<compile_context>
chip_gen: v5e
topology: v5e:2x2
jax: 0.10.0
libtpu: 0.0.40
codegen_flags: <defaults>
</compile_context>

<pallas_src>
import jax
import jax.numpy as jnp
from jax.experimental import pallas as pl
from jax.experimental.pallas import tpu as pltpu

# ------------------------- model configuration (small) -----------------------
IMG = 16            # img_size
PATCH = 4           # patch_size
IN_CHANS = 3
NUM_CLASSES = 10
EMBED = 32          # embed_dim (divisible by 8)
DEPTH = 4
BREAK = DEPTH // 2  # octic_equi_break_layer = depth // 2
HEADS = 4
HD = EMBED // HEADS
MLP_HIDDEN = int(EMBED * 4.0)
INIT_SCALE = 1e-4
D8 = EMBED // 8
SQRT2_OVER_2 = 0.7071067811865476
LN_EPS = 1e-6

GRID_H = IMG // PATCH
N_PATCH = GRID_H * GRID_H
NT = N_PATCH + 1                      # tokens incl. cls
CPP = IN_CHANS * PATCH * PATCH        # flattened patch size

# Row indices inside the packed per-block vector slab (DEPTH, VROWS, 128).
R_N1W, R_N1B, R_PROJB, R_LS1, R_N2W, R_N2B, R_FC1B, R_FC2B, R_LS2 = range(9)
VROWS = 9
# Row indices inside the packed "final" slab (FROWS, 128).
F_NORMW, F_NORMB, F_HEADB = range(3)
FROWS = 3
LANES = 128


# =============================== Pallas kernel ================================

def _vit_kernel(patches_ref, pew_ref, add_ref,
                qkvw_ref, projw_ref, fc1w_ref, fc2w_ref,
                vec_ref, fin_ref, headw_ref,
                out_ref, ohead_scr):
    """Entire forward pass for one image per grid step (grid=(B,), 'parallel')."""
    scale = HD ** -0.5

    # ---- fused patch embed + pos embed + cls prepend -----------------------
    # patches row 0 is all zeros, so the cls row just takes add_ref's cls values.
    x = add_ref[...] + jnp.dot(patches_ref[...], pew_ref[...],
                               preferred_element_type=jnp.float32)      # (NT, D)

    def norm(z, w, b, use_mean):
        # TODO(synk): LayerNormD8's exact equivariant normalization is
        # approximated by an RMS-style norm (no mean subtraction) for the octic
        # blocks (d < BREAK).
        if use_mean:
            z = z - jnp.mean(z, axis=-1, keepdims=True)
        var = jnp.mean(z * z, axis=-1, keepdims=True)
        return z * jax.lax.rsqrt(var + LN_EPS) * w + b

    # ---- all transformer blocks: static in-kernel depth loop ---------------
    for d in range(DEPTH):
        use_mean = d >= BREAK                  # static: octic vs standard block
        vecs = vec_ref[d]                      # (VROWS, 128)
        n1w = vecs[R_N1W:R_N1W + 1, :EMBED]
        n1b = vecs[R_N1B:R_N1B + 1, :EMBED]
        projb = vecs[R_PROJB:R_PROJB + 1, :EMBED]
        ls1 = vecs[R_LS1:R_LS1 + 1, :EMBED]
        n2w = vecs[R_N2W:R_N2W + 1, :EMBED]
        n2b = vecs[R_N2B:R_N2B + 1, :EMBED]
        fc1b = vecs[R_FC1B:R_FC1B + 1, :MLP_HIDDEN]
        fc2b = vecs[R_FC2B:R_FC2B + 1, :EMBED]
        ls2 = vecs[R_LS2:R_LS2 + 1, :EMBED]

        # ------------------------------ attention ---------------------------
        h = norm(x, n1w, n1b, use_mean)
        # Single fused qkv matmul; qkv_bias=False in the reference model.
        qkv = jnp.dot(h, qkvw_ref[d], preferred_element_type=jnp.float32)  # (NT, 3D)
        q_all = qkv[:, 0:EMBED] * scale
        k_all = qkv[:, EMBED:2 * EMBED]
        v_all = qkv[:, 2 * EMBED:3 * EMBED]
        for hh in range(HEADS):
            lo, hi = hh * HD, (hh + 1) * HD
            q = q_all[:, lo:hi]
            k = k_all[:, lo:hi]
            v = v_all[:, lo:hi]
            s = jax.lax.dot_general(q, k, (((1,), (1,)), ((), ())),
                                    preferred_element_type=jnp.float32)    # (NT, NT)
            s = s - jnp.max(s, axis=-1, keepdims=True)
            p = jnp.exp(s)
            p = p * pl.reciprocal(jnp.sum(p, axis=-1, keepdims=True), approx=True)
            # Per-head output goes into its static lane slot of the scratch so
            # the proj matmul below is a single K=EMBED matmul.
            ohead_scr[:, lo:hi] = jnp.dot(p, v, preferred_element_type=jnp.float32)
        attn = jnp.dot(ohead_scr[...], projw_ref[d],
                       preferred_element_type=jnp.float32) + projb
        x = x + ls1 * attn                      # residual + LayerScale

        # -------------------------------- MLP -------------------------------
        h = norm(x, n2w, n2b, use_mean)
        h = jnp.dot(h, fc1w_ref[d], preferred_element_type=jnp.float32) + fc1b
        # TODO(synk): exact-erf nn.GELU / TritonGeluD8 approximated with tanh GELU.
        h = jax.nn.gelu(h, approximate=True)
        m = jnp.dot(h, fc2w_ref[d], preferred_element_type=jnp.float32) + fc2b
        x = x + ls2 * m

    # ---- final LayerNorm (cls row only) + classification head --------------
    fin = fin_ref[...]
    cls = x[0:1, :]
    mu = jnp.mean(cls, axis=-1, keepdims=True)
    cc = cls - mu
    var = jnp.mean(cc * cc, axis=-1, keepdims=True)
    cls_n = (cc * jax.lax.rsqrt(var + LN_EPS) * fin[F_NORMW:F_NORMW + 1, :EMBED]
             + fin[F_NORMB:F_NORMB + 1, :EMBED])
    out_ref[...] = (jnp.dot(cls_n, headw_ref[...], preferred_element_type=jnp.float32)
                    + fin[F_HEADB:F_HEADB + 1, :NUM_CLASSES])


# =============================== model glue ===================================

def build_additive_tokens(params, gh, gw):
    """(NT, D) additive token init: row 0 = cls tokens, rows 1..N = pos + pe_b."""
    # TODO(synk): isotypic_dim_interpolation / interpolate_spatial_tuple irrep
    # sign structure is approximated by symmetric mirror tiling of the
    # quarter-grid positional parameters.
    pe = params["pos_embed"]          # 6 x (gh//2, gw//2, D8)

    def mirror(p):
        p = jnp.concatenate([p, p[::-1]], axis=0)
        p = jnp.concatenate([p, p[:, ::-1]], axis=1)
        return p

    ones = [mirror(pe[i]).reshape(gh * gw, D8) for i in range(4)]
    e1, e2 = mirror(pe[4]), mirror(pe[5])
    c0 = jnp.concatenate([e1, e2], axis=-1)                  # (gh, gw, D/4)
    c1 = jnp.concatenate([e1[:, ::-1], e2[:, ::-1]], axis=-1)
    two = jnp.stack([c0, c1], axis=2).reshape(gh * gw, EMBED // 2)
    pos_flat = jnp.concatenate(ones + [two], axis=-1)        # (N, D)

    cls = params["cls"]
    cls_flat = jnp.concatenate([cls[i].reshape(1, -1) for i in range(5)], axis=-1)

    return jnp.concatenate([cls_flat, pos_flat + params["pe_b"][None, :]], axis=0)


def octic_vit_forward(params, x):
    """Full OcticVisionTransformer forward (global_pool=False, invariant=False,
    num_register_tokens=0, dropout=0) in one fused pallas_call."""
    B, C, H, W = x.shape
    gh, gw = H // PATCH, W // PATCH
    N = gh * gw

    # TODO(synk): PatchEmbedD8's explicit D8 lifting of each patch is replaced
    # by a plain patchify + dense projection (weights are synthetic anyway).
    patches = (x.reshape(B, C, gh, PATCH, gw, PATCH)
                 .transpose(0, 2, 4, 1, 3, 5)
                 .reshape(B, N, CPP))
    # Leading all-zero row -> the cls token picks up only the additive init.
    patches = jnp.concatenate(
        [jnp.zeros((B, 1, CPP), jnp.float32), patches], axis=1)     # (B, NT, CPP)

    add_tok = build_additive_tokens(params, gh, gw)                 # (NT, D)

    blk = params["blk"]
    out = pl.pallas_call(
        _vit_kernel,
        out_shape=jax.ShapeDtypeStruct((B, 1, NUM_CLASSES), jnp.float32),
        grid=(B,),
        in_specs=[
            pl.BlockSpec((None, NT, CPP), lambda b: (b, 0, 0)),              # patches
            pl.BlockSpec((CPP, EMBED), lambda b: (0, 0)),                    # pe_w
            pl.BlockSpec((NT, EMBED), lambda b: (0, 0)),                     # cls+pos
            pl.BlockSpec((DEPTH, EMBED, 3 * EMBED), lambda b: (0, 0, 0)),    # qkv_w
            pl.BlockSpec((DEPTH, EMBED, EMBED), lambda b: (0, 0, 0)),        # proj_w
            pl.BlockSpec((DEPTH, EMBED, MLP_HIDDEN), lambda b: (0, 0, 0)),   # fc1_w
            pl.BlockSpec((DEPTH, MLP_HIDDEN, EMBED), lambda b: (0, 0, 0)),   # fc2_w
            pl.BlockSpec((DEPTH, VROWS, LANES), lambda b: (0, 0, 0)),        # vec slab
            pl.BlockSpec((FROWS, LANES), lambda b: (0, 0)),                  # fin slab
            pl.BlockSpec((EMBED, NUM_CLASSES), lambda b: (0, 0)),            # head_w
        ],
        out_specs=pl.BlockSpec((None, 1, NUM_CLASSES), lambda b: (b, 0, 0)),
        scratch_shapes=[pltpu.VMEM((NT, EMBED), jnp.float32)],               # head outs
        compiler_params=pltpu.CompilerParams(
            dimension_semantics=("parallel",)),
    )(patches, params["pe_w"], add_tok,
      blk["qkv_w"], blk["proj_w"], blk["fc1_w"], blk["fc2_w"], blk["vec"],
      params["fin"], params["head_w"])
    return out.reshape(B, NUM_CLASSES)


# ============================ parameter init ==================================

def trunc_normal(key, shape, std):
    return (std * jax.random.truncated_normal(key, -2.0, 2.0, shape)).astype(jnp.float32)


def init_params(key):
    keys = iter(jax.random.split(key, 16))
    p = {}
    p["pe_w"] = trunc_normal(next(keys), (CPP, EMBED), 0.02)
    p["pe_b"] = jnp.zeros((EMBED,), jnp.float32)

    std_tok = 8 * 0.02
    half = IMG // PATCH // 2
    p["pos_embed"] = [
        trunc_normal(next(keys), (half, half, D8), SQRT2_OVER_2 * std_tok)
        for _ in range(6)
    ]

    cls = [trunc_normal(next(keys), (1, 1, D8), std_tok)]
    cls += [jnp.zeros((1, 1, D8), jnp.float32) for _ in range(3)]
    cls += [jnp.zeros((1, 1, 2, EMBED // 4), jnp.float32)]
    p["cls"] = cls

    # Per-block matmul weights stacked along a leading depth axis; all the tiny
    # per-block vectors are packed into one (DEPTH, VROWS, 128) slab so the
    # fused kernel has few operands.  qkv_bias=False -> no qkv bias parameter.
    vec = jnp.zeros((DEPTH, VROWS, LANES), jnp.float32)
    vec = vec.at[:, R_N1W, :EMBED].set(1.0)        # norm1 weight
    vec = vec.at[:, R_LS1, :EMBED].set(INIT_SCALE)  # layer-scale 1
    vec = vec.at[:, R_N2W, :EMBED].set(1.0)        # norm2 weight
    vec = vec.at[:, R_LS2, :EMBED].set(INIT_SCALE)  # layer-scale 2
    # n1_b, proj_b, n2_b, fc1_b, fc2_b rows stay zero (matches nn.init).

    p["blk"] = {
        "qkv_w": trunc_normal(next(keys), (DEPTH, EMBED, 3 * EMBED), 0.02),
        "proj_w": trunc_normal(next(keys), (DEPTH, EMBED, EMBED), 0.02),
        "fc1_w": trunc_normal(next(keys), (DEPTH, EMBED, MLP_HIDDEN), 0.02),
        "fc2_w": trunc_normal(next(keys), (DEPTH, MLP_HIDDEN, EMBED), 0.02),
        "vec": vec,
    }

    fin = jnp.zeros((FROWS, LANES), jnp.float32)
    fin = fin.at[F_NORMW, :EMBED].set(1.0)          # final LayerNorm weight
    p["fin"] = fin
    p["head_w"] = trunc_normal(next(keys), (EMBED, NUM_CLASSES), 0.02)
    return p


# =================================== main =====================================

if __name__ == "__main__":
    key = jax.random.PRNGKey(0)
    pkey, xkey = jax.random.split(key)
    params = init_params(pkey)
    x = jax.random.normal(xkey, (2, IN_CHANS, IMG, IMG), dtype=jnp.float32)

    out = jax.jit(octic_vit_forward)(params, x)
    out = jax.block_until_ready(out)
    assert out.shape == (2, NUM_CLASSES), out.shape
    assert bool(jnp.all(jnp.isfinite(out)))
    print("KERNEL_OK")
</pallas_src>

<mosaic_0001>
module attributes {stable_mosaic.version = 11 : i64} {
  func.func @_vit_kernel(%arg0: i32, %arg1: memref<1x17x48xf32, #tpu.memory_space<vmem>>, %arg2: memref<48x32xf32, #tpu.memory_space<vmem>>, %arg3: memref<17x32xf32, #tpu.memory_space<vmem>>, %arg4: memref<4x32x96xf32, #tpu.memory_space<vmem>>, %arg5: memref<4x32x32xf32, #tpu.memory_space<vmem>>, %arg6: memref<4x32x128xf32, #tpu.memory_space<vmem>>, %arg7: memref<4x128x32xf32, #tpu.memory_space<vmem>>, %arg8: memref<4x9x128xf32, #tpu.memory_space<vmem>>, %arg9: memref<3x128xf32, #tpu.memory_space<vmem>>, %arg10: memref<32x10xf32, #tpu.memory_space<vmem>>, %arg11: memref<1x1x10xf32, #tpu.memory_space<vmem>>, %arg12: memref<17x32xf32, #tpu.memory_space<vmem>>) attributes {dimension_semantics = [#tpu.dimension_semantics<parallel>], iteration_bounds = array<i64: 2>, scalar_prefetch = 0 : i64, scratch_operands = 1 : i64, tpu.core_type = #tpu.core_type<tc>, window_params = [{transform_indices = @transform_0, window_bounds = array<i64: 1, 17, 48>}, {pipeline_mode = #tpu.pipeline_mode<synchronous>, transform_indices = @transform_1, window_bounds = array<i64: 48, 32>}, {pipeline_mode = #tpu.pipeline_mode<synchronous>, transform_indices = @transform_2, window_bounds = array<i64: 17, 32>}, {pipeline_mode = #tpu.pipeline_mode<synchronous>, transform_indices = @transform_3, window_bounds = array<i64: 4, 32, 96>}, {pipeline_mode = #tpu.pipeline_mode<synchronous>, transform_indices = @transform_4, window_bounds = array<i64: 4, 32, 32>}, {pipeline_mode = #tpu.pipeline_mode<synchronous>, transform_indices = @transform_5, window_bounds = array<i64: 4, 32, 128>}, {pipeline_mode = #tpu.pipeline_mode<synchronous>, transform_indices = @transform_6, window_bounds = array<i64: 4, 128, 32>}, {pipeline_mode = #tpu.pipeline_mode<synchronous>, transform_indices = @transform_7, window_bounds = array<i64: 4, 9, 128>}, {pipeline_mode = #tpu.pipeline_mode<synchronous>, transform_indices = @transform_8, window_bounds = array<i64: 3, 128>}, {pipeline_mode = #tpu.pipeline_mode<synchronous>, transform_indices = @transform_9, window_bounds = array<i64: 32, 10>}, {transform_indices = @transform_10, window_bounds = array<i64: 1, 1, 10>}]} {
    %c0 = arith.constant 0 : index
    %c0_0 = arith.constant 0 : index
    %0 = vector.load %arg3[%c0, %c0_0] : memref<17x32xf32, #tpu.memory_space<vmem>>, vector<17x32xf32>
    %c0_1 = arith.constant 0 : index
    %c0_2 = arith.constant 0 : index
    %c0_3 = arith.constant 0 : index
    %1 = vector.load %arg1[%c0_1, %c0_2, %c0_3] : memref<1x17x48xf32, #tpu.memory_space<vmem>>, vector<1x17x48xf32>
    %2 = vector.shape_cast %1 : vector<1x17x48xf32> to vector<17x48xf32>
    %c0_4 = arith.constant 0 : index
    %c0_5 = arith.constant 0 : index
    %3 = vector.load %arg2[%c0_4, %c0_5] : memref<48x32xf32, #tpu.memory_space<vmem>>, vector<48x32xf32>
    %cst = arith.constant dense<0.000000e+00> : vector<17x32xf32>
    %4 = tpu.matmul %2, %3, %cst {dimension_numbers = #tpu.dot_dimension_numbers<[1], [0], [0], [1], [0, 0, 1, 1], [], []>} : vector<17x48xf32>, vector<48x32xf32>, vector<17x32xf32> -> vector<17x32xf32>
    %5 = arith.addf %0, %4 : vector<17x32xf32>
    %c0_6 = arith.constant 0 : index
    %c0_7 = arith.constant 0 : index
    %c0_8 = arith.constant 0 : index
    %6 = vector.load %arg8[%c0_6, %c0_7, %c0_8] : memref<4x9x128xf32, #tpu.memory_space<vmem>>, vector<1x9x128xf32>
    %7 = vector.shape_cast %6 : vector<1x9x128xf32> to vector<9x128xf32>
    %8 = vector.extract_strided_slice %7 {offsets = [0, 0], sizes = [1, 32], strides = [1, 1]} : vector<9x128xf32> to vector<1x32xf32>
    %9 = vector.extract_strided_slice %7 {offsets = [1, 0], sizes = [1, 32], strides = [1, 1]} : vector<9x128xf32> to vector<1x32xf32>
    %10 = vector.extract_strided_slice %7 {offsets = [2, 0], sizes = [1, 32], strides = [1, 1]} : vector<9x128xf32> to vector<1x32xf32>
    %11 = vector.extract_strided_slice %7 {offsets = [3, 0], sizes = [1, 32], strides = [1, 1]} : vector<9x128xf32> to vector<1x32xf32>
    %12 = vector.extract_strided_slice %7 {offsets = [4, 0], sizes = [1, 32], strides = [1, 1]} : vector<9x128xf32> to vector<1x32xf32>
    %13 = vector.extract_strided_slice %7 {offsets = [5, 0], sizes = [1, 32], strides = [1, 1]} : vector<9x128xf32> to vector<1x32xf32>
    %14 = vector.extract_strided_slice %7 {offsets = [6, 0], sizes = [1, 128], strides = [1, 1]} : vector<9x128xf32> to vector<1x128xf32>
    %15 = vector.extract_strided_slice %7 {offsets = [7, 0], sizes = [1, 32], strides = [1, 1]} : vector<9x128xf32> to vector<1x32xf32>
    %16 = vector.extract_strided_slice %7 {offsets = [8, 0], sizes = [1, 32], strides = [1, 1]} : vector<9x128xf32> to vector<1x32xf32>
    %17 = arith.mulf %5, %5 : vector<17x32xf32>
    %cst_9 = arith.constant dense<0.000000e+00> : vector<17xf32>
    %18 = vector.multi_reduction <add>, %17, %cst_9 [1] : vector<17x32xf32> to vector<17xf32>
    %19 = vector.shape_cast %18 : vector<17xf32> to vector<17x1xf32>
    %cst_10 = arith.constant 3.200000e+01 : f32
    %20 = vector.broadcast %cst_10 : f32 to vector<17x1xf32>
    %21 = arith.divf %19, %20 : vector<17x1xf32>
    %cst_11 = arith.constant 9.99999997E-7 : f32
    %22 = vector.broadcast %cst_11 : f32 to vector<17x1xf32>
    %23 = arith.addf %21, %22 : vector<17x1xf32>
    %24 = math.rsqrt %23 : vector<17x1xf32>
    %25 = vector.broadcast %24 : vector<17x1xf32> to vector<17x32xf32>
    %26 = arith.mulf %5, %25 : vector<17x32xf32>
    %27 = vector.broadcast %8 : vector<1x32xf32> to vector<17x32xf32>
    %28 = arith.mulf %26, %27 : vector<17x32xf32>
    %29 = vector.broadcast %9 : vector<1x32xf32> to vector<17x32xf32>
    %30 = arith.addf %28, %29 : vector<17x32xf32>
    %c0_12 = arith.constant 0 : index
    %c0_13 = arith.constant 0 : index
    %c0_14 = arith.constant 0 : index
    %31 = vector.load %arg4[%c0_12, %c0_13, %c0_14] : memref<4x32x96xf32, #tpu.memory_space<vmem>>, vector<1x32x96xf32>
    %32 = vector.shape_cast %31 : vector<1x32x96xf32> to vector<32x96xf32>
    %cst_15 = arith.constant dense<0.000000e+00> : vector<17x96xf32>
    %33 = tpu.matmul %30, %32, %cst_15 {dimension_numbers = #tpu.dot_dimension_numbers<[1], [0], [0], [1], [0, 0, 1, 1], [], []>} : vector<17x32xf32>, vector<32x96xf32>, vector<17x96xf32> -> vector<17x96xf32>
    %34 = vector.extract_strided_slice %33 {offsets = [0, 0], sizes = [17, 32], strides = [1, 1]} : vector<17x96xf32> to vector<17x32xf32>
    %cst_16 = arith.constant 0.353553385 : f32
    %35 = vector.broadcast %cst_16 : f32 to vector<17x32xf32>
    %36 = arith.mulf %34, %35 : vector<17x32xf32>
    %37 = vector.extract_strided_slice %33 {offsets = [0, 32], sizes = [17, 32], strides = [1, 1]} : vector<17x96xf32> to vector<17x32xf32>
    %38 = vector.extract_strided_slice %33 {offsets = [0, 64], sizes = [17, 32], strides = [1, 1]} : vector<17x96xf32> to vector<17x32xf32>
    %39 = vector.extract_strided_slice %36 {offsets = [0, 0], sizes = [17, 8], strides = [1, 1]} : vector<17x32xf32> to vector<17x8xf32>
    %40 = vector.extract_strided_slice %37 {offsets = [0, 0], sizes = [17, 8], strides = [1, 1]} : vector<17x32xf32> to vector<17x8xf32>
    %41 = vector.extract_strided_slice %38 {offsets = [0, 0], sizes = [17, 8], strides = [1, 1]} : vector<17x32xf32> to vector<17x8xf32>
    %cst_17 = arith.constant dense<0.000000e+00> : vector<17x17xf32>
    %42 = tpu.matmul %39, %40, %cst_17 {dimension_numbers = #tpu.dot_dimension_numbers<[1], [1], [0], [0], [0, 0, 1, 0], [], []>} : vector<17x8xf32>, vector<17x8xf32>, vector<17x17xf32> -> vector<17x17xf32>
    %cst_18 = arith.constant dense<0xFF800000> : vector<17xf32>
    %43 = vector.multi_reduction <maximumf>, %42, %cst_18 [1] : vector<17x17xf32> to vector<17xf32>
    %44 = vector.shape_cast %43 : vector<17xf32> to vector<17x1xf32>
    %45 = vector.broadcast %44 : vector<17x1xf32> to vector<17x17xf32>
    %46 = arith.subf %42, %45 : vector<17x17xf32>
    %47 = math.exp %46 : vector<17x17xf32>
    %cst_19 = arith.constant dense<0.000000e+00> : vector<17xf32>
    %48 = vector.multi_reduction <add>, %47, %cst_19 [1] : vector<17x17xf32> to vector<17xf32>
    %49 = vector.shape_cast %48 : vector<17xf32> to vector<17x1xf32>
    %50 = tpu.reciprocal %49 {approx = true} : vector<17x1xf32> -> vector<17x1xf32>
    %51 = vector.broadcast %50 : vector<17x1xf32> to vector<17x17xf32>
    %52 = arith.mulf %47, %51 : vector<17x17xf32>
    %cst_20 = arith.constant dense<0.000000e+00> : vector<17x8xf32>
    %53 = tpu.matmul %52, %41, %cst_20 {dimension_numbers = #tpu.dot_dimension_numbers<[1], [0], [0], [1], [0, 0, 1, 1], [], []>} : vector<17x17xf32>, vector<17x8xf32>, vector<17x8xf32> -> vector<17x8xf32>
    %c0_21 = arith.constant 0 : index
    %c0_22 = arith.constant 0 : index
    %54 = vector.load %arg12[%c0_21, %c0_22] : memref<17x32xf32, #tpu.memory_space<vmem>>, vector<17x8xf32>
    tpu.vector_store %arg12[%c0_21, %c0_22], %53 {strides = array<i32>} : memref<17x32xf32, #tpu.memory_space<vmem>>, vector<17x8xf32>,
    %55 = vector.extract_strided_slice %36 {offsets = [0, 8], sizes = [17, 8], strides = [1, 1]} : vector<17x32xf32> to vector<17x8xf32>
    %56 = vector.extract_strided_slice %37 {offsets = [0, 8], sizes = [17, 8], strides = [1, 1]} : vector<17x32xf32> to vector<17x8xf32>
    %57 = vector.extract_strided_slice %38 {offsets = [0, 8], sizes = [17, 8], strides = [1, 1]} : vector<17x32xf32> to vector<17x8xf32>
    %cst_23 = arith.constant dense<0.000000e+00> : vector<17x17xf32>
    %58 = tpu.matmul %55, %56, %cst_23 {dimension_numbers = #tpu.dot_dimension_numbers<[1], [1], [0], [0], [0, 0, 1, 0], [], []>} : vector<17x8xf32>, vector<17x8xf32>, vector<17x17xf32> -> vector<17x17xf32>
    %cst_24 = arith.constant dense<0xFF800000> : vector<17xf32>
    %59 = vector.multi_reduction <maximumf>, %58, %cst_24 [1] : vector<17x17xf32> to vector<17xf32>
    %60 = vector.shape_cast %59 : vector<17xf32> to vector<17x1xf32>
    %61 = vector.broadcast %60 : vector<17x1xf32> to vector<17x17xf32>
    %62 = arith.subf %58, %61 : vector<17x17xf32>
    %63 = math.exp %62 : vector<17x17xf32>
    %cst_25 = arith.constant dense<0.000000e+00> : vector<17xf32>
    %64 = vector.multi_reduction <add>, %63, %cst_25 [1] : vector<17x17xf32> to vector<17xf32>
    %65 = vector.shape_cast %64 : vector<17xf32> to vector<17x1xf32>
    %66 = tpu.reciprocal %65 {approx = true} : vector<17x1xf32> -> vector<17x1xf32>
    %67 = vector.broadcast %66 : vector<17x1xf32> to vector<17x17xf32>
    %68 = arith.mulf %63, %67 : vector<17x17xf32>
    %cst_26 = arith.constant dense<0.000000e+00> : vector<17x8xf32>
    %69 = tpu.matmul %68, %57, %cst_26 {dimension_numbers = #tpu.dot_dimension_numbers<[1], [0], [0], [1], [0, 0, 1, 1], [], []>} : vector<17x17xf32>, vector<17x8xf32>, vector<17x8xf32> -> vector<17x8xf32>
    %c0_27 = arith.constant 0 : index
    %c8 = arith.constant 8 : index
    %70 = vector.load %arg12[%c0_27, %c8] : memref<17x32xf32, #tpu.memory_space<vmem>>, vector<17x8xf32>
    tpu.vector_store %arg12[%c0_27, %c8], %69 {strides = array<i32>} : memref<17x32xf32, #tpu.memory_space<vmem>>, vector<17x8xf32>,
    %71 = vector.extract_strided_slice %36 {offsets = [0, 16], sizes = [17, 8], strides = [1, 1]} : vector<17x32xf32> to vector<17x8xf32>
    %72 = vector.extract_strided_slice %37 {offsets = [0, 16], sizes = [17, 8], strides = [1, 1]} : vector<17x32xf32> to vector<17x8xf32>
    %73 = vector.extract_strided_slice %38 {offsets = [0, 16], sizes = [17, 8], strides = [1, 1]} : vector<17x32xf32> to vector<17x8xf32>
    %cst_28 = arith.constant dense<0.000000e+00> : vector<17x17xf32>
    %74 = tpu.matmul %71, %72, %cst_28 {dimension_numbers = #tpu.dot_dimension_numbers<[1], [1], [0], [0], [0, 0, 1, 0], [], []>} : vector<17x8xf32>, vector<17x8xf32>, vector<17x17xf32> -> vector<17x17xf32>
    %cst_29 = arith.constant dense<0xFF800000> : vector<17xf32>
    %75 = vector.multi_reduction <maximumf>, %74, %cst_29 [1] : vector<17x17xf32> to vector<17xf32>
    %76 = vector.shape_cast %75 : vector<17xf32> to vector<17x1xf32>
    %77 = vector.broadcast %76 : vector<17x1xf32> to vector<17x17xf32>
    %78 = arith.subf %74, %77 : vector<17x17xf32>
    %79 = math.exp %78 : vector<17x17xf32>
    %cst_30 = arith.constant dense<0.000000e+00> : vector<17xf32>
    %80 = vector.multi_reduction <add>, %79, %cst_30 [1] : vector<17x17xf32> to vector<17xf32>
    %81 = vector.shape_cast %80 : vector<17xf32> to vector<17x1xf32>
    %82 = tpu.reciprocal %81 {approx = true} : vector<17x1xf32> -> vector<17x1xf32>
    %83 = vector.broadcast %82 : vector<17x1xf32> to vector<17x17xf32>
    %84 = arith.mulf %79, %83 : vector<17x17xf32>
    %cst_31 = arith.constant dense<0.000000e+00> : vector<17x8xf32>
    %85 = tpu.matmul %84, %73, %cst_31 {dimension_numbers = #tpu.dot_dimension_numbers<[1], [0], [0], [1], [0, 0, 1, 1], [], []>} : vector<17x17xf32>, vector<17x8xf32>, vector<17x8xf32> -> vector<17x8xf32>
    %c0_32 = arith.constant 0 : index
    %c16 = arith.constant 16 : index
    %86 = vector.load %arg12[%c0_32, %c16] : memref<17x32xf32, #tpu.memory_space<vmem>>, vector<17x8xf32>
    tpu.vector_store %arg12[%c0_32, %c16], %85 {strides = array<i32>} : memref<17x32xf32, #tpu.memory_space<vmem>>, vector<17x8xf32>,
    %87 = vector.extract_strided_slice %36 {offsets = [0, 24], sizes = [17, 8], strides = [1, 1]} : vector<17x32xf32> to vector<17x8xf32>
    %88 = vector.extract_strided_slice %37 {offsets = [0, 24], sizes = [17, 8], strides = [1, 1]} : vector<17x32xf32> to vector<17x8xf32>
    %89 = vector.extract_strided_slice %38 {offsets = [0, 24], sizes = [17, 8], strides = [1, 1]} : vector<17x32xf32> to vector<17x8xf32>
    %cst_33 = arith.constant dense<0.000000e+00> : vector<17x17xf32>
    %90 = tpu.matmul %87, %88, %cst_33 {dimension_numbers = #tpu.dot_dimension_numbers<[1], [1], [0], [0], [0, 0, 1, 0], [], []>} : vector<17x8xf32>, vector<17x8xf32>, vector<17x17xf32> -> vector<17x17xf32>
    %cst_34 = arith.constant dense<0xFF800000> : vector<17xf32>
    %91 = vector.multi_reduction <maximumf>, %90, %cst_34 [1] : vector<17x17xf32> to vector<17xf32>
    %92 = vector.shape_cast %91 : vector<17xf32> to vector<17x1xf32>
    %93 = vector.broadcast %92 : vector<17x1xf32> to vector<17x17xf32>
    %94 = arith.subf %90, %93 : vector<17x17xf32>
    %95 = math.exp %94 : vector<17x17xf32>
    %cst_35 = arith.constant dense<0.000000e+00> : vector<17xf32>
    %96 = vector.multi_reduction <add>, %95, %cst_35 [1] : vector<17x17xf32> to vector<17xf32>
    %97 = vector.shape_cast %96 : vector<17xf32> to vector<17x1xf32>
    %98 = tpu.reciprocal %97 {approx = true} : vector<17x1xf32> -> vector<17x1xf32>
    %99 = vector.broadcast %98 : vector<17x1xf32> to vector<17x17xf32>
    %100 = arith.mulf %95, %99 : vector<17x17xf32>
    %cst_36 = arith.constant dense<0.000000e+00> : vector<17x8xf32>
    %101 = tpu.matmul %100, %89, %cst_36 {dimension_numbers = #tpu.dot_dimension_numbers<[1], [0], [0], [1], [0, 0, 1, 1], [], []>} : vector<17x17xf32>, vector<17x8xf32>, vector<17x8xf32> -> vector<17x8xf32>
    %c0_37 = arith.constant 0 : index
    %c24 = arith.constant 24 : index
    %102 = vector.load %arg12[%c0_37, %c24] : memref<17x32xf32, #tpu.memory_space<vmem>>, vector<17x8xf32>
    tpu.vector_store %arg12[%c0_37, %c24], %101 {strides = array<i32>} : memref<17x32xf32, #tpu.memory_space<vmem>>, vector<17x8xf32>,
    %c0_38 = arith.constant 0 : index
    %c0_39 = arith.constant 0 : index
    %103 = vector.load %arg12[%c0_38, %c0_39] : memref<17x32xf32, #tpu.memory_space<vmem>>, vector<17x32xf32>
    %c0_40 = arith.constant 0 : index
    %c0_41 = arith.constant 0 : index
    %c0_42 = arith.constant 0 : index
    %104 = vector.load %arg5[%c0_40, %c0_41, %c0_42] : memref<4x32x32xf32, #tpu.memory_space<vmem>>, vector<1x32x32xf32>
    %105 = vector.shape_cast %104 : vector<1x32x32xf32> to vector<32x32xf32>
    %cst_43 = arith.constant dense<0.000000e+00> : vector<17x32xf32>
    %106 = tpu.matmul %103, %105, %cst_43 {dimension_numbers = #tpu.dot_dimension_numbers<[1], [0], [0], [1], [0, 0, 1, 1], [], []>} : vector<17x32xf32>, vector<32x32xf32>, vector<17x32xf32> -> vector<17x32xf32>
    %107 = vector.broadcast %10 : vector<1x32xf32> to vector<17x32xf32>
    %108 = arith.addf %106, %107 : vector<17x32xf32>
    %109 = vector.broadcast %11 : vector<1x32xf32> to vector<17x32xf32>
    %110 = arith.mulf %109, %108 : vector<17x32xf32>
    %111 = arith.addf %5, %110 : vector<17x32xf32>
    %112 = arith.mulf %111, %111 : vector<17x32xf32>
    %cst_44 = arith.constant dense<0.000000e+00> : vector<17xf32>
    %113 = vector.multi_reduction <add>, %112, %cst_44 [1] : vector<17x32xf32> to vector<17xf32>
    %114 = vector.shape_cast %113 : vector<17xf32> to vector<17x1xf32>
    %cst_45 = arith.constant 3.200000e+01 : f32
    %115 = vector.broadcast %cst_45 : f32 to vector<17x1xf32>
    %116 = arith.divf %114, %115 : vector<17x1xf32>
    %cst_46 = arith.constant 9.99999997E-7 : f32
    %117 = vector.broadcast %cst_46 : f32 to vector<17x1xf32>
    %118 = arith.addf %116, %117 : vector<17x1xf32>
    %119 = math.rsqrt %118 : vector<17x1xf32>
    %120 = vector.broadcast %119 : vector<17x1xf32> to vector<17x32xf32>
    %121 = arith.mulf %111, %120 : vector<17x32xf32>
    %122 = vector.broadcast %12 : vector<1x32xf32> to vector<17x32xf32>
    %123 = arith.mulf %121, %122 : vector<17x32xf32>
    %124 = vector.broadcast %13 : vector<1x32xf32> to vector<17x32xf32>
    %125 = arith.addf %123, %124 : vector<17x32xf32>
    %c0_47 = arith.constant 0 : index
    %c0_48 = arith.constant 0 : index
    %c0_49 = arith.constant 0 : index
    %126 = vector.load %arg6[%c0_47, %c0_48, %c0_49] : memref<4x32x128xf32, #tpu.memory_space<vmem>>, vector<1x32x128xf32>
    %127 = vector.shape_cast %126 : vector<1x32x128xf32> to vector<32x128xf32>
    %cst_50 = arith.constant dense<0.000000e+00> : vector<17x128xf32>
    %128 = tpu.matmul %125, %127, %cst_50 {dimension_numbers = #tpu.dot_dimension_numbers<[1], [0], [0], [1], [0, 0, 1, 1], [], []>} : vector<17x32xf32>, vector<32x128xf32>, vector<17x128xf32> -> vector<17x128xf32>
    %129 = vector.broadcast %14 : vector<1x128xf32> to vector<17x128xf32>
    %130 = arith.addf %128, %129 : vector<17x128xf32>
    %131 = arith.mulf %130, %130 : vector<17x128xf32>
    %132 = arith.mulf %130, %131 : vector<17x128xf32>
    %cst_51 = arith.constant 4.471500e-02 : f32
    %133 = vector.broadcast %cst_51 : f32 to vector<17x128xf32>
    %134 = arith.mulf %133, %132 : vector<17x128xf32>
    %135 = arith.addf %130, %134 : vector<17x128xf32>
    %cst_52 = arith.constant 0.797884583 : f32
    %136 = vector.broadcast %cst_52 : f32 to vector<17x128xf32>
    %137 = arith.mulf %136, %135 : vector<17x128xf32>
    %138 = math.tanh %137 : vector<17x128xf32>
    %cst_53 = arith.constant 1.000000e+00 : f32
    %139 = vector.broadcast %cst_53 : f32 to vector<17x128xf32>
    %140 = arith.addf %139, %138 : vector<17x128xf32>
    %cst_54 = arith.constant 5.000000e-01 : f32
    %141 = vector.broadcast %cst_54 : f32 to vector<17x128xf32>
    %142 = arith.mulf %141, %140 : vector<17x128xf32>
    %143 = arith.mulf %130, %142 : vector<17x128xf32>
    %c0_55 = arith.constant 0 : index
    %c0_56 = arith.constant 0 : index
    %c0_57 = arith.constant 0 : index
    %144 = vector.load %arg7[%c0_55, %c0_56, %c0_57] : memref<4x128x32xf32, #tpu.memory_space<vmem>>, vector<1x128x32xf32>
    %145 = vector.shape_cast %144 : vector<1x128x32xf32> to vector<128x32xf32>
    %cst_58 = arith.constant dense<0.000000e+00> : vector<17x32xf32>
    %146 = tpu.matmul %143, %145, %cst_58 {dimension_numbers = #tpu.dot_dimension_numbers<[1], [0], [0], [1], [0, 0, 1, 1], [], []>} : vector<17x128xf32>, vector<128x32xf32>, vector<17x32xf32> -> vector<17x32xf32>
    %147 = vector.broadcast %15 : vector<1x32xf32> to vector<17x32xf32>
    %148 = arith.addf %146, %147 : vector<17x32xf32>
    %149 = vector.broadcast %16 : vector<1x32xf32> to vector<17x32xf32>
    %150 = arith.mulf %149, %148 : vector<17x32xf32>
    %151 = arith.addf %111, %150 : vector<17x32xf32>
    %c1 = arith.constant 1 : index
    %c0_59 = arith.constant 0 : index
    %c0_60 = arith.constant 0 : index
    %152 = vector.load %arg8[%c1, %c0_59, %c0_60] : memref<4x9x128xf32, #tpu.memory_space<vmem>>, vector<1x9x128xf32>
    %153 = vector.shape_cast %152 : vector<1x9x128xf32> to vector<9x128xf32>
    %154 = vector.extract_strided_slice %153 {offsets = [0, 0], sizes = [1, 32], strides = [1, 1]} : vector<9x128xf32> to vector<1x32xf32>
    %155 = vector.extract_strided_slice %153 {offsets = [1, 0], sizes = [1, 32], strides = [1, 1]} : vector<9x128xf32> to vector<1x32xf32>
    %156 = vector.extract_strided_slice %153 {offsets = [2, 0], sizes = [1, 32], strides = [1, 1]} : vector<9x128xf32> to vector<1x32xf32>
    %157 = vector.extract_strided_slice %153 {offsets = [3, 0], sizes = [1, 32], strides = [1, 1]} : vector<9x128xf32> to vector<1x32xf32>
    %158 = vector.extract_strided_slice %153 {offsets = [4, 0], sizes = [1, 32], strides = [1, 1]} : vector<9x128xf32> to vector<1x32xf32>
    %159 = vector.extract_strided_slice %153 {offsets = [5, 0], sizes = [1, 32], strides = [1, 1]} : vector<9x128xf32> to vector<1x32xf32>
    %160 = vector.extract_strided_slice %153 {offsets = [6, 0], sizes = [1, 128], strides = [1, 1]} : vector<9x128xf32> to vector<1x128xf32>
    %161 = vector.extract_strided_slice %153 {offsets = [7, 0], sizes = [1, 32], strides = [1, 1]} : vector<9x128xf32> to vector<1x32xf32>
    %162 = vector.extract_strided_slice %153 {offsets = [8, 0], sizes = [1, 32], strides = [1, 1]} : vector<9x128xf32> to vector<1x32xf32>
    %163 = arith.mulf %151, %151 : vector<17x32xf32>
    %cst_61 = arith.constant dense<0.000000e+00> : vector<17xf32>
    %164 = vector.multi_reduction <add>, %163, %cst_61 [1] : vector<17x32xf32> to vector<17xf32>
    %165 = vector.shape_cast %164 : vector<17xf32> to vector<17x1xf32>
    %cst_62 = arith.constant 3.200000e+01 : f32
    %166 = vector.broadcast %cst_62 : f32 to vector<17x1xf32>
    %167 = arith.divf %165, %166 : vector<17x1xf32>
    %cst_63 = arith.constant 9.99999997E-7 : f32
    %168 = vector.broadcast %cst_63 : f32 to vector<17x1xf32>
    %169 = arith.addf %167, %168 : vector<17x1xf32>
    %170 = math.rsqrt %169 : vector<17x1xf32>
    %171 = vector.broadcast %170 : vector<17x1xf32> to vector<17x32xf32>
    %172 = arith.mulf %151, %171 : vector<17x32xf32>
    %173 = vector.broadcast %154 : vector<1x32xf32> to vector<17x32xf32>
    %174 = arith.mulf %172, %173 : vector<17x32xf32>
    %175 = vector.broadcast %155 : vector<1x32xf32> to vector<17x32xf32>
    %176 = arith.addf %174, %175 : vector<17x32xf32>
    %c1_64 = arith.constant 1 : index
    %c0_65 = arith.constant 0 : index
    %c0_66 = arith.constant 0 : index
    %177 = vector.load %arg4[%c1_64, %c0_65, %c0_66] : memref<4x32x96xf32, #tpu.memory_space<vmem>>, vector<1x32x96xf32>
    %178 = vector.shape_cast %177 : vector<1x32x96xf32> to vector<32x96xf32>
    %cst_67 = arith.constant dense<0.000000e+00> : vector<17x96xf32>
    %179 = tpu.matmul %176, %178, %cst_67 {dimension_numbers = #tpu.dot_dimension_numbers<[1], [0], [0], [1], [0, 0, 1, 1], [], []>} : vector<17x32xf32>, vector<32x96xf32>, vector<17x96xf32> -> vector<17x96xf32>
    %180 = vector.extract_strided_slice %179 {offsets = [0, 0], sizes = [17, 32], strides = [1, 1]} : vector<17x96xf32> to vector<17x32xf32>
    %cst_68 = arith.constant 0.353553385 : f32
    %181 = vector.broadcast %cst_68 : f32 to vector<17x32xf32>
    %182 = arith.mulf %180, %181 : vector<17x32xf32>
    %183 = vector.extract_strided_slice %179 {offsets = [0, 32], sizes = [17, 32], strides = [1, 1]} : vector<17x96xf32> to vector<17x32xf32>
    %184 = vector.extract_strided_slice %179 {offsets = [0, 64], sizes = [17, 32], strides = [1, 1]} : vector<17x96xf32> to vector<17x32xf32>
    %185 = vector.extract_strided_slice %182 {offsets = [0, 0], sizes = [17, 8], strides = [1, 1]} : vector<17x32xf32> to vector<17x8xf32>
    %186 = vector.extract_strided_slice %183 {offsets = [0, 0], sizes = [17, 8], strides = [1, 1]} : vector<17x32xf32> to vector<17x8xf32>
    %187 = vector.extract_strided_slice %184 {offsets = [0, 0], sizes = [17, 8], strides = [1, 1]} : vector<17x32xf32> to vector<17x8xf32>
    %cst_69 = arith.constant dense<0.000000e+00> : vector<17x17xf32>
    %188 = tpu.matmul %185, %186, %cst_69 {dimension_numbers = #tpu.dot_dimension_numbers<[1], [1], [0], [0], [0, 0, 1, 0], [], []>} : vector<17x8xf32>, vector<17x8xf32>, vector<17x17xf32> -> vector<17x17xf32>
    %cst_70 = arith.constant dense<0xFF800000> : vector<17xf32>
    %189 = vector.multi_reduction <maximumf>, %188, %cst_70 [1] : vector<17x17xf32> to vector<17xf32>
    %190 = vector.shape_cast %189 : vector<17xf32> to vector<17x1xf32>
    %191 = vector.broadcast %190 : vector<17x1xf32> to vector<17x17xf32>
    %192 = arith.subf %188, %191 : vector<17x17xf32>
    %193 = math.exp %192 : vector<17x17xf32>
    %cst_71 = arith.constant dense<0.000000e+00> : vector<17xf32>
    %194 = vector.multi_reduction <add>, %193, %cst_71 [1] : vector<17x17xf32> to vector<17xf32>
    %195 = vector.shape_cast %194 : vector<17xf32> to vector<17x1xf32>
    %196 = tpu.reciprocal %195 {approx = true} : vector<17x1xf32> -> vector<17x1xf32>
    %197 = vector.broadcast %196 : vector<17x1xf32> to vector<17x17xf32>
    %198 = arith.mulf %193, %197 : vector<17x17xf32>
    %cst_72 = arith.constant dense<0.000000e+00> : vector<17x8xf32>
    %199 = tpu.matmul %198, %187, %cst_72 {dimension_numbers = #tpu.dot_dimension_numbers<[1], [0], [0], [1], [0, 0, 1, 1], [], []>} : vector<17x17xf32>, vector<17x8xf32>, vector<17x8xf32> -> vector<17x8xf32>
    %c0_73 = arith.constant 0 : index
    %c0_74 = arith.constant 0 : index
    %200 = vector.load %arg12[%c0_73, %c0_74] : memref<17x32xf32, #tpu.memory_space<vmem>>, vector<17x8xf32>
    tpu.vector_store %arg12[%c0_73, %c0_74], %199 {strides = array<i32>} : memref<17x32xf32, #tpu.memory_space<vmem>>, vector<17x8xf32>,
    %201 = vector.extract_strided_slice %182 {offsets = [0, 8], sizes = [17, 8], strides = [1, 1]} : vector<17x32xf32> to vector<17x8xf32>
    %202 = vector.extract_strided_slice %183 {offsets = [0, 8], sizes = [17, 8], strides = [1, 1]} : vector<17x32xf32> to vector<17x8xf32>
    %203 = vector.extract_strided_slice %184 {offsets = [0, 8], sizes = [17, 8], strides = [1, 1]} : vector<17x32xf32> to vector<17x8xf32>
    %cst_75 = arith.constant dense<0.000000e+00> : vector<17x17xf32>
    %204 = tpu.matmul %201, %202, %cst_75 {dimension_numbers = #tpu.dot_dimension_numbers<[1], [1], [0], [0], [0, 0, 1, 0], [], []>} : vector<17x8xf32>, vector<17x8xf32>, vector<17x17xf32> -> vector<17x17xf32>
    %cst_76 = arith.constant dense<0xFF800000> : vector<17xf32>
    %205 = vector.multi_reduction <maximumf>, %204, %cst_76 [1] : vector<17x17xf32> to vector<17xf32>
    %206 = vector.shape_cast %205 : vector<17xf32> to vector<17x1xf32>
    %207 = vector.broadcast %206 : vector<17x1xf32> to vector<17x17xf32>
    %208 = arith.subf %204, %207 : vector<17x17xf32>
    %209 = math.exp %208 : vector<17x17xf32>
    %cst_77 = arith.constant dense<0.000000e+00> : vector<17xf32>
    %210 = vector.multi_reduction <add>, %209, %cst_77 [1] : vector<17x17xf32> to vector<17xf32>
    %211 = vector.shape_cast %210 : vector<17xf32> to vector<17x1xf32>
    %212 = tpu.reciprocal %211 {approx = true} : vector<17x1xf32> -> vector<17x1xf32>
    %213 = vector.broadcast %212 : vector<17x1xf32> to vector<17x17xf32>
    %214 = arith.mulf %209, %213 : vector<17x17xf32>
    %cst_78 = arith.constant dense<0.000000e+00> : vector<17x8xf32>
    %215 = tpu.matmul %214, %203, %cst_78 {dimension_numbers = #tpu.dot_dimension_numbers<[1], [0], [0], [1], [0, 0, 1, 1], [], []>} : vector<17x17xf32>, vector<17x8xf32>, vector<17x8xf32> -> vector<17x8xf32>
    %c0_79 = arith.constant 0 : index
    %c8_80 = arith.constant 8 : index
    %216 = vector.load %arg12[%c0_79, %c8_80] : memref<17x32xf32, #tpu.memory_space<vmem>>, vector<17x8xf32>
    tpu.vector_store %arg12[%c0_79, %c8_80], %215 {strides = array<i32>} : memref<17x32xf32, #tpu.memory_space<vmem>>, vector<17x8xf32>,
    %217 = vector.extract_strided_slice %182 {offsets = [0, 16], sizes = [17, 8], strides = [1, 1]} : vector<17x32xf32> to vector<17x8xf32>
    %218 = vector.extract_strided_slice %183 {offsets = [0, 16], sizes = [17, 8], strides = [1, 1]} : vector<17x32xf32> to vector<17x8xf32>
    %219 = vector.extract_strided_slice %184 {offsets = [0, 16], sizes = [17, 8], strides = [1, 1]} : vector<17x32xf32> to vector<17x8xf32>
    %cst_81 = arith.constant dense<0.000000e+00> : vector<17x17xf32>
    %220 = tpu.matmul %217, %218, %cst_81 {dimension_numbers = #tpu.dot_dimension_numbers<[1], [1], [0], [0], [0, 0, 1, 0], [], []>} : vector<17x8xf32>, vector<17x8xf32>, vector<17x17xf32> -> vector<17x17xf32>
    %cst_82 = arith.constant dense<0xFF800000> : vector<17xf32>
    %221 = vector.multi_reduction <maximumf>, %220, %cst_82 [1] : vector<17x17xf32> to vector<17xf32>
    %222 = vector.shape_cast %221 : vector<17xf32> to vector<17x1xf32>
    %223 = vector.broadcast %222 : vector<17x1xf32> to vector<17x17xf32>
    %224 = arith.subf %220, %223 : vector<17x17xf32>
    %225 = math.exp %224 : vector<17x17xf32>
    %cst_83 = arith.constant dense<0.000000e+00> : vector<17xf32>
    %226 = vector.multi_reduction <add>, %225, %cst_83 [1] : vector<17x17xf32> to vector<17xf32>
    %227 = vector.shape_cast %226 : vector<17xf32> to vector<17x1xf32>
    %228 = tpu.reciprocal %227 {approx = true} : vector<17x1xf32> -> vector<17x1xf32>
    %229 = vector.broadcast %228 : vector<17x1xf32> to vector<17x17xf32>
    %230 = arith.mulf %225, %229 : vector<17x17xf32>
    %cst_84 = arith.constant dense<0.000000e+00> : vector<17x8xf32>
    %231 = tpu.matmul %230, %219, %cst_84 {dimension_numbers = #tpu.dot_dimension_numbers<[1], [0], [0], [1], [0, 0, 1, 1], [], []>} : vector<17x17xf32>, vector<17x8xf32>, vector<17x8xf32> -> vector<17x8xf32>
    %c0_85 = arith.constant 0 : index
    %c16_86 = arith.constant 16 : index
    %232 = vector.load %arg12[%c0_85, %c16_86] : memref<17x32xf32, #tpu.memory_space<vmem>>, vector<17x8xf32>
    tpu.vector_store %arg12[%c0_85, %c16_86], %231 {strides = array<i32>} : memref<17x32xf32, #tpu.memory_space<vmem>>, vector<17x8xf32>,
    %233 = vector.extract_strided_slice %182 {offsets = [0, 24], sizes = [17, 8], strides = [1, 1]} : vector<17x32xf32> to vector<17x8xf32>
    %234 = vector.extract_strided_slice %183 {offsets = [0, 24], sizes = [17, 8], strides = [1, 1]} : vector<17x32xf32> to vector<17x8xf32>
    %235 = vector.extract_strided_slice %184 {offsets = [0, 24], sizes = [17, 8], strides = [1, 1]} : vector<17x32xf32> to vector<17x8xf32>
    %cst_87 = arith.constant dense<0.000000e+00> : vector<17x17xf32>
    %236 = tpu.matmul %233, %234, %cst_87 {dimension_numbers = #tpu.dot_dimension_numbers<[1], [1], [0], [0], [0, 0, 1, 0], [], []>} : vector<17x8xf32>, vector<17x8xf32>, vector<17x17xf32> -> vector<17x17xf32>
    %cst_88 = arith.constant dense<0xFF800000> : vector<17xf32>
    %237 = vector.multi_reduction <maximumf>, %236, %cst_88 [1] : vector<17x17xf32> to vector<17xf32>
    %238 = vector.shape_cast %237 : vector<17xf32> to vector<17x1xf32>
    %239 = vector.broadcast %238 : vector<17x1xf32> to vector<17x17xf32>
    %240 = arith.subf %236, %239 : vector<17x17xf32>
    %241 = math.exp %240 : vector<17x17xf32>
    %cst_89 = arith.constant dense<0.000000e+00> : vector<17xf32>
    %242 = vector.multi_reduction <add>, %241, %cst_89 [1] : vector<17x17xf32> to vector<17xf32>
    %243 = vector.shape_cast %242 : vector<17xf32> to vector<17x1xf32>
    %244 = tpu.reciprocal %243 {approx = true} : vector<17x1xf32> -> vector<17x1xf32>
    %245 = vector.broadcast %244 : vector<17x1xf32> to vector<17x17xf32>
    %246 = arith.mulf %241, %245 : vector<17x17xf32>
    %cst_90 = arith.constant dense<0.000000e+00> : vector<17x8xf32>
    %247 = tpu.matmul %246, %235, %cst_90 {dimension_numbers = #tpu.dot_dimension_numbers<[1], [0], [0], [1], [0, 0, 1, 1], [], []>} : vector<17x17xf32>, vector<17x8xf32>, vector<17x8xf32> -> vector<17x8xf32>
    %c0_91 = arith.constant 0 : index
    %c24_92 = arith.constant 24 : index
    %248 = vector.load %arg12[%c0_91, %c24_92] : memref<17x32xf32, #tpu.memory_space<vmem>>, vector<17x8xf32>
    tpu.vector_store %arg12[%c0_91, %c24_92], %247 {strides = array<i32>} : memref<17x32xf32, #tpu.memory_space<vmem>>, vector<17x8xf32>,
    %c0_93 = arith.constant 0 : index
    %c0_94 = arith.constant 0 : index
    %249 = vector.load %arg12[%c0_93, %c0_94] : memref<17x32xf32, #tpu.memory_space<vmem>>, vector<17x32xf32>
    %c1_95 = arith.constant 1 : index
    %c0_96 = arith.constant 0 : index
    %c0_97 = arith.constant 0 : index
    %250 = vector.load %arg5[%c1_95, %c0_96, %c0_97] : memref<4x32x32xf32, #tpu.memory_space<vmem>>, vector<1x32x32xf32>
    %251 = vector.shape_cast %250 : vector<1x32x32xf32> to vector<32x32xf32>
    %cst_98 = arith.constant dense<0.000000e+00> : vector<17x32xf32>
    %252 = tpu.matmul %249, %251, %cst_98 {dimension_numbers = #tpu.dot_dimension_numbers<[1], [0], [0], [1], [0, 0, 1, 1], [], []>} : vector<17x32xf32>, vector<32x32xf32>, vector<17x32xf32> -> vector<17x32xf32>
    %253 = vector.broadcast %156 : vector<1x32xf32> to vector<17x32xf32>
    %254 = arith.addf %252, %253 : vector<17x32xf32>
    %255 = vector.broadcast %157 : vector<1x32xf32> to vector<17x32xf32>
    %256 = arith.mulf %255, %254 : vector<17x32xf32>
    %257 = arith.addf %151, %256 : vector<17x32xf32>
    %258 = arith.mulf %257, %257 : vector<17x32xf32>
    %cst_99 = arith.constant dense<0.000000e+00> : vector<17xf32>
    %259 = vector.multi_reduction <add>, %258, %cst_99 [1] : vector<17x32xf32> to vector<17xf32>
    %260 = vector.shape_cast %259 : vector<17xf32> to vector<17x1xf32>
    %cst_100 = arith.constant 3.200000e+01 : f32
    %261 = vector.broadcast %cst_100 : f32 to vector<17x1xf32>
    %262 = arith.divf %260, %261 : vector<17x1xf32>
    %cst_101 = arith.constant 9.99999997E-7 : f32
    %263 = vector.broadcast %cst_101 : f32 to vector<17x1xf32>
    %264 = arith.addf %262, %263 : vector<17x1xf32>
    %265 = math.rsqrt %264 : vector<17x1xf32>
    %266 = vector.broadcast %265 : vector<17x1xf32> to vector<17x32xf32>
    %267 = arith.mulf %257, %266 : vector<17x32xf32>
    %268 = vector.broadcast %158 : vector<1x32xf32> to vector<17x32xf32>
    %269 = arith.mulf %267, %268 : vector<17x32xf32>
    %270 = vector.broadcast %159 : vector<1x32xf32> to vector<17x32xf32>
    %271 = arith.addf %269, %270 : vector<17x32xf32>
    %c1_102 = arith.constant 1 : index
    %c0_103 = arith.constant 0 : index
    %c0_104 = arith.constant 0 : index
    %272 = vector.load %arg6[%c1_102, %c0_103, %c0_104] : memref<4x32x128xf32, #tpu.memory_space<vmem>>, vector<1x32x128xf32>
    %273 = vector.shape_cast %272 : vector<1x32x128xf32> to vector<32x128xf32>
    %cst_105 = arith.constant dense<0.000000e+00> : vector<17x128xf32>
    %274 = tpu.matmul %271, %273, %cst_105 {dimension_numbers = #tpu.dot_dimension_numbers<[1], [0], [0], [1], [0, 0, 1, 1], [], []>} : vector<17x32xf32>, vector<32x128xf32>, vector<17x128xf32> -> vector<17x128xf32>
    %275 = vector.broadcast %160 : vector<1x128xf32> to vector<17x128xf32>
    %276 = arith.addf %274, %275 : vector<17x128xf32>
    %277 = arith.mulf %276, %276 : vector<17x128xf32>
    %278 = arith.mulf %276, %277 : vector<17x128xf32>
    %cst_106 = arith.constant 4.471500e-02 : f32
    %279 = vector.broadcast %cst_106 : f32 to vector<17x128xf32>
    %280 = arith.mulf %279, %278 : vector<17x128xf32>
    %281 = arith.addf %276, %280 : vector<17x128xf32>
    %cst_107 = arith.constant 0.797884583 : f32
    %282 = vector.broadcast %cst_107 : f32 to vector<17x128xf32>
    %283 = arith.mulf %282, %281 : vector<17x128xf32>
    %284 = math.tanh %283 : vector<17x128xf32>
    %cst_108 = arith.constant 1.000000e+00 : f32
    %285 = vector.broadcast %cst_108 : f32 to vector<17x128xf32>
    %286 = arith.addf %285, %284 : vector<17x128xf32>
    %cst_109 = arith.constant 5.000000e-01 : f32
    %287 = vector.broadcast %cst_109 : f32 to vector<17x128xf32>
    %288 = arith.mulf %287, %286 : vector<17x128xf32>
    %289 = arith.mulf %276, %288 : vector<17x128xf32>
    %c1_110 = arith.constant 1 : index
    %c0_111 = arith.constant 0 : index
    %c0_112 = arith.constant 0 : index
    %290 = vector.load %arg7[%c1_110, %c0_111, %c0_112] : memref<4x128x32xf32, #tpu.memory_space<vmem>>, vector<1x128x32xf32>
    %291 = vector.shape_cast %290 : vector<1x128x32xf32> to vector<128x32xf32>
    %cst_113 = arith.constant dense<0.000000e+00> : vector<17x32xf32>
    %292 = tpu.matmul %289, %291, %cst_113 {dimension_numbers = #tpu.dot_dimension_numbers<[1], [0], [0], [1], [0, 0, 1, 1], [], []>} : vector<17x128xf32>, vector<128x32xf32>, vector<17x32xf32> -> vector<17x32xf32>
    %293 = vector.broadcast %161 : vector<1x32xf32> to vector<17x32xf32>
    %294 = arith.addf %292, %293 : vector<17x32xf32>
    %295 = vector.broadcast %162 : vector<1x32xf32> to vector<17x32xf32>
    %296 = arith.mulf %295, %294 : vector<17x32xf32>
    %297 = arith.addf %257, %296 : vector<17x32xf32>
    %c2 = arith.constant 2 : index
    %c0_114 = arith.constant 0 : index
    %c0_115 = arith.constant 0 : index
    %298 = vector.load %arg8[%c2, %c0_114, %c0_115] : memref<4x9x128xf32, #tpu.memory_space<vmem>>, vector<1x9x128xf32>
    %299 = vector.shape_cast %298 : vector<1x9x128xf32> to vector<9x128xf32>
    %300 = vector.extract_strided_slice %299 {offsets = [0, 0], sizes = [1, 32], strides = [1, 1]} : vector<9x128xf32> to vector<1x32xf32>
    %301 = vector.extract_strided_slice %299 {offsets = [1, 0], sizes = [1, 32], strides = [1, 1]} : vector<9x128xf32> to vector<1x32xf32>
    %302 = vector.extract_strided_slice %299 {offsets = [2, 0], sizes = [1, 32], strides = [1, 1]} : vector<9x128xf32> to vector<1x32xf32>
    %303 = vector.extract_strided_slice %299 {offsets = [3, 0], sizes = [1, 32], strides = [1, 1]} : vector<9x128xf32> to vector<1x32xf32>
    %304 = vector.extract_strided_slice %299 {offsets = [4, 0], sizes = [1, 32], strides = [1, 1]} : vector<9x128xf32> to vector<1x32xf32>
    %305 = vector.extract_strided_slice %299 {offsets = [5, 0], sizes = [1, 32], strides = [1, 1]} : vector<9x128xf32> to vector<1x32xf32>
    %306 = vector.extract_strided_slice %299 {offsets = [6, 0], sizes = [1, 128], strides = [1, 1]} : vector<9x128xf32> to vector<1x128xf32>
    %307 = vector.extract_strided_slice %299 {offsets = [7, 0], sizes = [1, 32], strides = [1, 1]} : vector<9x128xf32> to vector<1x32xf32>
    %308 = vector.extract_strided_slice %299 {offsets = [8, 0], sizes = [1, 32], strides = [1, 1]} : vector<9x128xf32> to vector<1x32xf32>
    %cst_116 = arith.constant dense<0.000000e+00> : vector<17xf32>
    %309 = vector.multi_reduction <add>, %297, %cst_116 [1] : vector<17x32xf32> to vector<17xf32>
    %310 = vector.shape_cast %309 : vector<17xf32> to vector<17x1xf32>
    %cst_117 = arith.constant 3.200000e+01 : f32
    %311 = vector.broadcast %cst_117 : f32 to vector<17x1xf32>
    %312 = arith.divf %310, %311 : vector<17x1xf32>
    %313 = vector.broadcast %312 : vector<17x1xf32> to vector<17x32xf32>
    %314 = arith.subf %297, %313 : vector<17x32xf32>
    %315 = arith.mulf %314, %314 : vector<17x32xf32>
    %cst_118 = arith.constant dense<0.000000e+00> : vector<17xf32>
    %316 = vector.multi_reduction <add>, %315, %cst_118 [1] : vector<17x32xf32> to vector<17xf32>
    %317 = vector.shape_cast %316 : vector<17xf32> to vector<17x1xf32>
    %cst_119 = arith.constant 3.200000e+01 : f32
    %318 = vector.broadcast %cst_119 : f32 to vector<17x1xf32>
    %319 = arith.divf %317, %318 : vector<17x1xf32>
    %cst_120 = arith.constant 9.99999997E-7 : f32
    %320 = vector.broadcast %cst_120 : f32 to vector<17x1xf32>
    %321 = arith.addf %319, %320 : vector<17x1xf32>
    %322 = math.rsqrt %321 : vector<17x1xf32>
    %323 = vector.broadcast %322 : vector<17x1xf32> to vector<17x32xf32>
    %324 = arith.mulf %314, %323 : vector<17x32xf32>
    %325 = vector.broadcast %300 : vector<1x32xf32> to vector<17x32xf32>
    %326 = arith.mulf %324, %325 : vector<17x32xf32>
    %327 = vector.broadcast %301 : vector<1x32xf32> to vector<17x32xf32>
    %328 = arith.addf %326, %327 : vector<17x32xf32>
    %c2_121 = arith.constant 2 : index
    %c0_122 = arith.constant 0 : index
    %c0_123 = arith.constant 0 : index
    %329 = vector.load %arg4[%c2_121, %c0_122, %c0_123] : memref<4x32x96xf32, #tpu.memory_space<vmem>>, vector<1x32x96xf32>
    %330 = vector.shape_cast %329 : vector<1x32x96xf32> to vector<32x96xf32>
    %cst_124 = arith.constant dense<0.000000e+00> : vector<17x96xf32>
    %331 = tpu.matmul %328, %330, %cst_124 {dimension_numbers = #tpu.dot_dimension_numbers<[1], [0], [0], [1], [0, 0, 1, 1], [], []>} : vector<17x32xf32>, vector<32x96xf32>, vector<17x96xf32> -> vector<17x96xf32>
    %332 = vector.extract_strided_slice %331 {offsets = [0, 0], sizes = [17, 32], strides = [1, 1]} : vector<17x96xf32> to vector<17x32xf32>
    %cst_125 = arith.constant 0.353553385 : f32
    %333 = vector.broadcast %cst_125 : f32 to vector<17x32xf32>
    %334 = arith.mulf %332, %333 : vector<17x32xf32>
    %335 = vector.extract_strided_slice %331 {offsets = [0, 32], sizes = [17, 32], strides = [1, 1]} : vector<17x96xf32> to vector<17x32xf32>
    %336 = vector.extract_strided_slice %331 {offsets = [0, 64], sizes = [17, 32], strides = [1, 1]} : vector<17x96xf32> to vector<17x32xf32>
    %337 = vector.extract_strided_slice %334 {offsets = [0, 0], sizes = [17, 8], strides = [1, 1]} : vector<17x32xf32> to vector<17x8xf32>
    %338 = vector.extract_strided_slice %335 {offsets = [0, 0], sizes = [17, 8], strides = [1, 1]} : vector<17x32xf32> to vector<17x8xf32>
    %339 = vector.extract_strided_slice %336 {offsets = [0, 0], sizes = [17, 8], strides = [1, 1]} : vector<17x32xf32> to vector<17x8xf32>
    %cst_126 = arith.constant dense<0.000000e+00> : vector<17x17xf32>
    %340 = tpu.matmul %337, %338, %cst_126 {dimension_numbers = #tpu.dot_dimension_numbers<[1], [1], [0], [0], [0, 0, 1, 0], [], []>} : vector<17x8xf32>, vector<17x8xf32>, vector<17x17xf32> -> vector<17x17xf32>
    %cst_127 = arith.constant dense<0xFF800000> : vector<17xf32>
    %341 = vector.multi_reduction <maximumf>, %340, %cst_127 [1] : vector<17x17xf32> to vector<17xf32>
    %342 = vector.shape_cast %341 : vector<17xf32> to vector<17x1xf32>
    %343 = vector.broadcast %342 : vector<17x1xf32> to vector<17x17xf32>
    %344 = arith.subf %340, %343 : vector<17x17xf32>
    %345 = math.exp %344 : vector<17x17xf32>
    %cst_128 = arith.constant dense<0.000000e+00> : vector<17xf32>
    %346 = vector.multi_reduction <add>, %345, %cst_128 [1] : vector<17x17xf32> to vector<17xf32>
    %347 = vector.shape_cast %346 : vector<17xf32> to vector<17x1xf32>
    %348 = tpu.reciprocal %347 {approx = true} : vector<17x1xf32> -> vector<17x1xf32>
    %349 = vector.broadcast %348 : vector<17x1xf32> to vector<17x17xf32>
    %350 = arith.mulf %345, %349 : vector<17x17xf32>
    %cst_129 = arith.constant dense<0.000000e+00> : vector<17x8xf32>
    %351 = tpu.matmul %350, %339, %cst_129 {dimension_numbers = #tpu.dot_dimension_numbers<[1], [0], [0], [1], [0, 0, 1, 1], [], []>} : vector<17x17xf32>, vector<17x8xf32>, vector<17x8xf32> -> vector<17x8xf32>
    %c0_130 = arith.constant 0 : index
    %c0_131 = arith.constant 0 : index
    %352 = vector.load %arg12[%c0_130, %c0_131] : memref<17x32xf32, #tpu.memory_space<vmem>>, vector<17x8xf32>
    tpu.vector_store %arg12[%c0_130, %c0_131], %351 {strides = array<i32>} : memref<17x32xf32, #tpu.memory_space<vmem>>, vector<17x8xf32>,
    %353 = vector.extract_strided_slice %334 {offsets = [0, 8], sizes = [17, 8], strides = [1, 1]} : vector<17x32xf32> to vector<17x8xf32>
    %354 = vector.extract_strided_slice %335 {offsets = [0, 8], sizes = [17, 8], strides = [1, 1]} : vector<17x32xf32> to vector<17x8xf32>
    %355 = vector.extract_strided_slice %336 {offsets = [0, 8], sizes = [17, 8], strides = [1, 1]} : vector<17x32xf32> to vector<17x8xf32>
    %cst_132 = arith.constant dense<0.000000e+00> : vector<17x17xf32>
    %356 = tpu.matmul %353, %354, %cst_132 {dimension_numbers = #tpu.dot_dimension_numbers<[1], [1], [0], [0], [0, 0, 1, 0], [], []>} : vector<17x8xf32>, vector<17x8xf32>, vector<17x17xf32> -> vector<17x17xf32>
    %cst_133 = arith.constant dense<0xFF800000> : vector<17xf32>
    %357 = vector.multi_reduction <maximumf>, %356, %cst_133 [1] : vector<17x17xf32> to vector<17xf32>
    %358 = vector.shape_cast %357 : vector<17xf32> to vector<17x1xf32>
    %359 = vector.broadcast %358 : vector<17x1xf32> to vector<17x17xf32>
    %360 = arith.subf %356, %359 : vector<17x17xf32>
    %361 = math.exp %360 : vector<17x17xf32>
    %cst_134 = arith.constant dense<0.000000e+00> : vector<17xf32>
    %362 = vector.multi_reduction <add>, %361, %cst_134 [1] : vector<17x17xf32> to vector<17xf32>
    %363 = vector.shape_cast %362 : vector<17xf32> to vector<17x1xf32>
    %364 = tpu.reciprocal %363 {approx = true} : vector<17x1xf32> -> vector<17x1xf32>
    %365 = vector.broadcast %364 : vector<17x1xf32> to vector<17x17xf32>
    %366 = arith.mulf %361, %365 : vector<17x17xf32>
    %cst_135 = arith.constant dense<0.000000e+00> : vector<17x8xf32>
    %367 = tpu.matmul %366, %355, %cst_135 {dimension_numbers = #tpu.dot_dimension_numbers<[1], [0], [0], [1], [0, 0, 1, 1], [], []>} : vector<17x17xf32>, vector<17x8xf32>, vector<17x8xf32> -> vector<17x8xf32>
    %c0_136 = arith.constant 0 : index
    %c8_137 = arith.constant 8 : index
    %368 = vector.load %arg12[%c0_136, %c8_137] : memref<17x32xf32, #tpu.memory_space<vmem>>, vector<17x8xf32>
    tpu.vector_store %arg12[%c0_136, %c8_137], %367 {strides = array<i32>} : memref<17x32xf32, #tpu.memory_space<vmem>>, vector<17x8xf32>,
    %369 = vector.extract_strided_slice %334 {offsets = [0, 16], sizes = [17, 8], strides = [1, 1]} : vector<17x32xf32> to vector<17x8xf32>
    %370 = vector.extract_strided_slice %335 {offsets = [0, 16], sizes = [17, 8], strides = [1, 1]} : vector<17x32xf32> to vector<17x8xf32>
    %371 = vector.extract_strided_slice %336 {offsets = [0, 16], sizes = [17, 8], strides = [1, 1]} : vector<17x32xf32> to vector<17x8xf32>
    %cst_138 = arith.constant dense<0.000000e+00> : vector<17x17xf32>
    %372 = tpu.matmul %369, %370, %cst_138 {dimension_numbers = #tpu.dot_dimension_numbers<[1], [1], [0], [0], [0, 0, 1, 0], [], []>} : vector<17x8xf32>, vector<17x8xf32>, vector<17x17xf32> -> vector<17x17xf32>
    %cst_139 = arith.constant dense<0xFF800000> : vector<17xf32>
    %373 = vector.multi_reduction <maximumf>, %372, %cst_139 [1] : vector<17x17xf32> to vector<17xf32>
    %374 = vector.shape_cast %373 : vector<17xf32> to vector<17x1xf32>
    %375 = vector.broadcast %374 : vector<17x1xf32> to vector<17x17xf32>
    %376 = arith.subf %372, %375 : vector<17x17xf32>
    %377 = math.exp %376 : vector<17x17xf32>
    %cst_140 = arith.constant dense<0.000000e+00> : vector<17xf32>
    %378 = vector.multi_reduction <add>, %377, %cst_140 [1] : vector<17x17xf32> to vector<17xf32>
    %379 = vector.shape_cast %378 : vector<17xf32> to vector<17x1xf32>
    %380 = tpu.reciprocal %379 {approx = true} : vector<17x1xf32> -> vector<17x1xf32>
    %381 = vector.broadcast %380 : vector<17x1xf32> to vector<17x17xf32>
    %382 = arith.mulf %377, %381 : vector<17x17xf32>
    %cst_141 = arith.constant dense<0.000000e+00> : vector<17x8xf32>
    %383 = tpu.matmul %382, %371, %cst_141 {dimension_numbers = #tpu.dot_dimension_numbers<[1], [0], [0], [1], [0, 0, 1, 1], [], []>} : vector<17x17xf32>, vector<17x8xf32>, vector<17x8xf32> -> vector<17x8xf32>
    %c0_142 = arith.constant 0 : index
    %c16_143 = arith.constant 16 : index
    %384 = vector.load %arg12[%c0_142, %c16_143] : memref<17x32xf32, #tpu.memory_space<vmem>>, vector<17x8xf32>
    tpu.vector_store %arg12[%c0_142, %c16_143], %383 {strides = array<i32>} : memref<17x32xf32, #tpu.memory_space<vmem>>, vector<17x8xf32>,
    %385 = vector.extract_strided_slice %334 {offsets = [0, 24], sizes = [17, 8], strides = [1, 1]} : vector<17x32xf32> to vector<17x8xf32>
    %386 = vector.extract_strided_slice %335 {offsets = [0, 24], sizes = [17, 8], strides = [1, 1]} : vector<17x32xf32> to vector<17x8xf32>
    %387 = vector.extract_strided_slice %336 {offsets = [0, 24], sizes = [17, 8], strides = [1, 1]} : vector<17x32xf32> to vector<17x8xf32>
    %cst_144 = arith.constant dense<0.000000e+00> : vector<17x17xf32>
    %388 = tpu.matmul %385, %386, %cst_144 {dimension_numbers = #tpu.dot_dimension_numbers<[1], [1], [0], [0], [0, 0, 1, 0], [], []>} : vector<17x8xf32>, vector<17x8xf32>, vector<17x17xf32> -> vector<17x17xf32>
    %cst_145 = arith.constant dense<0xFF800000> : vector<17xf32>
    %389 = vector.multi_reduction <maximumf>, %388, %cst_145 [1] : vector<17x17xf32> to vector<17xf32>
    %390 = vector.shape_cast %389 : vector<17xf32> to vector<17x1xf32>
    %391 = vector.broadcast %390 : vector<17x1xf32> to vector<17x17xf32>
    %392 = arith.subf %388, %391 : vector<17x17xf32>
    %393 = math.exp %392 : vector<17x17xf32>
    %cst_146 = arith.constant dense<0.000000e+00> : vector<17xf32>
    %394 = vector.multi_reduction <add>, %393, %cst_146 [1] : vector<17x17xf32> to vector<17xf32>
    %395 = vector.shape_cast %394 : vector<17xf32> to vector<17x1xf32>
    %396 = tpu.reciprocal %395 {approx = true} : vector<17x1xf32> -> vector<17x1xf32>
    %397 = vector.broadcast %396 : vector<17x1xf32> to vector<17x17xf32>
    %398 = arith.mulf %393, %397 : vector<17x17xf32>
    %cst_147 = arith.constant dense<0.000000e+00> : vector<17x8xf32>
    %399 = tpu.matmul %398, %387, %cst_147 {dimension_numbers = #tpu.dot_dimension_numbers<[1], [0], [0], [1], [0, 0, 1, 1], [], []>} : vector<17x17xf32>, vector<17x8xf32>, vector<17x8xf32> -> vector<17x8xf32>
    %c0_148 = arith.constant 0 : index
    %c24_149 = arith.constant 24 : index
    %400 = vector.load %arg12[%c0_148, %c24_149] : memref<17x32xf32, #tpu.memory_space<vmem>>, vector<17x8xf32>
    tpu.vector_store %arg12[%c0_148, %c24_149], %399 {strides = array<i32>} : memref<17x32xf32, #tpu.memory_space<vmem>>, vector<17x8xf32>,
    %c0_150 = arith.constant 0 : index
    %c0_151 = arith.constant 0 : index
    %401 = vector.load %arg12[%c0_150, %c0_151] : memref<17x32xf32, #tpu.memory_space<vmem>>, vector<17x32xf32>
    %c2_152 = arith.constant 2 : index
    %c0_153 = arith.constant 0 : index
    %c0_154 = arith.constant 0 : index
    %402 = vector.load %arg5[%c2_152, %c0_153, %c0_154] : memref<4x32x32xf32, #tpu.memory_space<vmem>>, vector<1x32x32xf32>
    %403 = vector.shape_cast %402 : vector<1x32x32xf32> to vector<32x32xf32>
    %cst_155 = arith.constant dense<0.000000e+00> : vector<17x32xf32>
    %404 = tpu.matmul %401, %403, %cst_155 {dimension_numbers = #tpu.dot_dimension_numbers<[1], [0], [0], [1], [0, 0, 1, 1], [], []>} : vector<17x32xf32>, vector<32x32xf32>, vector<17x32xf32> -> vector<17x32xf32>
    %405 = vector.broadcast %302 : vector<1x32xf32> to vector<17x32xf32>
    %406 = arith.addf %404, %405 : vector<17x32xf32>
    %407 = vector.broadcast %303 : vector<1x32xf32> to vector<17x32xf32>
    %408 = arith.mulf %407, %406 : vector<17x32xf32>
    %409 = arith.addf %297, %408 : vector<17x32xf32>
    %cst_156 = arith.constant dense<0.000000e+00> : vector<17xf32>
    %410 = vector.multi_reduction <add>, %409, %cst_156 [1] : vector<17x32xf32> to vector<17xf32>
    %411 = vector.shape_cast %410 : vector<17xf32> to vector<17x1xf32>
    %cst_157 = arith.constant 3.200000e+01 : f32
    %412 = vector.broadcast %cst_157 : f32 to vector<17x1xf32>
    %413 = arith.divf %411, %412 : vector<17x1xf32>
    %414 = vector.broadcast %413 : vector<17x1xf32> to vector<17x32xf32>
    %415 = arith.subf %409, %414 : vector<17x32xf32>
    %416 = arith.mulf %415, %415 : vector<17x32xf32>
    %cst_158 = arith.constant dense<0.000000e+00> : vector<17xf32>
    %417 = vector.multi_reduction <add>, %416, %cst_158 [1] : vector<17x32xf32> to vector<17xf32>
    %418 = vector.shape_cast %417 : vector<17xf32> to vector<17x1xf32>
    %cst_159 = arith.constant 3.200000e+01 : f32
    %419 = vector.broadcast %cst_159 : f32 to vector<17x1xf32>
    %420 = arith.divf %418, %419 : vector<17x1xf32>
    %cst_160 = arith.constant 9.99999997E-7 : f32
    %421 = vector.broadcast %cst_160 : f32 to vector<17x1xf32>
    %422 = arith.addf %420, %421 : vector<17x1xf32>
    %423 = math.rsqrt %422 : vector<17x1xf32>
    %424 = vector.broadcast %423 : vector<17x1xf32> to vector<17x32xf32>
    %425 = arith.mulf %415, %424 : vector<17x32xf32>
    %426 = vector.broadcast %304 : vector<1x32xf32> to vector<17x32xf32>
    %427 = arith.mulf %425, %426 : vector<17x32xf32>
    %428 = vector.broadcast %305 : vector<1x32xf32> to vector<17x32xf32>
    %429 = arith.addf %427, %428 : vector<17x32xf32>
    %c2_161 = arith.constant 2 : index
    %c0_162 = arith.constant 0 : index
    %c0_163 = arith.constant 0 : index
    %430 = vector.load %arg6[%c2_161, %c0_162, %c0_163] : memref<4x32x128xf32, #tpu.memory_space<vmem>>, vector<1x32x128xf32>
    %431 = vector.shape_cast %430 : vector<1x32x128xf32> to vector<32x128xf32>
    %cst_164 = arith.constant dense<0.000000e+00> : vector<17x128xf32>
    %432 = tpu.matmul %429, %431, %cst_164 {dimension_numbers = #tpu.dot_dimension_numbers<[1], [0], [0], [1], [0, 0, 1, 1], [], []>} : vector<17x32xf32>, vector<32x128xf32>, vector<17x128xf32> -> vector<17x128xf32>
    %433 = vector.broadcast %306 : vector<1x128xf32> to vector<17x128xf32>
    %434 = arith.addf %432, %433 : vector<17x128xf32>
    %435 = arith.mulf %434, %434 : vector<17x128xf32>
    %436 = arith.mulf %434, %435 : vector<17x128xf32>
    %cst_165 = arith.constant 4.471500e-02 : f32
    %437 = vector.broadcast %cst_165 : f32 to vector<17x128xf32>
    %438 = arith.mulf %437, %436 : vector<17x128xf32>
    %439 = arith.addf %434, %438 : vector<17x128xf32>
    %cst_166 = arith.constant 0.797884583 : f32
    %440 = vector.broadcast %cst_166 : f32 to vector<17x128xf32>
    %441 = arith.mulf %440, %439 : vector<17x128xf32>
    %442 = math.tanh %441 : vector<17x128xf32>
    %cst_167 = arith.constant 1.000000e+00 : f32
    %443 = vector.broadcast %cst_167 : f32 to vector<17x128xf32>
    %444 = arith.addf %443, %442 : vector<17x128xf32>
    %cst_168 = arith.constant 5.000000e-01 : f32
    %445 = vector.broadcast %cst_168 : f32 to vector<17x128xf32>
    %446 = arith.mulf %445, %444 : vector<17x128xf32>
    %447 = arith.mulf %434, %446 : vector<17x128xf32>
    %c2_169 = arith.constant 2 : index
    %c0_170 = arith.constant 0 : index
    %c0_171 = arith.constant 0 : index
    %448 = vector.load %arg7[%c2_169, %c0_170, %c0_171] : memref<4x128x32xf32, #tpu.memory_space<vmem>>, vector<1x128x32xf32>
    %449 = vector.shape_cast %448 : vector<1x128x32xf32> to vector<128x32xf32>
    %cst_172 = arith.constant dense<0.000000e+00> : vector<17x32xf32>
    %450 = tpu.matmul %447, %449, %cst_172 {dimension_numbers = #tpu.dot_dimension_numbers<[1], [0], [0], [1], [0, 0, 1, 1], [], []>} : vector<17x128xf32>, vector<128x32xf32>, vector<17x32xf32> -> vector<17x32xf32>
    %451 = vector.broadcast %307 : vector<1x32xf32> to vector<17x32xf32>
    %452 = arith.addf %450, %451 : vector<17x32xf32>
    %453 = vector.broadcast %308 : vector<1x32xf32> to vector<17x32xf32>
    %454 = arith.mulf %453, %452 : vector<17x32xf32>
    %455 = arith.addf %409, %454 : vector<17x32xf32>
    %c3 = arith.constant 3 : index
    %c0_173 = arith.constant 0 : index
    %c0_174 = arith.constant 0 : index
    %456 = vector.load %arg8[%c3, %c0_173, %c0_174] : memref<4x9x128xf32, #tpu.memory_space<vmem>>, vector<1x9x128xf32>
    %457 = vector.shape_cast %456 : vector<1x9x128xf32> to vector<9x128xf32>
    %458 = vector.extract_strided_slice %457 {offsets = [0, 0], sizes = [1, 32], strides = [1, 1]} : vector<9x128xf32> to vector<1x32xf32>
    %459 = vector.extract_strided_slice %457 {offsets = [1, 0], sizes = [1, 32], strides = [1, 1]} : vector<9x128xf32> to vector<1x32xf32>
    %460 = vector.extract_strided_slice %457 {offsets = [2, 0], sizes = [1, 32], strides = [1, 1]} : vector<9x128xf32> to vector<1x32xf32>
    %461 = vector.extract_strided_slice %457 {offsets = [3, 0], sizes = [1, 32], strides = [1, 1]} : vector<9x128xf32> to vector<1x32xf32>
    %462 = vector.extract_strided_slice %457 {offsets = [4, 0], sizes = [1, 32], strides = [1, 1]} : vector<9x128xf32> to vector<1x32xf32>
    %463 = vector.extract_strided_slice %457 {offsets = [5, 0], sizes = [1, 32], strides = [1, 1]} : vector<9x128xf32> to vector<1x32xf32>
    %464 = vector.extract_strided_slice %457 {offsets = [6, 0], sizes = [1, 128], strides = [1, 1]} : vector<9x128xf32> to vector<1x128xf32>
    %465 = vector.extract_strided_slice %457 {offsets = [7, 0], sizes = [1, 32], strides = [1, 1]} : vector<9x128xf32> to vector<1x32xf32>
    %466 = vector.extract_strided_slice %457 {offsets = [8, 0], sizes = [1, 32], strides = [1, 1]} : vector<9x128xf32> to vector<1x32xf32>
    %cst_175 = arith.constant dense<0.000000e+00> : vector<17xf32>
    %467 = vector.multi_reduction <add>, %455, %cst_175 [1] : vector<17x32xf32> to vector<17xf32>
    %468 = vector.shape_cast %467 : vector<17xf32> to vector<17x1xf32>
    %cst_176 = arith.constant 3.200000e+01 : f32
    %469 = vector.broadcast %cst_176 : f32 to vector<17x1xf32>
    %470 = arith.divf %468, %469 : vector<17x1xf32>
    %471 = vector.broadcast %470 : vector<17x1xf32> to vector<17x32xf32>
    %472 = arith.subf %455, %471 : vector<17x32xf32>
    %473 = arith.mulf %472, %472 : vector<17x32xf32>
    %cst_177 = arith.constant dense<0.000000e+00> : vector<17xf32>
    %474 = vector.multi_reduction <add>, %473, %cst_177 [1] : vector<17x32xf32> to vector<17xf32>
    %475 = vector.shape_cast %474 : vector<17xf32> to vector<17x1xf32>
    %cst_178 = arith.constant 3.200000e+01 : f32
    %476 = vector.broadcast %cst_178 : f32 to vector<17x1xf32>
    %477 = arith.divf %475, %476 : vector<17x1xf32>
    %cst_179 = arith.constant 9.99999997E-7 : f32
    %478 = vector.broadcast %cst_179 : f32 to vector<17x1xf32>
    %479 = arith.addf %477, %478 : vector<17x1xf32>
    %480 = math.rsqrt %479 : vector<17x1xf32>
    %481 = vector.broadcast %480 : vector<17x1xf32> to vector<17x32xf32>
    %482 = arith.mulf %472, %481 : vector<17x32xf32>
    %483 = vector.broadcast %458 : vector<1x32xf32> to vector<17x32xf32>
    %484 = arith.mulf %482, %483 : vector<17x32xf32>
    %485 = vector.broadcast %459 : vector<1x32xf32> to vector<17x32xf32>
    %486 = arith.addf %484, %485 : vector<17x32xf32>
    %c3_180 = arith.constant 3 : index
    %c0_181 = arith.constant 0 : index
    %c0_182 = arith.constant 0 : index
    %487 = vector.load %arg4[%c3_180, %c0_181, %c0_182] : memref<4x32x96xf32, #tpu.memory_space<vmem>>, vector<1x32x96xf32>
    %488 = vector.shape_cast %487 : vector<1x32x96xf32> to vector<32x96xf32>
    %cst_183 = arith.constant dense<0.000000e+00> : vector<17x96xf32>
    %489 = tpu.matmul %486, %488, %cst_183 {dimension_numbers = #tpu.dot_dimension_numbers<[1], [0], [0], [1], [0, 0, 1, 1], [], []>} : vector<17x32xf32>, vector<32x96xf32>, vector<17x96xf32> -> vector<17x96xf32>
    %490 = vector.extract_strided_slice %489 {offsets = [0, 0], sizes = [17, 32], strides = [1, 1]} : vector<17x96xf32> to vector<17x32xf32>
    %cst_184 = arith.constant 0.353553385 : f32
    %491 = vector.broadcast %cst_184 : f32 to vector<17x32xf32>
    %492 = arith.mulf %490, %491 : vector<17x32xf32>
    %493 = vector.extract_strided_slice %489 {offsets = [0, 32], sizes = [17, 32], strides = [1, 1]} : vector<17x96xf32> to vector<17x32xf32>
    %494 = vector.extract_strided_slice %489 {offsets = [0, 64], sizes = [17, 32], strides = [1, 1]} : vector<17x96xf32> to vector<17x32xf32>
    %495 = vector.extract_strided_slice %492 {offsets = [0, 0], sizes = [17, 8], strides = [1, 1]} : vector<17x32xf32> to vector<17x8xf32>
    %496 = vector.extract_strided_slice %493 {offsets = [0, 0], sizes = [17, 8], strides = [1, 1]} : vector<17x32xf32> to vector<17x8xf32>
    %497 = vector.extract_strided_slice %494 {offsets = [0, 0], sizes = [17, 8], strides = [1, 1]} : vector<17x32xf32> to vector<17x8xf32>
    %cst_185 = arith.constant dense<0.000000e+00> : vector<17x17xf32>
    %498 = tpu.matmul %495, %496, %cst_185 {dimension_numbers = #tpu.dot_dimension_numbers<[1], [1], [0], [0], [0, 0, 1, 0], [], []>} : vector<17x8xf32>, vector<17x8xf32>, vector<17x17xf32> -> vector<17x17xf32>
    %cst_186 = arith.constant dense<0xFF800000> : vector<17xf32>
    %499 = vector.multi_reduction <maximumf>, %498, %cst_186 [1] : vector<17x17xf32> to vector<17xf32>
    %500 = vector.shape_cast %499 : vector<17xf32> to vector<17x1xf32>
    %501 = vector.broadcast %500 : vector<17x1xf32> to vector<17x17xf32>
    %502 = arith.subf %498, %501 : vector<17x17xf32>
    %503 = math.exp %502 : vector<17x17xf32>
    %cst_187 = arith.constant dense<0.000000e+00> : vector<17xf32>
    %504 = vector.multi_reduction <add>, %503, %cst_187 [1] : vector<17x17xf32> to vector<17xf32>
    %505 = vector.shape_cast %504 : vector<17xf32> to vector<17x1xf32>
    %506 = tpu.reciprocal %505 {approx = true} : vector<17x1xf32> -> vector<17x1xf32>
    %507 = vector.broadcast %506 : vector<17x1xf32> to vector<17x17xf32>
    %508 = arith.mulf %503, %507 : vector<17x17xf32>
    %cst_188 = arith.constant dense<0.000000e+00> : vector<17x8xf32>
    %509 = tpu.matmul %508, %497, %cst_188 {dimension_numbers = #tpu.dot_dimension_numbers<[1], [0], [0], [1], [0, 0, 1, 1], [], []>} : vector<17x17xf32>, vector<17x8xf32>, vector<17x8xf32> -> vector<17x8xf32>
    %c0_189 = arith.constant 0 : index
    %c0_190 = arith.constant 0 : index
    %510 = vector.load %arg12[%c0_189, %c0_190] : memref<17x32xf32, #tpu.memory_space<vmem>>, vector<17x8xf32>
    tpu.vector_store %arg12[%c0_189, %c0_190], %509 {strides = array<i32>} : memref<17x32xf32, #tpu.memory_space<vmem>>, vector<17x8xf32>,
    %511 = vector.extract_strided_slice %492 {offsets = [0, 8], sizes = [17, 8], strides = [1, 1]} : vector<17x32xf32> to vector<17x8xf32>
    %512 = vector.extract_strided_slice %493 {offsets = [0, 8], sizes = [17, 8], strides = [1, 1]} : vector<17x32xf32> to vector<17x8xf32>
    %513 = vector.extract_strided_slice %494 {offsets = [0, 8], sizes = [17, 8], strides = [1, 1]} : vector<17x32xf32> to vector<17x8xf32>
    %cst_191 = arith.constant dense<0.000000e+00> : vector<17x17xf32>
    %514 = tpu.matmul %511, %512, %cst_191 {dimension_numbers = #tpu.dot_dimension_numbers<[1], [1], [0], [0], [0, 0, 1, 0], [], []>} : vector<17x8xf32>, vector<17x8xf32>, vector<17x17xf32> -> vector<17x17xf32>
    %cst_192 = arith.constant dense<0xFF800000> : vector<17xf32>
    %515 = vector.multi_reduction <maximumf>, %514, %cst_192 [1] : vector<17x17xf32> to vector<17xf32>
    %516 = vector.shape_cast %515 : vector<17xf32> to vector<17x1xf32>
    %517 = vector.broadcast %516 : vector<17x1xf32> to vector<17x17xf32>
    %518 = arith.subf %514, %517 : vector<17x17xf32>
    %519 = math.exp %518 : vector<17x17xf32>
    %cst_193 = arith.constant dense<0.000000e+00> : vector<17xf32>
    %520 = vector.multi_reduction <add>, %519, %cst_193 [1] : vector<17x17xf32> to vector<17xf32>
    %521 = vector.shape_cast %520 : vector<17xf32> to vector<17x1xf32>
    %522 = tpu.reciprocal %521 {approx = true} : vector<17x1xf32> -> vector<17x1xf32>
    %523 = vector.broadcast %522 : vector<17x1xf32> to vector<17x17xf32>
    %524 = arith.mulf %519, %523 : vector<17x17xf32>
    %cst_194 = arith.constant dense<0.000000e+00> : vector<17x8xf32>
    %525 = tpu.matmul %524, %513, %cst_194 {dimension_numbers = #tpu.dot_dimension_numbers<[1], [0], [0], [1], [0, 0, 1, 1], [], []>} : vector<17x17xf32>, vector<17x8xf32>, vector<17x8xf32> -> vector<17x8xf32>
    %c0_195 = arith.constant 0 : index
    %c8_196 = arith.constant 8 : index
    %526 = vector.load %arg12[%c0_195, %c8_196] : memref<17x32xf32, #tpu.memory_space<vmem>>, vector<17x8xf32>
    tpu.vector_store %arg12[%c0_195, %c8_196], %525 {strides = array<i32>} : memref<17x32xf32, #tpu.memory_space<vmem>>, vector<17x8xf32>,
    %527 = vector.extract_strided_slice %492 {offsets = [0, 16], sizes = [17, 8], strides = [1, 1]} : vector<17x32xf32> to vector<17x8xf32>
    %528 = vector.extract_strided_slice %493 {offsets = [0, 16], sizes = [17, 8], strides = [1, 1]} : vector<17x32xf32> to vector<17x8xf32>
    %529 = vector.extract_strided_slice %494 {offsets = [0, 16], sizes = [17, 8], strides = [1, 1]} : vector<17x32xf32> to vector<17x8xf32>
    %cst_197 = arith.constant dense<0.000000e+00> : vector<17x17xf32>
    %530 = tpu.matmul %527, %528, %cst_197 {dimension_numbers = #tpu.dot_dimension_numbers<[1], [1], [0], [0], [0, 0, 1, 0], [], []>} : vector<17x8xf32>, vector<17x8xf32>, vector<17x17xf32> -> vector<17x17xf32>
    %cst_198 = arith.constant dense<0xFF800000> : vector<17xf32>
    %531 = vector.multi_reduction <maximumf>, %530, %cst_198 [1] : vector<17x17xf32> to vector<17xf32>
    %532 = vector.shape_cast %531 : vector<17xf32> to vector<17x1xf32>
    %533 = vector.broadcast %532 : vector<17x1xf32> to vector<17x17xf32>
    %534 = arith.subf %530, %533 : vector<17x17xf32>
    %535 = math.exp %534 : vector<17x17xf32>
    %cst_199 = arith.constant dense<0.000000e+00> : vector<17xf32>
    %536 = vector.multi_reduction <add>, %535, %cst_199 [1] : vector<17x17xf32> to vector<17xf32>
    %537 = vector.shape_cast %536 : vector<17xf32> to vector<17x1xf32>
    %538 = tpu.reciprocal %537 {approx = true} : vector<17x1xf32> -> vector<17x1xf32>
    %539 = vector.broadcast %538 : vector<17x1xf32> to vector<17x17xf32>
    %540 = arith.mulf %535, %539 : vector<17x17xf32>
    %cst_200 = arith.constant dense<0.000000e+00> : vector<17x8xf32>
    %541 = tpu.matmul %540, %529, %cst_200 {dimension_numbers = #tpu.dot_dimension_numbers<[1], [0], [0], [1], [0, 0, 1, 1], [], []>} : vector<17x17xf32>, vector<17x8xf32>, vector<17x8xf32> -> vector<17x8xf32>
    %c0_201 = arith.constant 0 : index
    %c16_202 = arith.constant 16 : index
    %542 = vector.load %arg12[%c0_201, %c16_202] : memref<17x32xf32, #tpu.memory_space<vmem>>, vector<17x8xf32>
    tpu.vector_store %arg12[%c0_201, %c16_202], %541 {strides = array<i32>} : memref<17x32xf32, #tpu.memory_space<vmem>>, vector<17x8xf32>,
    %543 = vector.extract_strided_slice %492 {offsets = [0, 24], sizes = [17, 8], strides = [1, 1]} : vector<17x32xf32> to vector<17x8xf32>
    %544 = vector.extract_strided_slice %493 {offsets = [0, 24], sizes = [17, 8], strides = [1, 1]} : vector<17x32xf32> to vector<17x8xf32>
    %545 = vector.extract_strided_slice %494 {offsets = [0, 24], sizes = [17, 8], strides = [1, 1]} : vector<17x32xf32> to vector<17x8xf32>
    %cst_203 = arith.constant dense<0.000000e+00> : vector<17x17xf32>
    %546 = tpu.matmul %543, %544, %cst_203 {dimension_numbers = #tpu.dot_dimension_numbers<[1], [1], [0], [0], [0, 0, 1, 0], [], []>} : vector<17x8xf32>, vector<17x8xf32>, vector<17x17xf32> -> vector<17x17xf32>
    %cst_204 = arith.constant dense<0xFF800000> : vector<17xf32>
    %547 = vector.multi_reduction <maximumf>, %546, %cst_204 [1] : vector<17x17xf32> to vector<17xf32>
    %548 = vector.shape_cast %547 : vector<17xf32> to vector<17x1xf32>
    %549 = vector.broadcast %548 : vector<17x1xf32> to vector<17x17xf32>
    %550 = arith.subf %546, %549 : vector<17x17xf32>
    %551 = math.exp %550 : vector<17x17xf32>
    %cst_205 = arith.constant dense<0.000000e+00> : vector<17xf32>
    %552 = vector.multi_reduction <add>, %551, %cst_205 [1] : vector<17x17xf32> to vector<17xf32>
    %553 = vector.shape_cast %552 : vector<17xf32> to vector<17x1xf32>
    %554 = tpu.reciprocal %553 {approx = true} : vector<17x1xf32> -> vector<17x1xf32>
    %555 = vector.broadcast %554 : vector<17x1xf32> to vector<17x17xf32>
    %556 = arith.mulf %551, %555 : vector<17x17xf32>
    %cst_206 = arith.constant dense<0.000000e+00> : vector<17x8xf32>
    %557 = tpu.matmul %556, %545, %cst_206 {dimension_numbers = #tpu.dot_dimension_numbers<[1], [0], [0], [1], [0, 0, 1, 1], [], []>} : vector<17x17xf32>, vector<17x8xf32>, vector<17x8xf32> -> vector<17x8xf32>
    %c0_207 = arith.constant 0 : index
    %c24_208 = arith.constant 24 : index
    %558 = vector.load %arg12[%c0_207, %c24_208] : memref<17x32xf32, #tpu.memory_space<vmem>>, vector<17x8xf32>
    tpu.vector_store %arg12[%c0_207, %c24_208], %557 {strides = array<i32>} : memref<17x32xf32, #tpu.memory_space<vmem>>, vector<17x8xf32>,
    %c0_209 = arith.constant 0 : index
    %c0_210 = arith.constant 0 : index
    %559 = vector.load %arg12[%c0_209, %c0_210] : memref<17x32xf32, #tpu.memory_space<vmem>>, vector<17x32xf32>
    %c3_211 = arith.constant 3 : index
    %c0_212 = arith.constant 0 : index
    %c0_213 = arith.constant 0 : index
    %560 = vector.load %arg5[%c3_211, %c0_212, %c0_213] : memref<4x32x32xf32, #tpu.memory_space<vmem>>, vector<1x32x32xf32>
    %561 = vector.shape_cast %560 : vector<1x32x32xf32> to vector<32x32xf32>
    %cst_214 = arith.constant dense<0.000000e+00> : vector<17x32xf32>
    %562 = tpu.matmul %559, %561, %cst_214 {dimension_numbers = #tpu.dot_dimension_numbers<[1], [0], [0], [1], [0, 0, 1, 1], [], []>} : vector<17x32xf32>, vector<32x32xf32>, vector<17x32xf32> -> vector<17x32xf32>
    %563 = vector.broadcast %460 : vector<1x32xf32> to vector<17x32xf32>
    %564 = arith.addf %562, %563 : vector<17x32xf32>
    %565 = vector.broadcast %461 : vector<1x32xf32> to vector<17x32xf32>
    %566 = arith.mulf %565, %564 : vector<17x32xf32>
    %567 = arith.addf %455, %566 : vector<17x32xf32>
    %cst_215 = arith.constant dense<0.000000e+00> : vector<17xf32>
    %568 = vector.multi_reduction <add>, %567, %cst_215 [1] : vector<17x32xf32> to vector<17xf32>
    %569 = vector.shape_cast %568 : vector<17xf32> to vector<17x1xf32>
    %cst_216 = arith.constant 3.200000e+01 : f32
    %570 = vector.broadcast %cst_216 : f32 to vector<17x1xf32>
    %571 = arith.divf %569, %570 : vector<17x1xf32>
    %572 = vector.broadcast %571 : vector<17x1xf32> to vector<17x32xf32>
    %573 = arith.subf %567, %572 : vector<17x32xf32>
    %574 = arith.mulf %573, %573 : vector<17x32xf32>
    %cst_217 = arith.constant dense<0.000000e+00> : vector<17xf32>
    %575 = vector.multi_reduction <add>, %574, %cst_217 [1] : vector<17x32xf32> to vector<17xf32>
    %576 = vector.shape_cast %575 : vector<17xf32> to vector<17x1xf32>
    %cst_218 = arith.constant 3.200000e+01 : f32
    %577 = vector.broadcast %cst_218 : f32 to vector<17x1xf32>
    %578 = arith.divf %576, %577 : vector<17x1xf32>
    %cst_219 = arith.constant 9.99999997E-7 : f32
    %579 = vector.broadcast %cst_219 : f32 to vector<17x1xf32>
    %580 = arith.addf %578, %579 : vector<17x1xf32>
    %581 = math.rsqrt %580 : vector<17x1xf32>
    %582 = vector.broadcast %581 : vector<17x1xf32> to vector<17x32xf32>
    %583 = arith.mulf %573, %582 : vector<17x32xf32>
    %584 = vector.broadcast %462 : vector<1x32xf32> to vector<17x32xf32>
    %585 = arith.mulf %583, %584 : vector<17x32xf32>
    %586 = vector.broadcast %463 : vector<1x32xf32> to vector<17x32xf32>
    %587 = arith.addf %585, %586 : vector<17x32xf32>
    %c3_220 = arith.constant 3 : index
    %c0_221 = arith.constant 0 : index
    %c0_222 = arith.constant 0 : index
    %588 = vector.load %arg6[%c3_220, %c0_221, %c0_222] : memref<4x32x128xf32, #tpu.memory_space<vmem>>, vector<1x32x128xf32>
    %589 = vector.shape_cast %588 : vector<1x32x128xf32> to vector<32x128xf32>
    %cst_223 = arith.constant dense<0.000000e+00> : vector<17x128xf32>
    %590 = tpu.matmul %587, %589, %cst_223 {dimension_numbers = #tpu.dot_dimension_numbers<[1], [0], [0], [1], [0, 0, 1, 1], [], []>} : vector<17x32xf32>, vector<32x128xf32>, vector<17x128xf32> -> vector<17x128xf32>
    %591 = vector.broadcast %464 : vector<1x128xf32> to vector<17x128xf32>
    %592 = arith.addf %590, %591 : vector<17x128xf32>
    %593 = arith.mulf %592, %592 : vector<17x128xf32>
    %594 = arith.mulf %592, %593 : vector<17x128xf32>
    %cst_224 = arith.constant 4.471500e-02 : f32
    %595 = vector.broadcast %cst_224 : f32 to vector<17x128xf32>
    %596 = arith.mulf %595, %594 : vector<17x128xf32>
    %597 = arith.addf %592, %596 : vector<17x128xf32>
    %cst_225 = arith.constant 0.797884583 : f32
    %598 = vector.broadcast %cst_225 : f32 to vector<17x128xf32>
    %599 = arith.mulf %598, %597 : vector<17x128xf32>
    %600 = math.tanh %599 : vector<17x128xf32>
    %cst_226 = arith.constant 1.000000e+00 : f32
    %601 = vector.broadcast %cst_226 : f32 to vector<17x128xf32>
    %602 = arith.addf %601, %600 : vector<17x128xf32>
    %cst_227 = arith.constant 5.000000e-01 : f32
    %603 = vector.broadcast %cst_227 : f32 to vector<17x128xf32>
    %604 = arith.mulf %603, %602 : vector<17x128xf32>
    %605 = arith.mulf %592, %604 : vector<17x128xf32>
    %c3_228 = arith.constant 3 : index
    %c0_229 = arith.constant 0 : index
    %c0_230 = arith.constant 0 : index
    %606 = vector.load %arg7[%c3_228, %c0_229, %c0_230] : memref<4x128x32xf32, #tpu.memory_space<vmem>>, vector<1x128x32xf32>
    %607 = vector.shape_cast %606 : vector<1x128x32xf32> to vector<128x32xf32>
    %cst_231 = arith.constant dense<0.000000e+00> : vector<17x32xf32>
    %608 = tpu.matmul %605, %607, %cst_231 {dimension_numbers = #tpu.dot_dimension_numbers<[1], [0], [0], [1], [0, 0, 1, 1], [], []>} : vector<17x128xf32>, vector<128x32xf32>, vector<17x32xf32> -> vector<17x32xf32>
    %609 = vector.broadcast %465 : vector<1x32xf32> to vector<17x32xf32>
    %610 = arith.addf %608, %609 : vector<17x32xf32>
    %611 = vector.broadcast %466 : vector<1x32xf32> to vector<17x32xf32>
    %612 = arith.mulf %611, %610 : vector<17x32xf32>
    %613 = arith.addf %567, %612 : vector<17x32xf32>
    %c0_232 = arith.constant 0 : index
    %c0_233 = arith.constant 0 : index
    %614 = vector.load %arg9[%c0_232, %c0_233] : memref<3x128xf32, #tpu.memory_space<vmem>>, vector<3x128xf32>
    %615 = vector.extract_strided_slice %613 {offsets = [0, 0], sizes = [1, 32], strides = [1, 1]} : vector<17x32xf32> to vector<1x32xf32>
    %cst_234 = arith.constant dense<0.000000e+00> : vector<1xf32>
    %616 = vector.multi_reduction <add>, %615, %cst_234 [1] : vector<1x32xf32> to vector<1xf32>
    %617 = vector.shape_cast %616 : vector<1xf32> to vector<1x1xf32>
    %cst_235 = arith.constant 3.200000e+01 : f32
    %618 = vector.broadcast %cst_235 : f32 to vector<1x1xf32>
    %619 = arith.divf %617, %618 : vector<1x1xf32>
    %620 = vector.broadcast %619 : vector<1x1xf32> to vector<1x32xf32>
    %621 = arith.subf %615, %620 : vector<1x32xf32>
    %622 = arith.mulf %621, %621 : vector<1x32xf32>
    %cst_236 = arith.constant dense<0.000000e+00> : vector<1xf32>
    %623 = vector.multi_reduction <add>, %622, %cst_236 [1] : vector<1x32xf32> to vector<1xf32>
    %624 = vector.shape_cast %623 : vector<1xf32> to vector<1x1xf32>
    %cst_237 = arith.constant 3.200000e+01 : f32
    %625 = vector.broadcast %cst_237 : f32 to vector<1x1xf32>
    %626 = arith.divf %624, %625 : vector<1x1xf32>
    %cst_238 = arith.constant 9.99999997E-7 : f32
    %627 = vector.broadcast %cst_238 : f32 to vector<1x1xf32>
    %628 = arith.addf %626, %627 : vector<1x1xf32>
    %629 = math.rsqrt %628 : vector<1x1xf32>
    %630 = vector.broadcast %629 : vector<1x1xf32> to vector<1x32xf32>
    %631 = arith.mulf %621, %630 : vector<1x32xf32>
    %632 = vector.extract_strided_slice %614 {offsets = [0, 0], sizes = [1, 32], strides = [1, 1]} : vector<3x128xf32> to vector<1x32xf32>
    %633 = arith.mulf %631, %632 : vector<1x32xf32>
    %634 = vector.extract_strided_slice %614 {offsets = [1, 0], sizes = [1, 32], strides = [1, 1]} : vector<3x128xf32> to vector<1x32xf32>
    %635 = arith.addf %633, %634 : vector<1x32xf32>
    %c0_239 = arith.constant 0 : index
    %c0_240 = arith.constant 0 : index
    %636 = vector.load %arg10[%c0_239, %c0_240] : memref<32x10xf32, #tpu.memory_space<vmem>>, vector<32x10xf32>
    %cst_241 = arith.constant dense<0.000000e+00> : vector<1x10xf32>
    %637 = tpu.matmul %635, %636, %cst_241 {dimension_numbers = #tpu.dot_dimension_numbers<[1], [0], [0], [1], [0, 0, 1, 1], [], []>} : vector<1x32xf32>, vector<32x10xf32>, vector<1x10xf32> -> vector<1x10xf32>
    %638 = vector.extract_strided_slice %614 {offsets = [2, 0], sizes = [1, 10], strides = [1, 1]} : vector<3x128xf32> to vector<1x10xf32>
    %639 = arith.addf %637, %638 : vector<1x10xf32>
    %c0_242 = arith.constant 0 : index
    %c0_243 = arith.constant 0 : index
    %c0_244 = arith.constant 0 : index
    %640 = vector.load %arg11[%c0_242, %c0_243, %c0_244] : memref<1x1x10xf32, #tpu.memory_space<vmem>>, vector<1x1x10xf32>
    %641 = vector.shape_cast %640 : vector<1x1x10xf32> to vector<1x10xf32>
    %642 = vector.shape_cast %639 : vector<1x10xf32> to vector<1x1x10xf32>
    tpu.vector_store %arg11[%c0_242, %c0_243, %c0_244], %642 {strides = array<i32>} : memref<1x1x10xf32, #tpu.memory_space<vmem>>, vector<1x1x10xf32>,
    return
  }
  func.func @transform_0(%arg0: i32) -> (i32, i32, i32) {
    %c0_i32 = arith.constant 0 : i32
    %c0_i32_0 = arith.constant 0 : i32
    %c0_i32_1 = arith.constant 0 : i32
    return %arg0, %c0_i32, %c0_i32_0 : i32, i32, i32
  }
  func.func @transform_1(%arg0: i32) -> (i32, i32) {
    %c0_i32 = arith.constant 0 : i32
    %c0_i32_0 = arith.constant 0 : i32
    %c0_i32_1 = arith.constant 0 : i32
    return %c0_i32, %c0_i32_0 : i32, i32
  }
  func.func @transform_2(%arg0: i32) -> (i32, i32) {
    %c0_i32 = arith.constant 0 : i32
    %c0_i32_0 = arith.constant 0 : i32
    %c0_i32_1 = arith.constant 0 : i32
    return %c0_i32, %c0_i32_0 : i32, i32
  }
  func.func @transform_3(%arg0: i32) -> (i32, i32, i32) {
    %c0_i32 = arith.constant 0 : i32
    %c0_i32_0 = arith.constant 0 : i32
    %c0_i32_1 = arith.constant 0 : i32
    %c0_i32_2 = arith.constant 0 : i32
    return %c0_i32, %c0_i32_0, %c0_i32_1 : i32, i32, i32
  }
  func.func @transform_4(%arg0: i32) -> (i32, i32, i32) {
    %c0_i32 = arith.constant 0 : i32
    %c0_i32_0 = arith.constant 0 : i32
    %c0_i32_1 = arith.constant 0 : i32
    %c0_i32_2 = arith.constant 0 : i32
    return %c0_i32, %c0_i32_0, %c0_i32_1 : i32, i32, i32
  }
  func.func @transform_5(%arg0: i32) -> (i32, i32, i32) {
    %c0_i32 = arith.constant 0 : i32
    %c0_i32_0 = arith.constant 0 : i32
    %c0_i32_1 = arith.constant 0 : i32
    %c0_i32_2 = arith.constant 0 : i32
    return %c0_i32, %c0_i32_0, %c0_i32_1 : i32, i32, i32
  }
  func.func @transform_6(%arg0: i32) -> (i32, i32, i32) {
    %c0_i32 = arith.constant 0 : i32
    %c0_i32_0 = arith.constant 0 : i32
    %c0_i32_1 = arith.constant 0 : i32
    %c0_i32_2 = arith.constant 0 : i32
    return %c0_i32, %c0_i32_0, %c0_i32_1 : i32, i32, i32
  }
  func.func @transform_7(%arg0: i32) -> (i32, i32, i32) {
    %c0_i32 = arith.constant 0 : i32
    %c0_i32_0 = arith.constant 0 : i32
    %c0_i32_1 = arith.constant 0 : i32
    %c0_i32_2 = arith.constant 0 : i32
    return %c0_i32, %c0_i32_0, %c0_i32_1 : i32, i32, i32
  }
  func.func @transform_8(%arg0: i32) -> (i32, i32) {
    %c0_i32 = arith.constant 0 : i32
    %c0_i32_0 = arith.constant 0 : i32
    %c0_i32_1 = arith.constant 0 : i32
    return %c0_i32, %c0_i32_0 : i32, i32
  }
  func.func @transform_9(%arg0: i32) -> (i32, i32) {
    %c0_i32 = arith.constant 0 : i32
    %c0_i32_0 = arith.constant 0 : i32
    %c0_i32_1 = arith.constant 0 : i32
    return %c0_i32, %c0_i32_0 : i32, i32
  }
  func.func @transform_10(%arg0: i32) -> (i32, i32, i32) {
    %c0_i32 = arith.constant 0 : i32
    %c0_i32_0 = arith.constant 0 : i32
    %c0_i32_1 = arith.constant 0 : i32
    return %arg0, %c0_i32, %c0_i32_0 : i32, i32, i32
  }
}

</mosaic_0001>

<bundles_post_ra>
// kernel: octic_vit_forward.1
= control target key start
LH: loop header
LB: loop body
LE: loop exit
PB: predicated region body
PF: predicated region fallthrough
CT: control target
= control target key end

     0   :  { %s6562_s0 = inlined_call_operand.vmem [shape: f32[2,17,48], index: 0, kind: input, shape index: {}]   ;;  %s6563_s1 = inlined_call_operand.vmem [shape: f32[48,32], index: 1, kind: input, shape index: {}]   ;;  %s6564_s2 = inlined_call_operand.vmem [shape: f32[17,32], index: 2, kind: input, shape index: {}]   ;;  %s6565_s3 = inlined_call_operand.vmem [shape: f32[4,32,96], index: 3, kind: input, shape index: {}]   ;;  %s6566_s4 = inlined_call_operand.vmem [shape: f32[4,32,32], index: 4, kind: input, shape index: {}]   ;;  %s6567_s5 = inlined_call_operand.vmem [shape: f32[4,32,128], index: 5, kind: input, shape index: {}]   ;;  %s6568_s6 = inlined_call_operand.vmem [shape: f32[4,128,32], index: 6, kind: input, shape index: {}]   ;;  %s6569_s7 = inlined_call_operand.vmem [shape: f32[4,9,128], index: 7, kind: input, shape index: {}]   ;;  %s6570_s8 = inlined_call_operand.vmem [shape: f32[3,128], index: 8, kind: input, shape index: {}]   ;;  %s6571_s9 = inlined_call_operand.vmem [shape: f32[32,10], index: 9, kind: input, shape index: {}]   ;;  %s6572_s10 = inlined_call_operand.hbm [shape: f32[2,1,10], index: 10, kind: output, shape index: {}]  }
   0x1   :  { %6615 = sst [smem:[#allocation15_spill]] %s6562_s0 }
   0x2   :  { %6616 = sst [smem:[#allocation16_spill]] %s6563_s1 }
   0x3   :  { %6617 = sst [smem:[#allocation17_spill]] %s6564_s2 }
   0x4   :  { %6618 = sst [smem:[#allocation18_spill]] %s6572_s10 }
   0x5   :  { %15 = vsyncpa [#allocation4], 0 }
   0x6   :  { %17 = vsyncpa [#allocation4 + $0x1], 0  ;;  %s5027_s13 = smov 0   ;;  %s5029_s14 = smov 0  }
   0x7   :  { %s5031_s15 = smov 0   ;;  %s5033_s16 = smov 0  }
   0x8 LB: > { %6619 = sst [smem:[#allocation6_spill]] %s4943_s13  ;;  %s5048_s17 = sadd.s32 4294967295, %s4955_s16   ;;  %s4955_s16 = sphi %s5033_s16, %s6663_s16   ;;  %s4951_s15 = sphi %s5031_s15, %s6666_s15   ;;  %s4947_s14 = sphi %s5029_s14, %s6665_s14   ;;  %s4943_s13 = sphi %s5027_s13, %s6664_s13  }
   0x9   : > { %6620 = sst [smem:[#allocation7_spill]] %s4947_s14  ;;  %s4180_s18 = sadd.s32 4294967294, %s4955_s16  }
   0xa   : > { %6621 = sst [smem:[#allocation8_spill]] %s4951_s15  ;;  %s5052_s19 = sadd.s32 1, %s4955_s16  }
   0xb   : > { %6622 = sst [smem:[#allocation9_spill]] %s4955_s16  ;;  %s245_s20 = sadd.s32 1, %s4951_s15 }
   0xc   : > { %6623 = sst [smem:[#allocation10_spill]] %s5048_s17  ;;  %s242_s21 = ssub.s32 %s4955_s16, %s5052_s19 }
   0xd   : > { %6624 = sst [smem:[#allocation11_spill]] %s5052_s19  ;;  %p255_p0 = scmp.ne.s32.totalorder %s4951_s15, %s4947_s14 }
   0xe   : > { %p243_p1 = scmp.eq.s32.totalorder %s242_s21, 0  ;;  %p256_p2 = scmp.eq.s32.totalorder %s5048_s17, 1 }
   0xf   : > { %p261_p3 = scmp.ne.s32.totalorder %s4947_s14, %s4943_s13  ;;  %p262_p4 = scmp.eq.s32.totalorder %s4180_s18, 1 }
  0x10   : > { %s5063_s22 = scalar_select %p243_p1, %s4951_s15, %s245_s20  }
  0x11   : > { %p5065_p5 = por %p256_p2, %p255_p0  ;;  %p5069_p6 = por %p262_p4, %p261_p3 }
  0x12   : > { %6625 = sst [smem:[#allocation12_spill]] %s5063_s22  ;;  %p4183_p7 = scmp.ge.s32.totalorder %s4955_s16, 1 }
  0x13   : > { %s6626_s23 = scalar_select %p5065_p5, 1, 0 }
  0x14   : > { %s6628_s24 = scalar_select %p5069_p6, 1, 0 }
  0x15   : > { %6627 = sst [smem:[#allocation13_spill]] %s6626_s23  ;;  %p315_p8 = scmp.lt.s32.totalorder %s4955_s16, 3 }
  0x16   : > { %6629 = sst [smem:[#allocation14_spill]] %s6628_s24 }
  0x17   : > { %p316_p9 = pnand %p4183_p7, %p315_p8 }
  0x18   : > { %s6630_s1 = sld [smem:[#allocation16_spill]] (!%p316_p9)  ;;  %p352_p10 = scmp.lt.s32.totalorder (!%p316_p9), %s5048_s17, 1 }
  0x19   : > { %319 = sbr.rel (%p316_p9) target bundleno = 9484 (0x250c), region = 60  ;;  %s6631_s0 = sld [smem:[#allocation15_spill]] (!%p316_p9) }
  0x1a   : > { %s6632_s2 = sld [smem:[#allocation17_spill]] (!%p316_p9)  ;;  %s6602_s18 = smov (!%p316_p9), 96  }
  0x1b   : > { %s6598_s21 = smov (!%p316_p9), 88   ;;  %s6591_s25 = smov (!%p316_p9), 120  }
  0x1c   : > { %s6596_s26 = smov (!%p316_p9), 80   ;;  %s6587_s27 = smov (!%p316_p9), 72  }
  0x1d   : > { %s6583_s29 = smov (!%p316_p9), 104   ;;  %s6581_s30 = smov (!%p316_p9), 56  }
  0x1e   : > { %v368_v0 = vld [vmem:[%s6630_s1 + $0x28] sm:$0xff]  ;;  %v367_v1 = vld [vmem:[%s6630_s1 + $0x20] sm:$0xff]  ;;  %v366_v2 = vld [vmem:[%s6630_s1 + $0x18] sm:$0xff]  ;;  %s353_s11 = scalar_select %p352_p10, %s5048_s17, 1  ;;  %vm369_vm0 = vcmask 392192   ;;  %vm413_vm1 = vcmask 261120  }
  0x1f   : > { %389 = vmatpush.msra.mxu0 %v368_v0  ;;  %v365_v3 = vld [vmem:[%s6630_s1 + $0x10] sm:$0xff]  ;;  %v364_v4 = vld [vmem:[%s6630_s1 + $0x8] sm:$0xff]  ;;  %v363_v5 = vld [vmem:[%s6630_s1] sm:$0xff]  ;;  %vm420_vm2 = vcmask 253952   ;;  %v4957_v24 = vmov 32.0   ;;  %vm529_vm13 = vcmask 64512  }
  0x20   : > { %s4483_s20 = smul.u32 24, %s353_s11  ;;  %v357_v9 = vld [vmem:[%s6632_s2] sm:$0xff]  ;;  %v358_v14 = vld [vmem:[%s6632_s2 + $0x8] sm:$0xff]  ;;  %v359_v19 = vld [vmem:[%s6632_s2 + $0x10] sm:$0x1]  ;;  %4622 = vrcp.f32 %v4957_v24  ;;  %vm623_vm14 = vcmask 1040384  }
  0x21   : > { %390 = vmatpush.msra.mxu0 %v367_v1  ;;  %v481_v28 = vld [vmem:[%s6565_s3 + $0x18] sm:$0xff]  ;;  %v480_v30 = vld [vmem:[%s6565_s3 + $0x10] sm:$0xff]  ;;  %v479_v31 = vld [vmem:[%s6565_s3 + $0x8] sm:$0xff]  ;;  %vm571_vm15 = vcmask 138240   ;;  %s6575_s11 = smov 48   ;;  %s6573_s22 = smov 40  }
  0x22   : > { %s356_s28 = scalar_lea.vmem %s6631_s0, %s4483_s20  ;;  %503 = vmatpush.msra.mxu1 %v481_v28  ;;  %v478_v33 = vld [vmem:[%s6565_s3] sm:$0xff]  ;;  %s6600_s20 = smov 64  }
  0x23   : > { %391 = vmatpush.msra.mxu0 %v366_v2  ;;  %v360_v6 = vld [vmem:[%s356_s28] sm:$0xff]  ;;  %v361_v7 = vld [vmem:[%s356_s28 + $0x8] sm:$0xff]  ;;  %v362_v8 = vld [vmem:[%s356_s28 + $0x10] sm:$0x1]  ;;  %s6589_s28 = smov 112   ;;  %s6585_s12 = smov 16  }
  0x24   : > { %504 = vmatpush.msra.mxu1 %v480_v30  ;;  %v5142_v48 = vld [vmem:[%s6569_s7] sm:$0xff]  ;;  %s6648_s19 = smov 96   ;;  %s6649_s24 = smov 64  }
  0x25   : > { %392 = vmatpush.msra.mxu0 %v365_v3  ;;  %v470_v53 = vperm.slane %v5142_v48, 0  ;;  %v474_v57 = vperm.slane %v5142_v48, 1  ;;  %s6657_s10 = sld [smem:[#allocation10_spill]] }
  0x26   : > { %v4623_v25 = vpop.eup %4622  ;;  %505 = vmatpush.msra.mxu1 %v479_v31  ;;  %s6658_s1 = sld [smem:[#allocation18_spill]] }
  0x27   : > { %393 = vmatpush.msra.mxu0 %v364_v4  ;;  %v425_v26 = vmul.f32 32.0, %v4623_v25  ;;  %vm429_vm3 = vweird.f32 %v4623_v25 }
  0x28   : > { %506 = vmatpush.msra.mxu1 %v478_v33 }
  0x29   : > { %394 = vmatpush.msra.mxu0 %v363_v5  ;;  %v426_v27 = vsub.f32 1.0, %v425_v26 }
  0x2a   : > { %4185 = vmatmul.msk.f32.vlgmr.msra.gmra.mxu0 %vm369_vm0, %v360_v6 }
  0x2b   : > { %v427_v29 = vmul.f32 %v4623_v25, %v426_v27 }
  0x2c   : > { %s4121_s2 = scalar_lea.hbm %s6658_s1, %s6657_s10 }
  0x2d   : > { %v428_v32 = vadd.f32 %v4623_v25, %v427_v29  ;;  %s4125_s14 = sshll.u32 %s4121_s2, 4  ;;  %s4126_s14 = int_to_ptr.hbm [resolvable:$true] %s4125_s14 }
  0x2f   : > { %v5134_v34 = vsel %vm429_vm3, %v4623_v25, %v428_v32  ;;  %vm654_vm3 = vcmask 57344  }
  0x32   : > { %4186 = vmatmul.msk.f32.gmra.mxu0 %vm369_vm0, %v361_v7 }
  0x3a   : > { %4187 = vmatmul.msk.f32.gmra.mxu0 %vm369_vm0, %v362_v8  ;;  %vm578_vm0 = vcmask 131072  }
  0xa7   : > { %v396_v10 = vpop.f32.mrf.mxu0 }
  0xa8   : > { %v5101_v11 = vadd.f32 %v396_v10, %v357_v9 }
  0xaa   : > { %v410_v12 = vmul.f32 %v5101_v11, %v5101_v11 }
  0xac   : > { %v414_v13 = vsel %vm413_vm1, %v410_v12, 0.0 }
  0xad   : > { %415 = vadd.xlane.f32.xlu0 %v414_v13 }
  0xaf   : > { %v399_v15 = vpop.f32.mrf.mxu0 }
  0xb0   : > { %v5109_v16 = vadd.f32 %v399_v15, %v358_v14 }
  0xb2   : > { %v411_v17 = vmul.f32 %v5109_v16, %v5109_v16 }
  0xb4   : > { %v417_v18 = vsel %vm413_vm1, %v411_v17, 0.0 }
  0xb5   : > { %418 = vadd.xlane.f32.xlu0 %v417_v18 }
  0xb7   : > { %v402_v20 = vpop.f32.mrf.mxu0 }
  0xb8   : > { %v5117_v21 = vadd.f32 %v402_v20, %v359_v19 }
  0xba   : > { %v412_v22 = vmul.f32 %v5117_v21, %v5117_v21 }
  0xbc   : > { %v421_v23 = vsel %vm420_vm2, %v412_v22, 0.0 }
  0xbd   : > { %422 = vadd.xlane.f32.xlu1 %v421_v23 }
 0x120   : > { %v416_v35 = vpop.xlane.xlu0 %415 }
 0x121   : > { %v431_v36 = vmul.f32 %v5134_v34, %v416_v35 }
 0x123   : > { %v434_v37 = vadd.f32 1e-06, %v431_v36 }
 0x125   : > { %4624 = vrsqrt.f32 %v434_v37  ;;  %vm443_vm5 = vweird.f32 %v434_v37 }
 0x128   : > { %v419_v38 = vpop.xlane.xlu0 %418 }
 0x129   : > { %v432_v39 = vmul.f32 %v5134_v34, %v419_v38 }
 0x12b   : > { %v4625_v40 = vpop.eup %4624  ;;  %v435_v41 = vadd.f32 1e-06, %v432_v39 }
 0x12c   : > { %v438_v42 = vmul.f32 %v4625_v40, %v434_v37  ;;  %vm444_vm4 = vweird.f32 %v4625_v40 }
 0x12d   : > { %4626 = vrsqrt.f32 %v435_v41  ;;  %vm445_vm6 = vmor %vm443_vm5, %vm444_vm4  ;;  %vm453_vm8 = vweird.f32 %v435_v41  ;;  %vm796_vm4 = vcmask 130112   ;;  %vm941_vm5 = vcmask 195712  }
 0x12e   : > { %v439_v43 = vmul.f32 %v4625_v40, %v438_v42 }
 0x130   : > { %v440_v44 = vmul.f32 0.5, %v439_v43  ;;  %v423_v45 = vpop.xlane.xlu1 %422 }
 0x131   : > { %v433_v46 = vmul.f32 %v5134_v34, %v423_v45 }
 0x132   : > { %v441_v47 = vsub.f32 1.5, %v440_v44 }
 0x133   : > { %v4627_v49 = vpop.eup %4626  ;;  %v436_v50 = vadd.f32 1e-06, %v433_v46 }
 0x134   : > { %v442_v51 = vmul.f32 %v4625_v40, %v441_v47  ;;  %v448_v52 = vmul.f32 %v4627_v49, %v435_v41  ;;  %vm454_vm7 = vweird.f32 %v4627_v49 }
 0x135   : > { %4628 = vrsqrt.f32 %v436_v50  ;;  %vm455_vm9 = vmor %vm453_vm8, %vm454_vm7  ;;  %vm463_vm11 = vweird.f32 %v436_v50  ;;  %vm1086_vm7 = vcmask 261312   ;;  %vm6594_vm8 = vcmask 188544  }
 0x136   : > { %v449_v54 = vmul.f32 %v4627_v49, %v448_v52  ;;  %v446_v55 = vsel %vm445_vm6, %v4625_v40, %v442_v51  ;;  %vm6595_vm6 = vcmask 122944  }
 0x137   : > { %v467_v56 = vmul.f32 %v446_v55, %v5101_v11 }
 0x138   : > { %v450_v58 = vmul.f32 0.5, %v449_v54 }
 0x139   : > { %v471_v59 = vmul.f32 %v470_v53, %v467_v56 }
 0x13a   : > { %v451_v60 = vsub.f32 1.5, %v450_v58 }
 0x13b   : > { %v4629_v61 = vpop.eup %4628  ;;  %v475_v62 = vadd.f32 %v474_v57, %v471_v59 }
 0x13c   : > { %v452_v63 = vmul.f32 %v4627_v49, %v451_v60  ;;  %v458_v0 = vmul.f32 %v4629_v61, %v436_v50  ;;  %vm464_vm10 = vweird.f32 %v4629_v61 }
 0x13d   : > { %4188 = vmatmul.msk.f32.vlgmr.msra.gmra.mxu1 %vm413_vm1, %v475_v62  ;;  %vm465_vm12 = vmor %vm463_vm11, %vm464_vm10 }
 0x13e   : > { %v459_v1 = vmul.f32 %v4629_v61, %v458_v0  ;;  %v456_v2 = vsel %vm455_vm9, %v4627_v49, %v452_v63  ;;  %vm6593_vm9 = vcmask 254144  }
 0x13f   : > { %v468_v3 = vmul.f32 %v456_v2, %v5109_v16 }
 0x140   : > { %v460_v4 = vmul.f32 0.5, %v459_v1 }
 0x141   : > { %v472_v5 = vmul.f32 %v470_v53, %v468_v3 }
 0x142   : > { %v461_v6 = vsub.f32 1.5, %v460_v4 }
 0x143   : > { %v476_v7 = vadd.f32 %v474_v57, %v472_v5 }
 0x144   : > { %v462_v8 = vmul.f32 %v4629_v61, %v461_v6 }
 0x145   : > { %4189 = vmatmul.msk.f32.gmra.mxu1 %vm413_vm1, %v476_v7 }
 0x146   : > { %v466_v9 = vsel %vm465_vm12, %v4629_v61, %v462_v8 }
 0x147   : > { %v469_v10 = vmul.f32 %v466_v9, %v5117_v21 }
 0x149   : > { %v473_v12 = vmul.f32 %v470_v53, %v469_v10 }
 0x14b   : > { %v477_v13 = vadd.f32 %v474_v57, %v473_v12 }
 0x14d   : > { %4190 = vmatmul.msk.f32.gmra.mxu1 %vm413_vm1, %v477_v13 }
 0x1ba   : > { %v5152_v14 = vpop.f32.mrf.mxu1 }
 0x1bb   : > { %v5182_v26 = vmul.f32 0.35355338, %v5152_v14 }
 0x1c2   : > { %v5154_v15 = vpop.f32.mrf.mxu1 }
 0x1c3   : > { %525 = vrot.lane.b32.xlu2 %v5154_v15, %s6602_s18  ;;  %v5160_v17 = vpack.i.bf16 %v5152_v14, %v5154_v15  ;;  %v518_v30 = vmul.f32 0.35355338, %v5154_v15 }
 0x1c5   : > { %4539 = vrot.lane.b32.xlu0 %v5160_v17, %s6600_s20 }
 0x1ca   : > { %v5164_v18 = vpop.f32.mrf.mxu1 }
 0x1cb   : > { %523 = vrot.lane.b32.xlu2 %v5152_v14, %s6602_s18  ;;  %527 = vrot.lane.b32.xlu1 %v5164_v18, %s6602_s18  ;;  %v5185_v27 = vmul.f32 0.35355338, %v5164_v18 }
 0x1cd   : > { %666 = vrot.lane.b32.xlu0 %v5164_v18, %s6598_s21 }
 0x1d3   : > { %610 = vrot.lane.b32.xlu1 %v5164_v18, %s6600_s20 }
 0x21d   : > { %v526_v19 = vpop.permute.xlu2 %525 }
 0x225   : > { %v524_v23 = vpop.permute.xlu2 %523 }
 0x237   : > { %v4540_v22 = vpop.permute.xlu0 %4539 }
 0x238   : > { %v4541_v25 = vunpack.i.l.bf16 %v4540_v22  ;;  %v4542_v28 = vunpack.i.h.bf16 %v4540_v22 }
 0x23d   : > { %v528_v20 = vpop.permute.xlu1 %527 }
 0x23e   : > { %4191 = vmatpush.xpose.msk.msrb.mxu1 %vm529_vm13, %v528_v20  ;;  %4477 = vmatpush.xpose.msk.msra.mxu2 %vm529_vm13, %v528_v20 }
 0x23f   : > { %v667_v29 = vpop.permute.xlu0 %666 }
 0x242   : > { %4192 = vmatpush.xpose.msk.msrb.mxu1 %vm529_vm13, %v526_v19  ;;  %4478 = vmatpush.xpose.msk.msra.mxu2 %vm529_vm13, %v526_v19 }
 0x245   : > { %v611_v24 = vpop.permute.xlu1 %610 }
 0x246   : > { %4193 = vmatpush.xpose.msk.msrb.mxu1 %vm529_vm13, %v524_v23  ;;  %4479 = vmatpush.xpose.msk.msra.mxu2 %vm529_vm13, %v524_v23 }
 0x247   : > { %4197 = vmatpush.msk.msra.mxu3 %vm623_vm14, %v611_v24 }
 0x249   : > { %640 = vmatpush.msra.mxu3 %v4541_v25  ;;  %4194 = vmatmul.msk.f32.vlgmr.msrb.gmra.mxu1 %vm529_vm13, %v5182_v26 }
 0x24a   : > { %4196 = vmatmul.msk.f32.vlgmr.msra.gmra.mxu2 %vm529_vm13, %v5185_v27 }
 0x24b   : > { %641 = vmatpush.msra.mxu3 %v4542_v28 }
 0x24d   : > { %4201 = vmatpush.xpose.msk.msrb.mxu3 %vm529_vm13, %v667_v29 }
 0x251   : > { %4195 = vmatmul.msk.f32.gmra.mxu1 %vm529_vm13, %v518_v30 }
 0x2c6   : > { %v562_v31 = vpop.f32.mrf.mxu1 }
 0x2c7   : > { %v572_v32 = vsel %vm571_vm15, %v562_v31, -inf }
 0x2c8   : > { %573 = vmax.xlane.f32.xlu0 %v572_v32 }
 0x2cd   : > { %v568_v33 = vpop.f32.mrf.mxu2 }
 0x2ce   : > { %v565_v35 = vpop.f32.mrf.mxu1  ;;  %v579_v37 = vsel %vm578_vm0, %v568_v33, -inf }
 0x2cf   : > { %v575_v36 = vsel %vm571_vm15, %v565_v35, -inf }
 0x2d0   : > { %576 = vmax.xlane.f32.xlu2 %v575_v36  ;;  %580 = vmax.xlane.f32.xlu0 %v579_v37 }
 0x2e4   : > { %662 = vrot.lane.b32.xlu0 %v5152_v14, %s6598_s21 }
 0x2e8   : > { %664 = vrot.lane.b32.xlu2 %v5154_v15, %s6598_s21  ;;  %s6641_s21 = smov 40  }
 0x2ec   : > { %656 = vrot.lane.b32.xlu0 %v5182_v26, %s6591_s25 }
 0x33b   : > { %v574_v38 = vpop.xlane.xlu0 %573 }
 0x33c   : > { %v582_v39 = vsub.f32 %v562_v31, %v574_v38 }
 0x33e   : > { %v585_v40 = vmul.f32 1.442695, %v582_v39 }
 0x340   : > { %4630 = vpow2.f32 %v585_v40 }
 0x343   : > { %v577_v41 = vpop.xlane.xlu2 %576  ;;  %v581_v42 = vpop.xlane.xlu0 %580 }
 0x344   : > { %v583_v43 = vsub.f32 %v565_v35, %v577_v41  ;;  %v584_v44 = vsub.f32 %v568_v33, %v581_v42 }
 0x346   : > { %v4631_v45 = vpop.eup %4630  ;;  %v587_v46 = vmul.f32 1.442695, %v583_v43  ;;  %v589_v47 = vmul.f32 1.442695, %v584_v44 }
 0x347   : > { %v591_v49 = vsel %vm571_vm15, %v4631_v45, 0.0 }
 0x348   : > { %4632 = vpow2.f32 %v587_v46  ;;  %592 = vadd.xlane.f32.xlu0 %v591_v49 }
 0x349   : > { %4634 = vpow2.f32 %v589_v47 }
 0x34b   : > { %v665_v50 = vpop.permute.xlu2 %664 }
 0x34c   : > { %4202 = vmatpush.xpose.msk.msrb.mxu3 %vm529_vm13, %v665_v50 }
 0x34e   : > { %v4633_v51 = vpop.eup %4632 }
 0x34f   : > { %v4635_v52 = vpop.eup %4634  ;;  %v594_v53 = vsel %vm571_vm15, %v4633_v51, 0.0 }
 0x350   : > { %595 = vadd.xlane.f32.xlu1 %v594_v53  ;;  %v597_v54 = vsel %vm578_vm0, %v4635_v52, 0.0 }
 0x351   : > { %598 = vadd.xlane.f32.xlu2 %v597_v54 }
 0x356   : > { %v663_v55 = vpop.permute.xlu0 %662 }
 0x357   : > { %4203 = vmatpush.xpose.msk.msrb.mxu3 %vm529_vm13, %v663_v55 }
 0x35c   : > { %811 = vrot.lane.b32.xlu0 %v5164_v18, %s6596_s26 }
 0x35e   : > { %v657_v56 = vpop.permute.xlu0 %656 }
 0x364   : > { %660 = vrot.lane.b32.xlu0 %v5185_v27, %s6591_s25 }
 0x369   : > { %956 = vrot.lane.b32.xlu2 %v5164_v18, %s6587_s27  ;;  %658 = vrot.lane.b32.xlu1 %v518_v30, %s6591_s25  ;;  %s6635_s25 = smov 120  }
 0x36c   : > { %954 = vrot.lane.b32.xlu0 %v5154_v15, %s6587_s27 }
 0x371   : > { %809 = vrot.lane.b32.xlu2 %v5154_v15, %s6596_s26  ;;  %801 = vrot.lane.b32.xlu1 %v5182_v26, %s6589_s28 }
 0x374   : > { %952 = vrot.lane.b32.xlu0 %v5152_v14, %s6587_s27  ;;  %s6636_s27 = smov 112  }
 0x379   : > { %807 = vrot.lane.b32.xlu2 %v5152_v14, %s6596_s26  ;;  %948 = vrot.lane.b32.xlu1 %v518_v30, %s6583_s29  ;;  %s6642_s26 = smov 8  }
 0x37c   : > { %803 = vrot.lane.b32.xlu0 %v518_v30, %s6589_s28 }
 0x381   : > { %946 = vrot.lane.b32.xlu2 %v5182_v26, %s6583_s29 }
 0x384   : > { %950 = vrot.lane.b32.xlu0 %v5185_v27, %s6583_s29  ;;  %s6638_s29 = smov 104  }
 0x389   : > { %805 = vrot.lane.b32.xlu2 %v5185_v27, %s6589_s28  ;;  %s6637_s28 = smov 72  }
 0x3bb   : > { %v593_v57 = vpop.xlane.xlu0 %592 }
 0x3bc   : > { %4636 = vrcp.f32 %v593_v57 }
 0x3c2   : > { %v4637_v58 = vpop.eup %4636 }
 0x3c3   : > { %v596_v59 = vpop.xlane.xlu1 %595  ;;  %v603_v60 = vmul.f32 %v4637_v58, %v4631_v45 }
 0x3c4   : > { %4638 = vrcp.f32 %v596_v59  ;;  %v599_v61 = vpop.xlane.xlu2 %598 }
 0x3c5   : > { %4198 = vmatmul.msk.f32.vlgmr.msra.gmra.mxu3 %vm571_vm15, %v603_v60  ;;  %4640 = vrcp.f32 %v599_v61 }
 0x3ca   : > { %v4639_v62 = vpop.eup %4638 }
 0x3cb   : > { %v604_v63 = vmul.f32 %v4639_v62, %v4633_v51  ;;  %v4641_v2 = vpop.eup %4640 }
 0x3cc   : > { %v957_v0 = vpop.permute.xlu2 %956  ;;  %v605_v4 = vmul.f32 %v4641_v2, %v4635_v52 }
 0x3cd   : > { %4221 = vmatpush.xpose.msk.msra.mxu3 %vm529_vm13, %v957_v0 }
 0x3ce   : > { %4199 = vmatmul.msk.f32.gmra.mxu3 %vm571_vm15, %v604_v63  ;;  %v812_v1 = vpop.permute.xlu0 %811 }
 0x3cf   : > { %4211 = vmatpush.xpose.msk.msrb.mxu0 %vm529_vm13, %v812_v1 }
 0x3d4   : > { %v810_v3 = vpop.permute.xlu2 %809 }
 0x3d5   : > { %4212 = vmatpush.xpose.msk.msrb.mxu0 %vm529_vm13, %v810_v3 }
 0x3d6   : > { %4200 = vmatmul.msk.f32.gmra.mxu3 %vm571_vm15, %v605_v4  ;;  %v661_v5 = vpop.permute.xlu0 %660 }
 0x3db   : > { %v659_v6 = vpop.permute.xlu1 %658 }
 0x3dc   : > { %v808_v7 = vpop.permute.xlu2 %807 }
 0x3dd   : > { %4213 = vmatpush.xpose.msk.msrb.mxu0 %vm529_vm13, %v808_v7 }
 0x3de   : > { %4204 = vmatmul.msk.f32.vlgmr.msrb.gmra.mxu3 %vm529_vm13, %v657_v56  ;;  %v955_v8 = vpop.permute.xlu0 %954 }
 0x3df   : > { %4222 = vmatpush.xpose.msk.msra.mxu3 %vm529_vm13, %v955_v8 }
 0x3e3   : > { %v802_v9 = vpop.permute.xlu1 %801 }
 0x3e4   : > { %4214 = vmatmul.msk.f32.vlgmr.msrb.gmra.mxu0 %vm529_vm13, %v802_v9  ;;  %v947_v12 = vpop.permute.xlu2 %946 }
 0x3e6   : > { %4205 = vmatmul.msk.f32.gmra.mxu3 %vm529_vm13, %v659_v6  ;;  %v953_v10 = vpop.permute.xlu0 %952 }
 0x3e7   : > { %4223 = vmatpush.xpose.msk.msra.mxu3 %vm529_vm13, %v953_v10 }
 0x3eb   : > { %v949_v15 = vpop.permute.xlu1 %948 }
 0x3ec   : > { %v806_v14 = vpop.permute.xlu2 %805 }
 0x3ee   : > { %4206 = vmatmul.msk.f32.gmra.mxu3 %vm529_vm13, %v661_v5  ;;  %v804_v13 = vpop.permute.xlu0 %803 }
 0x3ef   : > { %4215 = vmatmul.msk.f32.gmra.mxu0 %vm529_vm13, %v804_v13 }
 0x3f6   : > { %4224 = vmatmul.msk.f32.vlgmr.msra.gmra.mxu3 %vm529_vm13, %v947_v12  ;;  %v951_v19 = vpop.permute.xlu0 %950 }
 0x3f7   : > { %4216 = vmatmul.msk.f32.gmra.mxu0 %vm529_vm13, %v806_v14 }
 0x3fe   : > { %4225 = vmatmul.msk.f32.gmra.mxu3 %vm529_vm13, %v949_v15 }
 0x406   : > { %4226 = vmatmul.msk.f32.gmra.mxu3 %vm529_vm13, %v951_v19 }
 0x448   : > { %v643_v20 = vpop.f32.mrf.mxu3 }
 0x449   : > { %652 = vst.msk [vmem:[#allocation2] sm:$0xff] %vm529_vm13, %v643_v20 }
 0x451   : > { %v646_v22 = vpop.f32.mrf.mxu3 }
 0x452   : > { %653 = vst.msk [vmem:[#allocation2 + $0x8] sm:$0xff] %vm529_vm13, %v646_v22 }
 0x459   : > { %v649_v23 = vpop.f32.mrf.mxu3 }
 0x45a   : > { %655 = vst.msk [vmem:[#allocation2 + $0x10] sm:$0x1] %vm654_vm3, %v649_v23 }
 0x461   : > { %v842_v24 = vpop.f32.mrf.mxu0  ;;  %v5260_v30 = vpop.f32.mrf.mxu3 }
 0x462   : > { %v851_v25 = vsel %vm571_vm15, %v842_v24, -inf  ;;  %v706_v51 = vsel %vm571_vm15, %v5260_v30, -inf }
 0x463   : > { %852 = vmax.xlane.f32.xlu1 %v851_v25 }
 0x469   : > { %v5264_v31 = vpop.f32.mrf.mxu3 }
 0x46a   : > { %v709_v39 = vsel %vm571_vm15, %v5264_v31, -inf }
 0x46c   : > { %v845_v26 = vpop.f32.mrf.mxu0 }
 0x46d   : > { %v854_v27 = vsel %vm571_vm15, %v845_v26, -inf }
 0x46e   : > { %855 = vmax.xlane.f32.xlu0 %v854_v27 }
 0x471   : > { %v5268_v32 = vpop.f32.mrf.mxu3 }
 0x472   : > { %v712_v36 = vsel %vm578_vm0, %v5268_v32, -inf }
 0x474   : > { %v5256_v28 = vpop.f32.mrf.mxu0 }
 0x475   : > { %v857_v29 = vsel %vm578_vm0, %v5256_v28, -inf }
 0x476   : > { %858 = vmax.xlane.f32.xlu2 %v857_v29 }
 0x479   : > { %v5270_v33 = vpop.f32.mrf.mxu3 }
 0x47a   : > { %v996_v40 = vsel %vm571_vm15, %v5270_v33, -inf }
 0x481   : > { %v5272_v35 = vpop.f32.mrf.mxu3 }
 0x482   : > { %4544 = vrot.lane.b32.xlu0 %v5160_v17, %s6581_s30 }
 0x489   : > { %v993_v37 = vpop.f32.mrf.mxu3 }
 0x48a   : > { %v1002_v38 = vsel %vm578_vm0, %v993_v37, -inf }
 0x48e   : > { %743 = vrot.lane.b32.xlu2 %v5164_v18, %s6581_s30  ;;  %s6639_s30 = smov 56  }
 0x4ac   : > { %713 = vmax.xlane.f32.xlu0 %v712_v36 }
 0x4b4   : > { %1003 = vmax.xlane.f32.xlu0 %v1002_v38 }
 0x4b7   : > { %710 = vmax.xlane.f32.xlu2 %v709_v39 }
 0x4bf   : > { %997 = vmax.xlane.f32.xlu2 %v996_v40 }
 0x4c8   : > { %888 = vrot.lane.b32.xlu0 %v5164_v18, %s6575_s11 }
 0x4d6   : > { %v853_v41 = vpop.xlane.xlu1 %852 }
 0x4d7   : > { %v860_v42 = vsub.f32 %v842_v24, %v853_v41  ;;  %4549 = vrot.lane.b32.xlu2 %v5160_v17, %s6575_s11  ;;  %s6577_s11 = smov 24  }
 0x4d9   : > { %v863_v43 = vmul.f32 1.442695, %v860_v42 }
 0x4db   : > { %4642 = vpow2.f32 %v863_v43 }
 0x4df   : > { %1033 = vrot.lane.b32.xlu2 %v5164_v18, %s6573_s22  ;;  %v999_v18 = vsel %vm571_vm15, %v5272_v35, -inf }
 0x4e1   : > { %v4643_v44 = vpop.eup %4642  ;;  %v856_v45 = vpop.xlane.xlu0 %855 }
 0x4e2   : > { %v861_v46 = vsub.f32 %v845_v26, %v856_v45  ;;  %v869_v47 = vsel %vm571_vm15, %v4643_v44, 0.0 }
 0x4e3   : > { %870 = vadd.xlane.f32.xlu1 %v869_v47 }
 0x4e4   : > { %v865_v49 = vmul.f32 1.442695, %v861_v46 }
 0x4e6   : > { %4644 = vpow2.f32 %v865_v49 }
 0x4e9   : > { %v5288_v50 = vpop.xlane.xlu2 %858 }
 0x4eb   : > { %707 = vmax.xlane.f32.xlu1 %v706_v51 }
 0x4ec   : > { %v4645_v52 = vpop.eup %4644 }
 0x4ed   : > { %v872_v54 = vsel %vm571_vm15, %v4645_v52, 0.0 }
 0x4f1   : > { %v744_v53 = vpop.permute.xlu2 %743 }
 0x4f2   : > { %4207 = vmatpush.msk.msra.mxu1 %vm623_vm14, %v744_v53  ;;  %873 = vadd.xlane.f32.xlu0 %v872_v54 }
 0x4f3   : > { %1000 = vmax.xlane.f32.xlu1 %v999_v18 }
 0x4f4   : > { %v4545_v55 = vpop.permute.xlu0 %4544 }
 0x4f5   : > { %v4546_v56 = vunpack.i.l.bf16 %v4545_v55  ;;  %v4547_v57 = vunpack.i.h.bf16 %v4545_v55 }
 0x4f7   : > { %772 = vmatpush.msra.mxu1 %v4546_v56 }
 0x4f9   : > { %773 = vmatpush.msra.mxu1 %v4547_v57 }
 0x51f   : > { %v714_v58 = vpop.xlane.xlu0 %713 }
 0x520   : > { %v717_v24 = vsub.f32 %v5268_v32, %v714_v58 }
 0x522   : > { %v722_v29 = vmul.f32 1.442695, %v717_v24  ;;  %v1096_v24 = vld [vmem:[%s6566_s4 + $0x10] sm:$0xff] }
 0x527   : > { %v1004_v59 = vpop.xlane.xlu0 %1003 }
 0x528   : > { %v1007_v60 = vsub.f32 %v993_v37, %v1004_v59 }
 0x52a   : > { %v1012_v61 = vmul.f32 1.442695, %v1007_v60  ;;  %v711_v62 = vpop.xlane.xlu2 %710 }
 0x52b   : > { %v716_v13 = vsub.f32 %v5264_v31, %v711_v62 }
 0x52c   : > { %4646 = vpow2.f32 %v1012_v61 }
 0x52d   : > { %v720_v15 = vmul.f32 1.442695, %v716_v13 }
 0x532   : > { %v5296_v63 = vpop.eup %4646  ;;  %v998_v0 = vpop.xlane.xlu2 %997 }
 0x533   : > { %v1020_v1 = vsel %vm578_vm0, %v5296_v63, 0.0  ;;  %v1005_v37 = vsub.f32 %v5270_v33, %v998_v0  ;;  %v862_v33 = vsub.f32 %v5256_v28, %v5288_v50 }
 0x534   : > { %1021 = vadd.xlane.f32.xlu0 %v1020_v1 }
 0x535   : > { %v1008_v38 = vmul.f32 1.442695, %v1005_v37  ;;  %v867_v43 = vmul.f32 1.442695, %v862_v33 }
 0x53a   : > { %v4550_v2 = vpop.permute.xlu2 %4549  ;;  %v889_v3 = vpop.permute.xlu0 %888 }
 0x53b   : > { %4217 = vmatpush.msk.msrb.mxu2 %vm623_vm14, %v889_v3  ;;  %v4551_v4 = vunpack.i.l.bf16 %v4550_v2  ;;  %v4552_v5 = vunpack.i.h.bf16 %v4550_v2 }
 0x53d   : > { %917 = vmatpush.msrb.mxu2 %v4551_v4 }
 0x53f   : > { %918 = vmatpush.msrb.mxu2 %v4552_v5 }
 0x542   : > { %v1034_v6 = vpop.permute.xlu2 %1033 }
 0x543   : > { %4227 = vmatpush.msk.msrb.mxu1 %vm623_vm14, %v1034_v6 }
 0x556   : > { %v871_v7 = vpop.xlane.xlu1 %870 }
 0x557   : > { %4648 = vrcp.f32 %v871_v7 }
 0x55d   : > { %v4649_v8 = vpop.eup %4648 }
 0x55e   : > { %v708_v9 = vpop.xlane.xlu1 %707  ;;  %v881_v10 = vmul.f32 %v4649_v8, %v4643_v44 }
 0x55f   : > { %v715_v12 = vsub.f32 %v5260_v30, %v708_v9 }
 0x560   : > { %4218 = vmatmul.msk.f32.vlgmr.msrb.gmra.mxu2 %vm571_vm15, %v881_v10 }
 0x561   : > { %v718_v14 = vmul.f32 1.442695, %v715_v12 }
 0x563   : > { %4650 = vpow2.f32 %v718_v14 }
 0x565   : > { %v874_v19 = vpop.xlane.xlu0 %873 }
 0x566   : > { %4652 = vrcp.f32 %v874_v19  ;;  %v1001_v20 = vpop.xlane.xlu1 %1000 }
 0x567   : > { %v1006_v22 = vsub.f32 %v5272_v35, %v1001_v20  ;;  %4654 = vpow2.f32 %v720_v15 }
 0x569   : > { %v4651_v23 = vpop.eup %4650  ;;  %v1010_v25 = vmul.f32 1.442695, %v1006_v22 }
 0x56a   : > { %v724_v26 = vsel %vm571_vm15, %v4651_v23, 0.0 }
 0x56b   : > { %4656 = vpow2.f32 %v1010_v25  ;;  %725 = vadd.xlane.f32.xlu1 %v724_v26  ;;  %v1095_v25 = vld [vmem:[%s6566_s4 + $0x8] sm:$0xff]  ;;  %v1094_v26 = vld [vmem:[%s6566_s4] sm:$0xff] }
 0x56c   : > { %v4653_v27 = vpop.eup %4652  ;;  %4658 = vpow2.f32 %v722_v29 }
 0x56d   : > { %v882_v30 = vmul.f32 %v4653_v27, %v4645_v52  ;;  %v4655_v31 = vpop.eup %4654  ;;  %4660 = vpow2.f32 %v1008_v38  ;;  %v1134_v38 = vperm.slane %v5142_v48, 3 }
 0x56e   : > { %v727_v32 = vsel %vm571_vm15, %v4655_v31, 0.0  ;;  %4662 = vpow2.f32 %v867_v43 }
 0x56f   : > { %4219 = vmatmul.msk.f32.gmra.mxu2 %vm571_vm15, %v882_v30 }
 0x571   : > { %v4657_v36 = vpop.eup %4656 }
 0x572   : > { %v1017_v35 = vsel %vm571_vm15, %v4657_v36, 0.0  ;;  %v4659_v39 = vpop.eup %4658 }
 0x573   : > { %1018 = vadd.xlane.f32.xlu2 %v1017_v35  ;;  %728 = vadd.xlane.f32.xlu1 %v727_v32  ;;  %v730_v40 = vsel %vm578_vm0, %v4659_v39, 0.0  ;;  %v4661_v41 = vpop.eup %4660  ;;  %v1098_v32 = vperm.slane %v5142_v48, 2 }
 0x574   : > { %v1014_v42 = vsel %vm571_vm15, %v4661_v41, 0.0  ;;  %v4663_v44 = vpop.eup %4662 }
 0x575   : > { %v875_v45 = vsel %vm578_vm0, %v4663_v44, 0.0 }
 0x57b   : > { %731 = vadd.xlane.f32.xlu1 %v730_v40 }
 0x583   : > { %1015 = vadd.xlane.f32.xlu1 %v1014_v42 }
 0x59c   : > { %4554 = vrot.lane.b32.xlu1 %v5160_v17, %s6573_s22  ;;  %s6579_s22 = smov 8  }
 0x5a7   : > { %v1022_v61 = vpop.xlane.xlu0 %1021 }
 0x5c6   : > { %876 = vadd.xlane.f32.xlu1 %v875_v45 }
 0x5de   : > { %v726_v46 = vpop.xlane.xlu1 %725 }
 0x5df   : > { %4664 = vrcp.f32 %v726_v46 }
 0x5e3   : > { %v920_v47 = vpop.f32.mrf.mxu2 }
 0x5e4   : > { %932 = vrot.lane.b32.xlu0 %v920_v47, %s6585_s12 }
 0x5e5   : > { %v4665_v49 = vpop.eup %4664 }
 0x5e6   : > { %v736_v51 = vmul.f32 %v4665_v49, %v4651_v23  ;;  %v729_v52 = vpop.xlane.xlu1 %728  ;;  %v1019_v55 = vpop.xlane.xlu2 %1018  ;;  %v1097_v23 = vld [vmem:[%s6566_s4 + $0x18] sm:$0xff] }
 0x5e7   : > { %4666 = vrcp.f32 %v729_v52  ;;  %1120 = vmatpush.msra.mxu0 %v1097_v23 }
 0x5e8   : > { %4208 = vmatmul.msk.f32.vlgmr.msra.gmra.mxu1 %vm571_vm15, %v736_v51 }
 0x5e9   : > { %1121 = vmatpush.msra.mxu0 %v1096_v24  ;;  %v1281_v24 = vld [vmem:[%s6568_s6 + $0x70] sm:$0xff] }
 0x5eb   : > { %1122 = vmatpush.msra.mxu0 %v1095_v25  ;;  %v1280_v25 = vld [vmem:[%s6568_s6 + $0x68] sm:$0xff] }
 0x5ed   : > { %v4667_v17 = vpop.eup %4666  ;;  %1123 = vmatpush.msra.mxu0 %v1094_v26 }
 0x5ee   : > { %v732_v28 = vpop.xlane.xlu1 %731  ;;  %v737_v50 = vmul.f32 %v4667_v17, %v4655_v31 }
 0x5ef   : > { %4668 = vrcp.f32 %v732_v28 }
 0x5f0   : > { %4209 = vmatmul.msk.f32.gmra.mxu1 %vm571_vm15, %v737_v50 }
 0x5f2   : > { %v923_v7 = vpop.f32.mrf.mxu2 }
 0x5f5   : > { %v4669_v53 = vpop.eup %4668 }
 0x5f6   : > { %v738_v54 = vmul.f32 %v4669_v53, %v4659_v39  ;;  %v1016_v18 = vpop.xlane.xlu1 %1015 }
 0x5f7   : > { %4670 = vrcp.f32 %v1016_v18  ;;  %v1200_v18 = vld [vmem:[%s6567_s5] sm:$0xff] }
 0x5f8   : > { %4210 = vmatmul.msk.f32.gmra.mxu1 %vm571_vm15, %v738_v54  ;;  %4672 = vrcp.f32 %v1019_v55  ;;  %v1202_v54 = vld [vmem:[%s6567_s5 + $0x10] sm:$0xff] }
 0x5f9   : > { %4674 = vrcp.f32 %v1022_v61 }
 0x5fd   : > { %v4671_v57 = vpop.eup %4670 }
 0x5fe   : > { %v1026_v60 = vmul.f32 %v4671_v57, %v4661_v41  ;;  %v4673_v62 = vpop.eup %4672 }
 0x5ff   : > { %v1027_v0 = vmul.f32 %v4673_v62, %v4657_v36  ;;  %v4675_v1 = vpop.eup %4674 }
 0x600   : > { %v1028_v2 = vmul.f32 %v4675_v1, %v5296_v63 }
 0x60e   : > { %v4555_v56 = vpop.permute.xlu1 %4554 }
 0x60f   : > { %v4556_v58 = vunpack.i.l.bf16 %v4555_v56  ;;  %v4557_v59 = vunpack.i.h.bf16 %v4555_v56 }
 0x611   : > { %1062 = vmatpush.msrb.mxu1 %v4556_v58 }
 0x613   : > { %1063 = vmatpush.msrb.mxu1 %v4557_v59 }
 0x614   : > { %4228 = vmatmul.msk.f32.vlgmr.msrb.gmra.mxu1 %vm571_vm15, %v1026_v60 }
 0x61c   : > { %4229 = vmatmul.msk.f32.gmra.mxu1 %vm571_vm15, %v1027_v0 }
 0x624   : > { %4230 = vmatmul.msk.f32.gmra.mxu1 %vm571_vm15, %v1028_v2 }
 0x639   : > { %v877_v3 = vpop.xlane.xlu1 %876 }
 0x63a   : > { %4676 = vrcp.f32 %v877_v3 }
 0x640   : > { %v4677_v4 = vpop.eup %4676 }
 0x641   : > { %v883_v5 = vmul.f32 %v4677_v4, %v4663_v44 }
 0x643   : > { %4220 = vmatmul.msk.f32.gmra.mxu2 %vm571_vm15, %v883_v5 }
 0x656   : > { %v933_v14 = vpop.permute.xlu0 %932 }
 0x665   : > { %v775_v6 = vpop.f32.mrf.mxu1 }
 0x666   : > { %787 = vrot.lane.b32.xlu2 %v775_v6, %s6579_s22  ;;  %v1192_v6 = vperm.slane %v5142_v48, 4 }
 0x66d   : > { %v778_v8 = vpop.f32.mrf.mxu1 }
 0x66e   : > { %934 = vrot.lane.b32.xlu2 %v923_v7, %s6585_s12  ;;  %789 = vrot.lane.b32.xlu1 %v778_v8, %s6579_s22 }
 0x675   : > { %v781_v9 = vpop.f32.mrf.mxu1 }
 0x676   : > { %791 = vrot.lane.b32.xlu2 %v781_v9, %s6579_s22  ;;  %s6633_s22 = smov 88  }
 0x691   : > { %v1065_v63 = vpop.f32.mrf.mxu1 }
 0x692   : > { %1077 = vrot.lane.b32.xlu0 %v1065_v63, %s6577_s11  ;;  %v1196_v63 = vperm.slane %v5142_v48, 5  ;;  %v1282_v48 = vld [vmem:[%s6568_s6 + $0x78] sm:$0xff] }
 0x693   : > { %1284 = vmatpush.msrb.mxu3 %v1282_v48 }
 0x695   : > { %1285 = vmatpush.msrb.mxu3 %v1281_v24 }
 0x697   : > { %1286 = vmatpush.msrb.mxu3 %v1280_v25 }
 0x699   : > { %v1068_v10 = vpop.f32.mrf.mxu1 }
 0x69a   : > { %1079 = vrot.lane.b32.xlu0 %v1068_v10, %s6577_s11 }
 0x6a1   : > { %v1071_v12 = vpop.f32.mrf.mxu1 }
 0x6a2   : > { %1081 = vrot.lane.b32.xlu2 %v1071_v12, %s6577_s11  ;;  %s6640_s11 = smov 48  }
 0x6c0   : > { %v788_v13 = vpop.permute.xlu2 %787 }
 0x6c1   : > { %797 = vst.msk [vmem:[#allocation2] sm:$0xff] %vm796_vm4, %v788_v13 }
 0x6c2   : > { %942 = vst.msk [vmem:[#allocation2] sm:$0xff] %vm941_vm5, %v933_v14 }
 0x6c6   : > { %v926_v15 = vpop.f32.mrf.mxu2 }
 0x6c7   : > { %936 = vrot.lane.b32.xlu0 %v926_v15, %s6585_s12  ;;  %s6634_s12 = smov 80  }
 0x6c8   : > { %v935_v19 = vpop.permute.xlu2 %934 }
 0x6d0   : > { %v792_v20 = vpop.permute.xlu2 %791 }
 0x6d1   : > { %800 = vst.msk [vmem:[#allocation2 + $0x10] sm:$0x1] %vm6595_vm6, %v792_v20 }
 0x6e0   : > { %v790_v22 = vpop.permute.xlu1 %789 }
 0x6e1   : > { %798 = vst.msk [vmem:[#allocation2 + $0x8] sm:$0xff] %vm796_vm4, %v790_v22 }
 0x6e2   : > { %943 = vst.msk [vmem:[#allocation2 + $0x8] sm:$0xff] %vm941_vm5, %v935_v19 }
 0x6fc   : > { %v1082_v37 = vpop.permute.xlu2 %1081 }
 0x704   : > { %v1078_v27 = vpop.permute.xlu0 %1077 }
 0x705   : > { %1087 = vst.msk [vmem:[#allocation2] sm:$0xff] %vm1086_vm7, %v1078_v27 }
 0x70c   : > { %v1080_v29 = vpop.permute.xlu0 %1079  ;;  %v1091_v30 = vld [vmem:[#allocation2] sm:$0xff] }
 0x70d   : > { %1088 = vst.msk [vmem:[#allocation2 + $0x8] sm:$0xff] %vm1086_vm7, %v1080_v29  ;;  %4231 = vmatmul.msk.f32.vlgmr.msra.gmra.mxu0 %vm413_vm1, %v1091_v30 }
 0x714   : > { %v1092_v31 = vld [vmem:[#allocation2 + $0x8] sm:$0xff] }
 0x715   : > { %4232 = vmatmul.msk.f32.gmra.mxu0 %vm413_vm1, %v1092_v31 }
 0x739   : > { %v937_v36 = vpop.permute.xlu0 %936 }
 0x73a   : > { %945 = vst.msk [vmem:[#allocation2 + $0x10] sm:$0x1] %vm6594_vm8, %v937_v36 }
 0x73b   : > { %1090 = vst.msk [vmem:[#allocation2 + $0x10] sm:$0x1] %vm6593_vm9, %v1082_v37 }
 0x742   : > { %v1093_v35 = vld [vmem:[#allocation2 + $0x10] sm:$0x1] }
 0x743   : > { %4233 = vmatmul.msk.f32.gmra.mxu0 %vm413_vm1, %v1093_v35 }
 0x78a   : > { %v1125_v39 = vpop.f32.mrf.mxu0 }
 0x78b   : > { %v1126_v40 = vadd.f32 %v1125_v39, %v1098_v32 }
 0x78d   : > { %v1135_v41 = vmul.f32 %v1134_v38, %v1126_v40 }
 0x78f   : > { %v5363_v42 = vadd.f32 %v1135_v41, %v5101_v11 }
 0x791   : > { %v1141_v33 = vmul.f32 %v5363_v42, %v5363_v42 }
 0x792   : > { %v1128_v43 = vpop.f32.mrf.mxu0 }
 0x793   : > { %v1129_v44 = vadd.f32 %v1128_v43, %v1098_v32  ;;  %v1144_v45 = vsel %vm413_vm1, %v1141_v33, 0.0  ;;  %v1279_v33 = vld [vmem:[%s6568_s6 + $0x60] sm:$0xff]  ;;  %v1278_v43 = vld [vmem:[%s6568_s6 + $0x58] sm:$0xff] }
 0x794   : > { %1145 = vadd.xlane.f32.xlu0 %v1144_v45  ;;  %1287 = vmatpush.msrb.mxu3 %v1279_v33  ;;  %v1276_v45 = vld [vmem:[%s6568_s6 + $0x48] sm:$0xff] }
 0x795   : > { %v1136_v46 = vmul.f32 %v1134_v38, %v1129_v44  ;;  %v1277_v44 = vld [vmem:[%s6568_s6 + $0x50] sm:$0xff] }
 0x796   : > { %1288 = vmatpush.msrb.mxu3 %v1278_v43 }
 0x797   : > { %v5369_v47 = vadd.f32 %v1136_v46, %v5109_v16  ;;  %v1203_v16 = vld [vmem:[%s6567_s5 + $0x18] sm:$0xff]  ;;  %v1275_v46 = vld [vmem:[%s6568_s6 + $0x40] sm:$0xff] }
 0x798   : > { %1226 = vmatpush.msra.mxu2 %v1203_v16  ;;  %1289 = vmatpush.msrb.mxu3 %v1277_v44  ;;  %v1267_v16 = vld [vmem:[%s6568_s6] sm:$0xff] }
 0x799   : > { %v1142_v49 = vmul.f32 %v5369_v47, %v5369_v47 }
 0x79a   : > { %1227 = vmatpush.msra.mxu2 %v1202_v54  ;;  %1290 = vmatpush.msrb.mxu3 %v1276_v45  ;;  %v4890_v54 = vld [vmem:[%s6569_s7] sm:$0xff] }
 0x79b   : > { %v1147_v51 = vsel %vm413_vm1, %v1142_v49, 0.0  ;;  %v1274_v49 = vld [vmem:[%s6568_s6 + $0x38] sm:$0xff] }
 0x79c   : > { %1148 = vadd.xlane.f32.xlu1 %v1147_v51  ;;  %1291 = vmatpush.msrb.mxu3 %v1275_v46  ;;  %v1273_v51 = vld [vmem:[%s6568_s6 + $0x30] sm:$0xff] }
 0x79e   : > { %1292 = vmatpush.msrb.mxu3 %v1274_v49 }
 0x7a0   : > { %1293 = vmatpush.msrb.mxu3 %v1273_v51 }
 0x7c0   : > { %v1131_v11 = vpop.f32.mrf.mxu0 }
 0x7c1   : > { %v1132_v52 = vadd.f32 %v1131_v11, %v1098_v32  ;;  %v1272_v11 = vld [vmem:[%s6568_s6 + $0x28] sm:$0xff] }
 0x7c2   : > { %1294 = vmatpush.msrb.mxu3 %v1272_v11  ;;  %v4241_v11 = vld [vmem:[%s6565_s3 + $0x30] sm:$0xff] }
 0x7c3   : > { %v1137_v17 = vmul.f32 %v1134_v38, %v1132_v52  ;;  %v1271_v52 = vld [vmem:[%s6568_s6 + $0x20] sm:$0xff] }
 0x7c4   : > { %1295 = vmatpush.msrb.mxu3 %v1271_v52  ;;  %v4239_v52 = vld [vmem:[%s6565_s3 + $0x20] sm:$0xff] }
 0x7c5   : > { %v5375_v28 = vadd.f32 %v1137_v17, %v5117_v21  ;;  %v1201_v21 = vld [vmem:[%s6567_s5 + $0x8] sm:$0xff]  ;;  %v1270_v17 = vld [vmem:[%s6568_s6 + $0x18] sm:$0xff] }
 0x7c6   : > { %1228 = vmatpush.msra.mxu2 %v1201_v21  ;;  %1296 = vmatpush.msrb.mxu3 %v1270_v17  ;;  %v1204_v21 = vperm.slane %v4890_v54, 6 }
 0x7c7   : > { %v1143_v50 = vmul.f32 %v5375_v28, %v5375_v28 }
 0x7c8   : > { %1229 = vmatpush.msra.mxu2 %v1200_v18 }
 0x7c9   : > { %v1150_v53 = vsel %vm420_vm2, %v1143_v50, 0.0  ;;  %v1269_v50 = vld [vmem:[%s6568_s6 + $0x10] sm:$0xff] }
 0x7ca   : > { %1151 = vadd.xlane.f32.xlu2 %v1150_v53  ;;  %v1268_v53 = vld [vmem:[%s6568_s6 + $0x8] sm:$0xff]  ;;  %1297 = vmatpush.msrb.mxu3 %v1269_v50 }
 0x7cc   : > { %1298 = vmatpush.msrb.mxu3 %v1268_v53 }
 0x7ce   : > { %1299 = vmatpush.msrb.mxu3 %v1267_v16 }
 0x807   : > { %v1146_v55 = vpop.xlane.xlu0 %1145 }
 0x808   : > { %v1153_v56 = vmul.f32 %v1146_v55, %v5134_v34 }
 0x80a   : > { %v1156_v57 = vadd.f32 1e-06, %v1153_v56 }
 0x80c   : > { %4678 = vrsqrt.f32 %v1156_v57  ;;  %vm1165_vm11 = vweird.f32 %v1156_v57 }
 0x80f   : > { %v1149_v58 = vpop.xlane.xlu1 %1148 }
 0x810   : > { %v1154_v59 = vmul.f32 %v1149_v58, %v5134_v34 }
 0x812   : > { %v4679_v60 = vpop.eup %4678  ;;  %v1157_v61 = vadd.f32 1e-06, %v1154_v59 }
 0x813   : > { %v1160_v62 = vmul.f32 %v4679_v60, %v1156_v57  ;;  %vm1166_vm10 = vweird.f32 %v4679_v60 }
 0x814   : > { %4680 = vrsqrt.f32 %v1157_v61  ;;  %vm1167_vm12 = vmor %vm1165_vm11, %vm1166_vm10  ;;  %vm1175_vm8 = vweird.f32 %v1157_v61 }
 0x815   : > { %v1161_v0 = vmul.f32 %v4679_v60, %v1160_v62 }
 0x817   : > { %v1162_v1 = vmul.f32 0.5, %v1161_v0 }
 0x819   : > { %v1163_v2 = vsub.f32 1.5, %v1162_v1 }
 0x81a   : > { %v4681_v3 = vpop.eup %4680 }
 0x81b   : > { %v1164_v4 = vmul.f32 %v4679_v60, %v1163_v2  ;;  %v1170_v5 = vmul.f32 %v4681_v3, %v1157_v61  ;;  %vm1176_vm9 = vweird.f32 %v4681_v3 }
 0x81c   : > { %vm1177_vm6 = vmor %vm1175_vm8, %vm1176_vm9 }
 0x81d   : > { %v1168_v7 = vsel %vm1167_vm12, %v4679_v60, %v1164_v4  ;;  %v1171_v8 = vmul.f32 %v4681_v3, %v1170_v5 }
 0x81e   : > { %v1189_v9 = vmul.f32 %v1168_v7, %v5363_v42 }
 0x81f   : > { %v1172_v10 = vmul.f32 0.5, %v1171_v8 }
 0x820   : > { %v1193_v12 = vmul.f32 %v1192_v6, %v1189_v9 }
 0x821   : > { %v1173_v13 = vsub.f32 1.5, %v1172_v10 }
 0x822   : > { %v1197_v14 = vadd.f32 %v1196_v63, %v1193_v12 }
 0x823   : > { %v1174_v15 = vmul.f32 %v4681_v3, %v1173_v13 }
 0x824   : > { %4234 = vmatmul.msk.f32.vlgmr.msra.gmra.mxu2 %vm413_vm1, %v1197_v14 }
 0x825   : > { %v1178_v19 = vsel %vm1177_vm6, %v4681_v3, %v1174_v15 }
 0x826   : > { %v1190_v20 = vmul.f32 %v1178_v19, %v5369_v47 }
 0x828   : > { %v1194_v22 = vmul.f32 %v1192_v6, %v1190_v20 }
 0x82a   : > { %v1198_v23 = vadd.f32 %v1196_v63, %v1194_v22 }
 0x82c   : > { %4235 = vmatmul.msk.f32.gmra.mxu2 %vm413_vm1, %v1198_v23 }
 0x83d   : > { %v1152_v26 = vpop.xlane.xlu2 %1151 }
 0x83e   : > { %v1155_v27 = vmul.f32 %v1152_v26, %v5134_v34 }
 0x840   : > { %v1158_v29 = vadd.f32 1e-06, %v1155_v27  ;;  %v1283_v27 = vperm.slane %v4890_v54, 7 }
 0x842   : > { %4682 = vrsqrt.f32 %v1158_v29  ;;  %vm1185_vm8 = vweird.f32 %v1158_v29 }
 0x848   : > { %v4683_v30 = vpop.eup %4682 }
 0x849   : > { %v1180_v31 = vmul.f32 %v4683_v30, %v1158_v29  ;;  %vm1186_vm6 = vweird.f32 %v4683_v30  ;;  %v4618_v29 = vld [vmem:[%s6569_s7 + $0x8] ss:$0 sm:$0xff] }
 0x84a   : > { %vm1187_vm9 = vmor %vm1185_vm8, %vm1186_vm6 }
 0x84b   : > { %v1181_v36 = vmul.f32 %v4683_v30, %v1180_v31 }
 0x84d   : > { %v1182_v37 = vmul.f32 0.5, %v1181_v36 }
 0x84f   : > { %v1183_v35 = vsub.f32 1.5, %v1182_v37 }
 0x851   : > { %v1184_v32 = vmul.f32 %v4683_v30, %v1183_v35 }
 0x853   : > { %v1188_v38 = vsel %vm1187_vm9, %v4683_v30, %v1184_v32 }
 0x854   : > { %v1191_v39 = vmul.f32 %v1188_v38, %v5375_v28 }
 0x856   : > { %v1195_v40 = vmul.f32 %v1192_v6, %v1191_v39 }
 0x858   : > { %v1199_v41 = vadd.f32 %v1196_v63, %v1195_v40 }
 0x85a   : > { %4236 = vmatmul.msk.f32.gmra.mxu2 %vm413_vm1, %v1199_v41 }
 0x8a7   : > { %v1231_v18 = vpop.f32.mrf.mxu2 }
 0x8a8   : > { %v1232_v55 = vadd.f32 %v1231_v18, %v1204_v21 }
 0x8aa   : > { %v1240_v56 = vmul.f32 %v1232_v55, %v1232_v55 }
 0x8ac   : > { %v1243_v57 = vmul.f32 %v1240_v56, %v1232_v55 }
 0x8ae   : > { %v1246_v58 = vmul.f32 0.044715, %v1243_v57 }
 0x8af   : > { %v1234_v59 = vpop.f32.mrf.mxu2 }
 0x8b0   : > { %v1249_v60 = vadd.f32 %v1246_v58, %v1232_v55  ;;  %v1235_v61 = vadd.f32 %v1234_v59, %v1204_v21  ;;  %v5492_v58 = vld [vmem:[%s6569_s7 + $0x10] sm:$0xff] }
 0x8b2   : > { %v1252_v62 = vmul.f32 0.7978846, %v1249_v60  ;;  %v1241_v0 = vmul.f32 %v1235_v61, %v1235_v61 }
 0x8b4   : > { %4684 = vtanh.f32 %v1252_v62  ;;  %v1244_v1 = vmul.f32 %v1241_v0, %v1235_v61  ;;  %v1371_v0 = vperm.slane %v5492_v58, 0 }
 0x8b6   : > { %v1247_v2 = vmul.f32 0.044715, %v1244_v1 }
 0x8b8   : > { %v1250_v3 = vadd.f32 %v1247_v2, %v1235_v61 }
 0x8ba   : > { %v4685_v4 = vpop.eup %4684  ;;  %v1253_v5 = vmul.f32 0.7978846, %v1250_v3 }
 0x8bb   : > { %v1258_v6 = vadd.f32 1.0, %v4685_v4  ;;  %v1375_v4 = vperm.slane %v5492_v58, 1 }
 0x8bc   : > { %4686 = vtanh.f32 %v1253_v5 }
 0x8bd   : > { %v1261_v7 = vmul.f32 0.5, %v1258_v6 }
 0x8bf   : > { %v1264_v8 = vmul.f32 %v1261_v7, %v1232_v55 }
 0x8c1   : > { %1300 = vmatmul.f32.vlgmr.msrb.gmra.mxu3 %v1264_v8 }
 0x8c2   : > { %v4687_v9 = vpop.eup %4686 }
 0x8c3   : > { %v1259_v63 = vadd.f32 1.0, %v4687_v9 }
 0x8c5   : > { %v1262_v10 = vmul.f32 0.5, %v1259_v63 }
 0x8c7   : > { %v1265_v12 = vmul.f32 %v1262_v10, %v1235_v61 }
 0x8c9   : > { %1303 = vmatmul.f32.gmra.mxu3 %v1265_v12 }
 0x8dd   : > { %v1237_v13 = vpop.f32.mrf.mxu2 }
 0x8de   : > { %v1238_v14 = vadd.f32 %v1237_v13, %v1204_v21 }
 0x8e0   : > { %v1242_v15 = vmul.f32 %v1238_v14, %v1238_v14 }
 0x8e2   : > { %v1245_v19 = vmul.f32 %v1242_v15, %v1238_v14 }
 0x8e4   : > { %v1248_v20 = vmul.f32 0.044715, %v1245_v19 }
 0x8e6   : > { %v1251_v22 = vadd.f32 %v1248_v20, %v1238_v14 }
 0x8e8   : > { %v1254_v23 = vmul.f32 0.7978846, %v1251_v22 }
 0x8ea   : > { %4688 = vtanh.f32 %v1254_v23 }
 0x8f0   : > { %v4689_v48 = vpop.eup %4688 }
 0x8f1   : > { %v1260_v24 = vadd.f32 1.0, %v4689_v48 }
 0x8f3   : > { %v1263_v25 = vmul.f32 0.5, %v1260_v24 }
 0x8f5   : > { %v1266_v26 = vmul.f32 %v1263_v25, %v1238_v14 }
 0x8f7   : > { %1306 = vmatmul.f32.gmra.mxu3 %v1266_v26 }
 0x944   : > { %v1301_v30 = vpop.f32.mrf.mxu3 }
 0x945   : > { %v1302_v31 = vadd.f32 %v1301_v30, %v1283_v27 }
 0x947   : > { %v1311_v36 = vmul.f32 %v4618_v29, %v1302_v31 }
 0x949   : > { %v5458_v37 = vadd.f32 %v1311_v36, %v5363_v42 }
 0x94b   : > { %v1320_v35 = vmul.f32 %v5458_v37, %v5458_v37 }
 0x94c   : > { %v1304_v32 = vpop.f32.mrf.mxu3 }
 0x94d   : > { %v1305_v38 = vadd.f32 %v1304_v32, %v1283_v27  ;;  %v1323_v39 = vsel %vm413_vm1, %v1320_v35, 0.0 }
 0x94e   : > { %1324 = vadd.xlane.f32.xlu0 %v1323_v39 }
 0x94f   : > { %v1312_v40 = vmul.f32 %v4618_v29, %v1305_v38 }
 0x951   : > { %v5464_v41 = vadd.f32 %v1312_v40, %v5369_v47  ;;  %v4242_v47 = vld [vmem:[%s6565_s3 + $0x38] sm:$0xff] }
 0x952   : > { %1405 = vmatpush.msra.mxu1 %v4242_v47 }
 0x953   : > { %v1321_v33 = vmul.f32 %v5464_v41, %v5464_v41 }
 0x954   : > { %1406 = vmatpush.msra.mxu1 %v4241_v11 }
 0x955   : > { %v1326_v43 = vsel %vm413_vm1, %v1321_v33, 0.0 }
 0x956   : > { %1327 = vadd.xlane.f32.xlu1 %v1326_v43 }
 0x97a   : > { %v1307_v42 = vpop.f32.mrf.mxu3 }
 0x97b   : > { %v1308_v44 = vadd.f32 %v1307_v42, %v1283_v27 }
 0x97d   : > { %v1313_v45 = vmul.f32 %v4618_v29, %v1308_v44 }
 0x97f   : > { %v5470_v46 = vadd.f32 %v1313_v45, %v5375_v28  ;;  %v4240_v28 = vld [vmem:[%s6565_s3 + $0x28] sm:$0xff] }
 0x980   : > { %1407 = vmatpush.msra.mxu1 %v4240_v28 }
 0x981   : > { %v1322_v49 = vmul.f32 %v5470_v46, %v5470_v46 }
 0x982   : > { %1408 = vmatpush.msra.mxu1 %v4239_v52 }
 0x983   : > { %v1329_v51 = vsel %vm420_vm2, %v1322_v49, 0.0 }
 0x984   : > { %1330 = vadd.xlane.f32.xlu2 %v1329_v51 }
 0x9c1   : > { %v1325_v17 = vpop.xlane.xlu0 %1324 }
 0x9c2   : > { %v1332_v50 = vmul.f32 %v1325_v17, %v5134_v34 }
 0x9c4   : > { %v1335_v53 = vadd.f32 1e-06, %v1332_v50 }
 0x9c6   : > { %4690 = vrsqrt.f32 %v1335_v53  ;;  %vm1344_vm11 = vweird.f32 %v1335_v53 }
 0x9c9   : > { %v1328_v16 = vpop.xlane.xlu1 %1327 }
 0x9ca   : > { %v1333_v54 = vmul.f32 %v1328_v16, %v5134_v34 }
 0x9cc   : > { %v4691_v21 = vpop.eup %4690  ;;  %v1336_v18 = vadd.f32 1e-06, %v1333_v54 }
 0x9cd   : > { %v1339_v55 = vmul.f32 %v4691_v21, %v1335_v53  ;;  %vm1345_vm10 = vweird.f32 %v4691_v21 }
 0x9ce   : > { %4692 = vrsqrt.f32 %v1336_v18  ;;  %vm1346_vm12 = vmor %vm1344_vm11, %vm1345_vm10  ;;  %vm1354_vm8 = vweird.f32 %v1336_v18 }
 0x9cf   : > { %v1340_v56 = vmul.f32 %v4691_v21, %v1339_v55 }
 0x9d1   : > { %v1341_v57 = vmul.f32 0.5, %v1340_v56 }
 0x9d3   : > { %v1342_v59 = vsub.f32 1.5, %v1341_v57 }
 0x9d4   : > { %v4693_v60 = vpop.eup %4692 }
 0x9d5   : > { %v1343_v61 = vmul.f32 %v4691_v21, %v1342_v59  ;;  %v1349_v62 = vmul.f32 %v4693_v60, %v1336_v18  ;;  %vm1355_vm6 = vweird.f32 %v4693_v60 }
 0x9d6   : > { %vm1356_vm9 = vmor %vm1354_vm8, %vm1355_vm6  ;;  %vm6645_vm6 = vcmask 122944   ;;  %vm6646_vm8 = vcmask 188544  }
 0x9d7   : > { %v1347_v1 = vsel %vm1346_vm12, %v4691_v21, %v1343_v61  ;;  %v1350_v2 = vmul.f32 %v4693_v60, %v1349_v62 }
 0x9d8   : > { %v1368_v3 = vmul.f32 %v1347_v1, %v5458_v37 }
 0x9d9   : > { %v1351_v5 = vmul.f32 0.5, %v1350_v2 }
 0x9da   : > { %v1372_v6 = vmul.f32 %v1371_v0, %v1368_v3 }
 0x9db   : > { %v1352_v7 = vsub.f32 1.5, %v1351_v5 }
 0x9dc   : > { %v1376_v8 = vadd.f32 %v1375_v4, %v1372_v6 }
 0x9dd   : > { %v1353_v9 = vmul.f32 %v4693_v60, %v1352_v7 }
 0x9de   : > { %4243 = vmatmul.msk.f32.vlgmr.msra.gmra.mxu1 %vm413_vm1, %v1376_v8 }
 0x9df   : > { %v1357_v63 = vsel %vm1356_vm9, %v4693_v60, %v1353_v9  ;;  %vm6647_vm9 = vcmask 254144  }
 0x9e0   : > { %v1369_v10 = vmul.f32 %v1357_v63, %v5464_v41 }
 0x9e2   : > { %v1373_v12 = vmul.f32 %v1371_v0, %v1369_v10 }
 0x9e4   : > { %v1377_v13 = vadd.f32 %v1375_v4, %v1373_v12 }
 0x9e6   : > { %4244 = vmatmul.msk.f32.gmra.mxu1 %vm413_vm1, %v1377_v13 }
 0x9f7   : > { %v1331_v14 = vpop.xlane.xlu2 %1330 }
 0x9f8   : > { %v1334_v15 = vmul.f32 %v1331_v14, %v5134_v34 }
 0x9fa   : > { %v1337_v19 = vadd.f32 1e-06, %v1334_v15 }
 0x9fc   : > { %4694 = vrsqrt.f32 %v1337_v19  ;;  %vm1364_vm11 = vweird.f32 %v1337_v19 }
 0xa02   : > { %v4695_v20 = vpop.eup %4694 }
 0xa03   : > { %v1359_v22 = vmul.f32 %v4695_v20, %v1337_v19  ;;  %vm1365_vm10 = vweird.f32 %v4695_v20 }
 0xa04   : > { %vm1366_vm12 = vmor %vm1364_vm11, %vm1365_vm10 }
 0xa05   : > { %v1360_v23 = vmul.f32 %v4695_v20, %v1359_v22 }
 0xa07   : > { %v1361_v48 = vmul.f32 0.5, %v1360_v23 }
 0xa09   : > { %v1362_v24 = vsub.f32 1.5, %v1361_v48 }
 0xa0b   : > { %v1363_v25 = vmul.f32 %v4695_v20, %v1362_v24 }
 0xa0d   : > { %v1367_v26 = vsel %vm1366_vm12, %v4695_v20, %v1363_v25 }
 0xa0e   : > { %v1370_v27 = vmul.f32 %v1367_v26, %v5470_v46 }
 0xa10   : > { %v1374_v29 = vmul.f32 %v1371_v0, %v1370_v27 }
 0xa12   : > { %v1378_v30 = vadd.f32 %v1375_v4, %v1374_v29 }
 0xa14   : > { %4245 = vmatmul.msk.f32.gmra.mxu1 %vm413_vm1, %v1378_v30 }
 0xa5b   : > { %v5503_v31 = vpop.f32.mrf.mxu1 }
 0xa5c   : > { %1425 = vrot.lane.b32.xlu2 %v5503_v31, %s6602_s18  ;;  %v1419_v33 = vmul.f32 0.35355338, %v5503_v31 }
 0xa63   : > { %v5507_v36 = vpop.f32.mrf.mxu1 }
 0xa64   : > { %1427 = vrot.lane.b32.xlu1 %v5507_v36, %s6602_s18  ;;  %v5513_v35 = vpack.i.bf16 %v5503_v31, %v5507_v36  ;;  %v1420_v43 = vmul.f32 0.35355338, %v5507_v36 }
 0xa6c   : > { %4559 = vrot.lane.b32.xlu1 %v5513_v35, %s6600_s20 }
 0xa91   : > { %v5517_v32 = vpop.f32.mrf.mxu1 }
 0xa92   : > { %1429 = vrot.lane.b32.xlu0 %v5517_v32, %s6602_s18  ;;  %v5529_v42 = vmul.f32 0.35355338, %v5517_v32  ;;  %s6644_s18 = smov 16  }
 0xab6   : > { %v1426_v40 = vpop.permute.xlu2 %1425 }
 0xad6   : > { %v1428_v39 = vpop.permute.xlu1 %1427 }
 0xade   : > { %v4560_v50 = vpop.permute.xlu1 %4559 }
 0xadf   : > { %v4561_v57 = vunpack.i.l.bf16 %v4560_v50  ;;  %v4562_v61 = vunpack.i.h.bf16 %v4560_v50 }
 0xb04   : > { %v1430_v38 = vpop.permute.xlu0 %1429 }
 0xb05   : > { %4246 = vmatpush.xpose.msk.msrb.mxu0 %vm529_vm13, %v1430_v38 }
 0xb09   : > { %4247 = vmatpush.xpose.msk.msrb.mxu0 %vm529_vm13, %v1428_v39 }
 0xb0d   : > { %4248 = vmatpush.xpose.msk.msrb.mxu0 %vm529_vm13, %v1426_v40 }
 0xb10   : > { %4249 = vmatmul.msk.f32.vlgmr.msrb.gmra.mxu0 %vm529_vm13, %v1419_v33 }
 0xb18   : > { %4250 = vmatmul.msk.f32.gmra.mxu0 %vm529_vm13, %v1420_v43 }
 0xb20   : > { %4251 = vmatmul.msk.f32.gmra.mxu0 %vm529_vm13, %v5529_v42 }
 0xb8d   : > { %v1463_v44 = vpop.f32.mrf.mxu0 }
 0xb8e   : > { %v1472_v45 = vsel %vm571_vm15, %v1463_v44, -inf }
 0xb8f   : > { %1473 = vmax.xlane.f32.xlu0 %v1472_v45 }
 0xb95   : > { %v1466_v49 = vpop.f32.mrf.mxu0 }
 0xb96   : > { %v1475_v51 = vsel %vm571_vm15, %v1466_v49, -inf }
 0xb97   : > { %1476 = vmax.xlane.f32.xlu2 %v1475_v51 }
 0xb9d   : > { %v1469_v47 = vpop.f32.mrf.mxu0 }
 0xb9e   : > { %v1478_v11 = vsel %vm578_vm0, %v1469_v47, -inf }
 0xb9f   : > { %1479 = vmax.xlane.f32.xlu1 %v1478_v11 }
 0xba3   : > { %1563 = vrot.lane.b32.xlu0 %v5517_v32, %s6633_s22 }
 0xbab   : > { %1559 = vrot.lane.b32.xlu0 %v5503_v31, %s6633_s22 }
 0xbaf   : > { %1509 = vrot.lane.b32.xlu2 %v5517_v32, %s6600_s20  ;;  %s6643_s20 = smov 24  }
 0xbb3   : > { %1706 = vrot.lane.b32.xlu0 %v5517_v32, %s6634_s12 }
 0xbb8   : > { %1561 = vrot.lane.b32.xlu1 %v5507_v36, %s6633_s22 }
 0xbbb   : > { %1555 = vrot.lane.b32.xlu0 %v1420_v43, %s6635_s25 }
 0xbc0   : > { %1553 = vrot.lane.b32.xlu1 %v1419_v33, %s6635_s25 }
 0xbc3   : > { %1696 = vrot.lane.b32.xlu0 %v1419_v33, %s6636_s27 }
 0xbc8   : > { %1704 = vrot.lane.b32.xlu1 %v5507_v36, %s6634_s12 }
 0xbcb   : > { %1557 = vrot.lane.b32.xlu0 %v5529_v42, %s6635_s25 }
 0xbd0   : > { %1702 = vrot.lane.b32.xlu1 %v5503_v31, %s6634_s12 }
 0xbd8   : > { %1849 = vrot.lane.b32.xlu1 %v5517_v32, %s6637_s28 }
 0xbe0   : > { %1698 = vrot.lane.b32.xlu1 %v1420_v43, %s6636_s27 }
 0xbe8   : > { %1839 = vrot.lane.b32.xlu1 %v1419_v33, %s6638_s29 }
 0xbf0   : > { %1841 = vrot.lane.b32.xlu1 %v1420_v43, %s6638_s29 }
 0xc02   : > { %v1474_v28 = vpop.xlane.xlu0 %1473 }
 0xc03   : > { %v1481_v52 = vsub.f32 %v1463_v44, %v1474_v28 }
 0xc05   : > { %v1484_v17 = vmul.f32 1.442695, %v1481_v52 }
 0xc07   : > { %4696 = vpow2.f32 %v1484_v17 }
 0xc0a   : > { %v1477_v53 = vpop.xlane.xlu2 %1476 }
 0xc0b   : > { %v1482_v16 = vsub.f32 %v1466_v49, %v1477_v53 }
 0xc0d   : > { %v4697_v54 = vpop.eup %4696  ;;  %v1486_v21 = vmul.f32 1.442695, %v1482_v16 }
 0xc0e   : > { %v1490_v18 = vsel %vm571_vm15, %v4697_v54, 0.0 }
 0xc0f   : > { %4698 = vpow2.f32 %v1486_v21  ;;  %1491 = vadd.xlane.f32.xlu0 %v1490_v18 }
 0xc12   : > { %v1510_v55 = vpop.permute.xlu2 %1509  ;;  %v1480_v56 = vpop.xlane.xlu1 %1479 }
 0xc13   : > { %v1483_v59 = vsub.f32 %v1469_v47, %v1480_v56  ;;  %4252 = vmatpush.msk.msrb.mxu2 %vm623_vm14, %v1510_v55 }
 0xc15   : > { %v4699_v60 = vpop.eup %4698  ;;  %v1488_v62 = vmul.f32 1.442695, %v1483_v59  ;;  %v1564_v0 = vpop.permute.xlu0 %1563  ;;  %1538 = vmatpush.msrb.mxu2 %v4561_v57 }
 0xc16   : > { %4256 = vmatpush.xpose.msk.msra.mxu0 %vm529_vm13, %v1564_v0  ;;  %4480 = vmatpush.xpose.msk.msrb.mxu1 %vm529_vm13, %v1564_v0  ;;  %v1493_v1 = vsel %vm571_vm15, %v4699_v60, 0.0 }
 0xc17   : > { %4700 = vpow2.f32 %v1488_v62  ;;  %1539 = vmatpush.msrb.mxu2 %v4562_v61  ;;  %1494 = vadd.xlane.f32.xlu0 %v1493_v1 }
 0xc1d   : > { %v4701_v2 = vpop.eup %4700  ;;  %v1560_v3 = vpop.permute.xlu0 %1559 }
 0xc1e   : > { %v1496_v4 = vsel %vm578_vm0, %v4701_v2, 0.0 }
 0xc1f   : > { %1497 = vadd.xlane.f32.xlu2 %v1496_v4 }
 0xc25   : > { %v1707_v5 = vpop.permute.xlu0 %1706 }
 0xc26   : > { %4266 = vmatpush.xpose.msk.msra.mxu2 %vm529_vm13, %v1707_v5 }
 0xc2a   : > { %v1562_v6 = vpop.permute.xlu1 %1561 }
 0xc2b   : > { %1845 = vrot.lane.b32.xlu0 %v5503_v31, %s6637_s28  ;;  %4257 = vmatpush.xpose.msk.msra.mxu0 %vm529_vm13, %v1562_v6 }
 0xc2c   : > { %4481 = vmatpush.xpose.msk.msrb.mxu1 %vm529_vm13, %v1562_v6 }
 0xc2d   : > { %v1556_v7 = vpop.permute.xlu0 %1555 }
 0xc2f   : > { %4258 = vmatpush.xpose.msk.msra.mxu0 %vm529_vm13, %v1560_v3 }
 0xc30   : > { %4482 = vmatpush.xpose.msk.msrb.mxu1 %vm529_vm13, %v1560_v3 }
 0xc32   : > { %v1554_v8 = vpop.permute.xlu1 %1553 }
 0xc33   : > { %4260 = vmatmul.msk.f32.vlgmr.msrb.gmra.mxu1 %vm529_vm13, %v1556_v7  ;;  %1700 = vrot.lane.b32.xlu0 %v5529_v42, %s6636_s27 }
 0xc34   : > { %4259 = vmatmul.msk.f32.vlgmr.msra.gmra.mxu0 %vm529_vm13, %v1554_v8 }
 0xc35   : > { %v1697_v9 = vpop.permute.xlu0 %1696 }
 0xc37   : > { %1847 = vrot.lane.b32.xlu2 %v5507_v36, %s6637_s28 }
 0xc3a   : > { %v1705_v63 = vpop.permute.xlu1 %1704 }
 0xc3b   : > { %1843 = vrot.lane.b32.xlu0 %v5529_v42, %s6638_s29  ;;  %4267 = vmatpush.xpose.msk.msra.mxu2 %vm529_vm13, %v1705_v63 }
 0xc3d   : > { %v1558_v10 = vpop.permute.xlu0 %1557 }
 0xc3e   : > { %4261 = vmatmul.msk.f32.gmra.mxu1 %vm529_vm13, %v1558_v10 }
 0xc42   : > { %v1703_v12 = vpop.permute.xlu1 %1702 }
 0xc43   : > { %4268 = vmatpush.xpose.msk.msra.mxu2 %vm529_vm13, %v1703_v12 }
 0xc4a   : > { %v1850_v13 = vpop.permute.xlu1 %1849 }
 0xc4b   : > { %4276 = vmatpush.xpose.msk.msra.mxu1 %vm529_vm13, %v1850_v13 }
 0xc52   : > { %v1699_v24 = vpop.permute.xlu1 %1698 }
 0xc5a   : > { %v1840_v30 = vpop.permute.xlu1 %1839 }
 0xc62   : > { %v1842_v36 = vpop.permute.xlu1 %1841 }
 0xc82   : > { %v1492_v14 = vpop.xlane.xlu0 %1491 }
 0xc83   : > { %4702 = vrcp.f32 %v1492_v14 }
 0xc89   : > { %v4703_v15 = vpop.eup %4702 }
 0xc8a   : > { %v1502_v19 = vmul.f32 %v4703_v15, %v4697_v54  ;;  %v1495_v20 = vpop.xlane.xlu0 %1494 }
 0xc8b   : > { %4704 = vrcp.f32 %v1495_v20 }
 0xc8c   : > { %4253 = vmatmul.msk.f32.vlgmr.msrb.gmra.mxu2 %vm571_vm15, %v1502_v19 }
 0xc91   : > { %v4705_v22 = vpop.eup %4704 }
 0xc92   : > { %v1498_v23 = vpop.xlane.xlu2 %1497  ;;  %v1503_v48 = vmul.f32 %v4705_v22, %v4699_v60 }
 0xc93   : > { %4706 = vrcp.f32 %v1498_v23 }
 0xc94   : > { %4254 = vmatmul.msk.f32.gmra.mxu2 %vm571_vm15, %v1503_v48 }
 0xc99   : > { %v4707_v25 = vpop.eup %4706 }
 0xc9a   : > { %v1848_v26 = vpop.permute.xlu2 %1847  ;;  %v1504_v27 = vmul.f32 %v4707_v25, %v4701_v2 }
 0xc9b   : > { %4277 = vmatpush.xpose.msk.msra.mxu1 %vm529_vm13, %v1848_v26 }
 0xc9c   : > { %4255 = vmatmul.msk.f32.gmra.mxu2 %vm571_vm15, %v1504_v27 }
 0xc9d   : > { %v1846_v29 = vpop.permute.xlu0 %1845 }
 0xc9f   : > { %4278 = vmatpush.xpose.msk.msra.mxu1 %vm529_vm13, %v1846_v29 }
 0xca2   : > { %4279 = vmatmul.msk.f32.vlgmr.msra.gmra.mxu1 %vm529_vm13, %v1840_v30 }
 0xca4   : > { %4269 = vmatmul.msk.f32.vlgmr.msra.gmra.mxu2 %vm529_vm13, %v1697_v9 }
 0xca5   : > { %v1701_v31 = vpop.permute.xlu0 %1700 }
 0xcaa   : > { %4280 = vmatmul.msk.f32.gmra.mxu1 %vm529_vm13, %v1842_v36 }
 0xcac   : > { %4270 = vmatmul.msk.f32.gmra.mxu2 %vm529_vm13, %v1699_v24 }
 0xcad   : > { %v1844_v39 = vpop.permute.xlu0 %1843 }
 0xcb0   : > { %v1597_v38 = vpop.f32.mrf.mxu1 }
 0xcb1   : > { %v1594_v40 = vpop.f32.mrf.mxu0  ;;  %v1606_v33 = vsel %vm571_vm15, %v1597_v38, -inf }
 0xcb2   : > { %1607 = vmax.xlane.f32.xlu1 %v1606_v33  ;;  %v1603_v43 = vsel %vm571_vm15, %v1594_v40, -inf  ;;  %4281 = vmatmul.msk.f32.gmra.mxu1 %vm529_vm13, %v1844_v39 }
 0xcb3   : > { %1604 = vmax.xlane.f32.xlu2 %v1603_v43 }
 0xcb4   : > { %4271 = vmatmul.msk.f32.gmra.mxu2 %vm529_vm13, %v1701_v31 }
 0xcbb   : > { %v1600_v42 = vpop.f32.mrf.mxu1 }
 0xcbc   : > { %v1609_v44 = vsel %vm578_vm0, %v1600_v42, -inf }
 0xcbd   : > { %1610 = vmax.xlane.f32.xlu0 %v1609_v44 }
 0xd0f   : > { %v1541_v45 = vpop.f32.mrf.mxu2 }
 0xd10   : > { %1550 = vst.msk [vmem:[#allocation2] sm:$0xff] %vm529_vm13, %v1541_v45 }
 0xd17   : > { %v1544_v49 = vpop.f32.mrf.mxu2 }
 0xd18   : > { %1551 = vst.msk [vmem:[#allocation2 + $0x8] sm:$0xff] %vm529_vm13, %v1544_v49 }
 0xd1f   : > { %v1547_v51 = vpop.f32.mrf.mxu2  ;;  %v1880_v47 = vpop.f32.mrf.mxu1 }
 0xd20   : > { %1552 = vst.msk [vmem:[#allocation2 + $0x10] sm:$0x1] %vm654_vm3, %v1547_v51  ;;  %v1889_v11 = vsel %vm571_vm15, %v1880_v47, -inf }
 0xd21   : > { %1890 = vmax.xlane.f32.xlu1 %v1889_v11 }
 0xd25   : > { %v1608_v28 = vpop.xlane.xlu1 %1607 }
 0xd26   : > { %v1613_v52 = vsub.f32 %v1597_v38, %v1608_v28  ;;  %v1605_v21 = vpop.xlane.xlu2 %1604 }
 0xd27   : > { %v1883_v17 = vpop.f32.mrf.mxu1  ;;  %v1612_v59 = vsub.f32 %v1594_v40, %v1605_v21  ;;  %v1737_v3 = vpop.f32.mrf.mxu2 }
 0xd28   : > { %v1617_v50 = vmul.f32 1.442695, %v1613_v52  ;;  %v1892_v53 = vsel %vm571_vm15, %v1883_v17, -inf  ;;  %v1746_v4 = vsel %vm571_vm15, %v1737_v3, -inf }
 0xd29   : > { %1893 = vmax.xlane.f32.xlu2 %v1892_v53  ;;  %v1615_v61 = vmul.f32 1.442695, %v1612_v59 }
 0xd2a   : > { %4708 = vpow2.f32 %v1617_v50 }
 0xd2f   : > { %v5604_v16 = vpop.f32.mrf.mxu1  ;;  %v1740_v5 = vpop.f32.mrf.mxu2 }
 0xd30   : > { %v5606_v54 = vpop.eup %4708  ;;  %v1611_v18 = vpop.xlane.xlu0 %1610  ;;  %v1895_v55 = vsel %vm578_vm0, %v5604_v16, -inf  ;;  %v1749_v8 = vsel %vm571_vm15, %v1740_v5, -inf }
 0xd31   : > { %v1614_v56 = vsub.f32 %v1600_v42, %v1611_v18  ;;  %1896 = vmax.xlane.f32.xlu0 %v1895_v55  ;;  %v1624_v57 = vsel %vm571_vm15, %v5606_v54, 0.0 }
 0xd32   : > { %1625 = vadd.xlane.f32.xlu2 %v1624_v57 }
 0xd33   : > { %v1619_v60 = vmul.f32 1.442695, %v1614_v56 }
 0xd35   : > { %4710 = vpow2.f32 %v1619_v60 }
 0xd36   : > { %4712 = vpow2.f32 %v1615_v61 }
 0xd37   : > { %v5621_v6 = vpop.f32.mrf.mxu2 }
 0xd38   : > { %v1752_v7 = vsel %vm578_vm0, %v5621_v6, -inf }
 0xd3a   : > { %1640 = vrot.lane.b32.xlu1 %v5517_v32, %s6639_s30 }
 0xd3b   : > { %v4711_v62 = vpop.eup %4710 }
 0xd3c   : > { %v1627_v0 = vsel %vm578_vm0, %v4711_v62, 0.0  ;;  %v4713_v1 = vpop.eup %4712 }
 0xd3d   : > { %1628 = vadd.xlane.f32.xlu2 %v1627_v0  ;;  %v1621_v2 = vsel %vm571_vm15, %v4713_v1, 0.0 }
 0xd42   : > { %4569 = vrot.lane.b32.xlu1 %v5513_v35, %s6640_s11 }
 0xd45   : > { %4564 = vrot.lane.b32.xlu0 %v5513_v35, %s6639_s30  ;;  %1622 = vadd.xlane.f32.xlu2 %v1621_v2 }
 0xd4d   : > { %1747 = vmax.xlane.f32.xlu2 %v1746_v4 }
 0xd6c   : > { %1753 = vmax.xlane.f32.xlu1 %v1752_v7 }
 0xd6f   : > { %1750 = vmax.xlane.f32.xlu0 %v1749_v8 }
 0xd83   : > { %1783 = vrot.lane.b32.xlu0 %v5517_v32, %s6640_s11 }
 0xd85   : > { %1926 = vrot.lane.b32.xlu1 %v5517_v32, %s6641_s21 }
 0xd94   : > { %v1891_v9 = vpop.xlane.xlu1 %1890 }
 0xd95   : > { %v1898_v63 = vsub.f32 %v1880_v47, %v1891_v9 }
 0xd97   : > { %v1901_v10 = vmul.f32 1.442695, %v1898_v63 }
 0xd99   : > { %4714 = vpow2.f32 %v1901_v10 }
 0xd9c   : > { %v1894_v12 = vpop.xlane.xlu2 %1893 }
 0xd9d   : > { %v1899_v13 = vsub.f32 %v1883_v17, %v1894_v12 }
 0xd9f   : > { %v5630_v14 = vpop.eup %4714  ;;  %v1903_v19 = vmul.f32 1.442695, %v1899_v13 }
 0xda0   : > { %v1907_v15 = vsel %vm571_vm15, %v5630_v14, 0.0 }
 0xda1   : > { %1908 = vadd.xlane.f32.xlu2 %v1907_v15  ;;  %4716 = vpow2.f32 %v1903_v19 }
 0xda4   : > { %v1897_v48 = vpop.xlane.xlu0 %1896 }
 0xda5   : > { %v1626_v20 = vpop.xlane.xlu2 %1625  ;;  %v1900_v47 = vsub.f32 %v5604_v16, %v1897_v48 }
 0xda7   : > { %v5634_v22 = vpop.eup %4716  ;;  %v1905_v52 = vmul.f32 1.442695, %v1900_v47 }
 0xda8   : > { %v1910_v32 = vsel %vm571_vm15, %v5634_v22, 0.0 }
 0xdac   : > { %v1641_v23 = vpop.permute.xlu1 %1640 }
 0xdad   : > { %4262 = vmatpush.msk.msrb.mxu0 %vm623_vm14, %v1641_v23 }
 0xdaf   : > { %1911 = vadd.xlane.f32.xlu1 %v1910_v32 }
 0xdb0   : > { %v1629_v24 = vpop.xlane.xlu2 %1628 }
 0xdb4   : > { %v4570_v28 = vpop.permute.xlu1 %4569 }
 0xdb5   : > { %v4571_v18 = vunpack.i.l.bf16 %v4570_v28  ;;  %v4572_v56 = vunpack.i.h.bf16 %v4570_v28 }
 0xdb7   : > { %v4565_v25 = vpop.permute.xlu0 %4564 }
 0xdb8   : > { %v4566_v26 = vunpack.i.l.bf16 %v4565_v25  ;;  %v1623_v27 = vpop.xlane.xlu2 %1622  ;;  %v4567_v29 = vunpack.i.h.bf16 %v4565_v25 }
 0xdb9   : > { %4718 = vrcp.f32 %v1623_v27 }
 0xdba   : > { %1669 = vmatpush.msrb.mxu0 %v4566_v26  ;;  %4720 = vrcp.f32 %v1626_v20 }
 0xdbc   : > { %1670 = vmatpush.msrb.mxu0 %v4567_v29 }
 0xdbf   : > { %v4719_v30 = vpop.eup %4718 }
 0xdc0   : > { %v1633_v31 = vmul.f32 %v4719_v30, %v4713_v1  ;;  %v1748_v36 = vpop.xlane.xlu2 %1747  ;;  %v4721_v40 = vpop.eup %4720 }
 0xdc1   : > { %v1755_v38 = vsub.f32 %v1737_v3, %v1748_v36  ;;  %v1634_v33 = vmul.f32 %v4721_v40, %v5606_v54  ;;  %v4287_v40 = vld [vmem:[%s6566_s4 + $0x28] sm:$0xff] }
 0xdc2   : > { %4263 = vmatmul.msk.f32.vlgmr.msrb.gmra.mxu0 %vm571_vm15, %v1633_v31 }
 0xdc3   : > { %v1758_v39 = vmul.f32 1.442695, %v1755_v38  ;;  %v4289_v38 = vld [vmem:[%s6566_s4 + $0x38] sm:$0xff] }
 0xdc4   : > { %2012 = vmatpush.msrb.mxu2 %v4289_v38 }
 0xdc5   : > { %4722 = vpow2.f32 %v1758_v39  ;;  %v4288_v39 = vld [vmem:[%s6566_s4 + $0x30] sm:$0xff] }
 0xdc6   : > { %4724 = vrcp.f32 %v1629_v24  ;;  %2013 = vmatpush.msrb.mxu2 %v4288_v39 }
 0xdc8   : > { %2014 = vmatpush.msrb.mxu2 %v4287_v40 }
 0xdca   : > { %4264 = vmatmul.msk.f32.gmra.mxu0 %vm571_vm15, %v1634_v33  ;;  %v4286_v33 = vld [vmem:[%s6566_s4 + $0x20] sm:$0xff] }
 0xdcb   : > { %v4723_v43 = vpop.eup %4722  ;;  %2015 = vmatpush.msrb.mxu2 %v4286_v33  ;;  %v4315_v33 = vld [vmem:[%s6568_s6 + $0xf8] sm:$0xff] }
 0xdcc   : > { %v1764_v42 = vsel %vm571_vm15, %v4723_v43, 0.0  ;;  %v4725_v44 = vpop.eup %4724  ;;  %2178 = vmatpush.msrb.mxu1 %v4315_v33 }
 0xdcd   : > { %1765 = vadd.xlane.f32.xlu2 %v1764_v42  ;;  %v1635_v45 = vmul.f32 %v4725_v44, %v4711_v62 }
 0xdd2   : > { %4265 = vmatmul.msk.f32.gmra.mxu0 %vm571_vm15, %v1635_v45 }
 0xddf   : > { %v1754_v53 = vpop.xlane.xlu1 %1753 }
 0xde2   : > { %v1751_v49 = vpop.xlane.xlu0 %1750 }
 0xde3   : > { %v1756_v51 = vsub.f32 %v1740_v5, %v1751_v49 }
 0xde5   : > { %v1760_v11 = vmul.f32 1.442695, %v1756_v51  ;;  %4574 = vrot.lane.b32.xlu2 %v5513_v35, %s6641_s21  ;;  %v1757_v35 = vsub.f32 %v5621_v6, %v1754_v53 }
 0xde7   : > { %4726 = vpow2.f32 %v1760_v11  ;;  %v1762_v57 = vmul.f32 1.442695, %v1757_v35 }
 0xde8   : > { %4728 = vpow2.f32 %v1905_v52 }
 0xde9   : > { %4730 = vpow2.f32 %v1762_v57 }
 0xded   : > { %v4727_v17 = vpop.eup %4726 }
 0xdee   : > { %v1767_v50 = vsel %vm571_vm15, %v4727_v17, 0.0  ;;  %v4729_v54 = vpop.eup %4728 }
 0xdef   : > { %1768 = vadd.xlane.f32.xlu0 %v1767_v50  ;;  %v1913_v16 = vsel %vm578_vm0, %v4729_v54, 0.0  ;;  %v4731_v59 = vpop.eup %4730  ;;  %v2026_v50 = vperm.slane %v5492_v58, 3 }
 0xdf0   : > { %v1770_v60 = vsel %vm578_vm0, %v4731_v59, 0.0 }
 0xdf5   : > { %v1784_v21 = vpop.permute.xlu0 %1783 }
 0xdf6   : > { %4272 = vmatpush.msk.msra.mxu3 %vm623_vm14, %v1784_v21 }
 0xdf7   : > { %1914 = vadd.xlane.f32.xlu0 %v1913_v16  ;;  %v1927_v55 = vpop.permute.xlu1 %1926 }
 0xdf8   : > { %1812 = vmatpush.msra.mxu3 %v4571_v18  ;;  %4282 = vmatpush.msk.msra.mxu0 %vm623_vm14, %v1927_v55 }
 0xdfa   : > { %1813 = vmatpush.msra.mxu3 %v4572_v56 }
 0xe0e   : > { %1771 = vadd.xlane.f32.xlu2 %v1770_v60 }
 0xe14   : > { %v1909_v61 = vpop.xlane.xlu2 %1908 }
 0xe22   : > { %v1912_v3 = vpop.xlane.xlu1 %1911 }
 0xe3f   : > { %v1672_v62 = vpop.f32.mrf.mxu0 }
 0xe40   : > { %v1766_v0 = vpop.xlane.xlu2 %1765  ;;  %1684 = vrot.lane.b32.xlu0 %v1672_v62, %s6642_s26 }
 0xe41   : > { %4732 = vrcp.f32 %v1766_v0 }
 0xe42   : > { %4734 = vrcp.f32 %v1909_v61 }
 0xe43   : > { %4736 = vrcp.f32 %v1912_v3 }
 0xe47   : > { %v4733_v1 = vpop.eup %4732  ;;  %v1675_v2 = vpop.f32.mrf.mxu0 }
 0xe48   : > { %v1776_v4 = vmul.f32 %v4733_v1, %v4723_v43  ;;  %v4575_v5 = vpop.permute.xlu2 %4574  ;;  %1686 = vrot.lane.b32.xlu2 %v1675_v2, %s6642_s26  ;;  %v4735_v6 = vpop.eup %4734 }
 0xe49   : > { %v4576_v7 = vunpack.i.l.bf16 %v4575_v5  ;;  %v4577_v8 = vunpack.i.h.bf16 %v4575_v5  ;;  %v1919_v9 = vmul.f32 %v4735_v6, %v5630_v14  ;;  %v4737_v63 = vpop.eup %4736  ;;  %v4293_v5 = vld [vmem:[%s6567_s5 + $0x20] sm:$0xff] }
 0xe4a   : > { %4273 = vmatmul.msk.f32.vlgmr.msra.gmra.mxu3 %vm571_vm15, %v1776_v4  ;;  %v1920_v10 = vmul.f32 %v4737_v63, %v5634_v22  ;;  %v4295_v4 = vld [vmem:[%s6567_s5 + $0x30] sm:$0xff] }
 0xe4b   : > { %1955 = vmatpush.msra.mxu0 %v4576_v7 }
 0xe4d   : > { %1956 = vmatpush.msra.mxu0 %v4577_v8 }
 0xe4e   : > { %4283 = vmatmul.msk.f32.vlgmr.msra.gmra.mxu0 %vm571_vm15, %v1919_v9 }
 0xe4f   : > { %v1678_v25 = vpop.f32.mrf.mxu0 }
 0xe56   : > { %4284 = vmatmul.msk.f32.gmra.mxu0 %vm571_vm15, %v1920_v10 }
 0xe62   : > { %v1769_v12 = vpop.xlane.xlu0 %1768 }
 0xe63   : > { %4738 = vrcp.f32 %v1769_v12 }
 0xe69   : > { %v4739_v13 = vpop.eup %4738 }
 0xe6a   : > { %v1915_v15 = vpop.xlane.xlu0 %1914  ;;  %v1777_v19 = vmul.f32 %v4739_v13, %v4727_v17  ;;  %v1990_v17 = vperm.slane %v5492_v58, 2 }
 0xe6b   : > { %4740 = vrcp.f32 %v1915_v15 }
 0xe6c   : > { %4274 = vmatmul.msk.f32.gmra.mxu3 %vm571_vm15, %v1777_v19  ;;  %v2084_v19 = vperm.slane %v5492_v58, 4 }
 0xe71   : > { %v4741_v20 = vpop.eup %4740 }
 0xe72   : > { %v1921_v23 = vmul.f32 %v4741_v20, %v4729_v54 }
 0xe74   : > { %4285 = vmatmul.msk.f32.gmra.mxu0 %vm571_vm15, %v1921_v23 }
 0xe81   : > { %v1772_v14 = vpop.xlane.xlu2 %1771 }
 0xe82   : > { %4742 = vrcp.f32 %v1772_v14  ;;  %v2088_v14 = vperm.slane %v5492_v58, 5 }
 0xe88   : > { %v4743_v32 = vpop.eup %4742 }
 0xe89   : > { %v1778_v48 = vmul.f32 %v4743_v32, %v4731_v59 }
 0xe8b   : > { %4275 = vmatmul.msk.f32.gmra.mxu3 %vm571_vm15, %v1778_v48 }
 0xea2   : > { %v1687_v22 = vpop.permute.xlu2 %1686 }
 0xea3   : > { %1694 = vst.msk [vmem:[#allocation2 + $0x8] sm:$0xff] %vm796_vm4, %v1687_v22 }
 0xeb2   : > { %v1685_v24 = vpop.permute.xlu0 %1684 }
 0xeb3   : > { %1693 = vst.msk [vmem:[#allocation2] sm:$0xff] %vm796_vm4, %v1685_v24 }
 0xecb   : > { %v1958_v26 = vpop.f32.mrf.mxu0 }
 0xecc   : > { %1970 = vrot.lane.b32.xlu0 %v1958_v26, %s6643_s20 }
 0xecd   : > { %v1815_v27 = vpop.f32.mrf.mxu3 }
 0xece   : > { %1827 = vrot.lane.b32.xlu1 %v1815_v27, %s6644_s18 }
 0xed3   : > { %v1961_v29 = vpop.f32.mrf.mxu0 }
 0xed4   : > { %1972 = vrot.lane.b32.xlu0 %v1961_v29, %s6643_s20 }
 0xeef   : > { %v1818_v30 = vpop.f32.mrf.mxu3 }
 0xef0   : > { %1829 = vrot.lane.b32.xlu1 %v1818_v30, %s6644_s18 }
 0xef1   : > { %v1964_v31 = vpop.f32.mrf.mxu0 }
 0xef8   : > { %1688 = vrot.lane.b32.xlu1 %v1678_v25, %s6642_s26 }
 0xf00   : > { %1974 = vrot.lane.b32.xlu1 %v1964_v31, %s6643_s20 }
 0xf0e   : > { %v1821_v36 = vpop.f32.mrf.mxu3 }
 0xf0f   : > { %1831 = vrot.lane.b32.xlu0 %v1821_v36, %s6644_s18 }
 0xf3e   : > { %v1971_v42 = vpop.permute.xlu0 %1970 }
 0xf40   : > { %v1828_v43 = vpop.permute.xlu1 %1827 }
 0xf41   : > { %1836 = vst.msk [vmem:[#allocation2] sm:$0xff] %vm941_vm5, %v1828_v43  ;;  %v4314_v43 = vld [vmem:[%s6568_s6 + $0xf0] sm:$0xff] }
 0xf42   : > { %1979 = vst.msk [vmem:[#allocation2] sm:$0xff] %vm1086_vm7, %v1971_v42  ;;  %v4313_v42 = vld [vmem:[%s6568_s6 + $0xe8] sm:$0xff]  ;;  %2179 = vmatpush.msrb.mxu1 %v4314_v43 }
 0xf44   : > { %2180 = vmatpush.msrb.mxu1 %v4313_v42 }
 0xf46   : > { %v1973_v49 = vpop.permute.xlu0 %1972 }
 0xf49   : > { %v1982_v44 = vld [vmem:[#allocation2] sm:$0xff] }
 0xf4a   : > { %4290 = vmatmul.msk.f32.vlgmr.msrb.gmra.mxu2 %vm413_vm1, %v1982_v44 }
 0xf62   : > { %v1830_v45 = vpop.permute.xlu1 %1829 }
 0xf63   : > { %1837 = vst.msk [vmem:[#allocation2 + $0x8] sm:$0xff] %vm941_vm5, %v1830_v45 }
 0xf64   : > { %1980 = vst.msk [vmem:[#allocation2 + $0x8] sm:$0xff] %vm1086_vm7, %v1973_v49 }
 0xf6a   : > { %v1689_v51 = vpop.permute.xlu1 %1688 }
 0xf6b   : > { %1695 = vst.msk [vmem:[#allocation2 + $0x10] sm:$0x1] %vm6645_vm6, %v1689_v51  ;;  %v1983_v47 = vld [vmem:[#allocation2 + $0x8] sm:$0xff] }
 0xf6c   : > { %4291 = vmatmul.msk.f32.gmra.mxu2 %vm413_vm1, %v1983_v47 }
 0xf72   : > { %v1975_v28 = vpop.permute.xlu1 %1974 }
 0xf81   : > { %v1832_v11 = vpop.permute.xlu0 %1831 }
 0xf82   : > { %1838 = vst.msk [vmem:[#allocation2 + $0x10] sm:$0x1] %vm6646_vm8, %v1832_v11 }
 0xf83   : > { %1981 = vst.msk [vmem:[#allocation2 + $0x10] sm:$0x1] %vm6647_vm9, %v1975_v28 }
 0xf8a   : > { %v1984_v52 = vld [vmem:[#allocation2 + $0x10] sm:$0x1] }
 0xf8b   : > { %4292 = vmatmul.msk.f32.gmra.mxu2 %vm413_vm1, %v1984_v52 }
 0xfcd   : > { %v2017_v53 = vpop.f32.mrf.mxu2 }
 0xfce   : > { %v2018_v54 = vadd.f32 %v2017_v53, %v1990_v17 }
 0xfd0   : > { %v2027_v21 = vmul.f32 %v2026_v50, %v2018_v54 }
 0xfd2   : > { %v5697_v18 = vadd.f32 %v2027_v21, %v5458_v37 }
 0xfd4   : > { %v2033_v16 = vmul.f32 %v5697_v18, %v5697_v18 }
 0xfd6   : > { %v2036_v55 = vsel %vm413_vm1, %v2033_v16, 0.0  ;;  %v4312_v16 = vld [vmem:[%s6568_s6 + $0xe0] sm:$0xff] }
 0xfd7   : > { %2037 = vadd.xlane.f32.xlu0 %v2036_v55  ;;  %2181 = vmatpush.msrb.mxu1 %v4312_v16  ;;  %v4311_v55 = vld [vmem:[%s6568_s6 + $0xd8] sm:$0xff] }
 0xfd9   : > { %2182 = vmatpush.msrb.mxu1 %v4311_v55 }
 0xfef   : > { %v2020_v56 = vpop.f32.mrf.mxu2 }
 0xff0   : > { %v2021_v35 = vadd.f32 %v2020_v56, %v1990_v17  ;;  %v4310_v56 = vld [vmem:[%s6568_s6 + $0xd0] sm:$0xff] }
 0xff1   : > { %2183 = vmatpush.msrb.mxu1 %v4310_v56 }
 0xff2   : > { %v2028_v57 = vmul.f32 %v2026_v50, %v2021_v35  ;;  %v4309_v35 = vld [vmem:[%s6568_s6 + $0xc8] sm:$0xff] }
 0xff3   : > { %2184 = vmatpush.msrb.mxu1 %v4309_v35 }
 0xff4   : > { %v5703_v59 = vadd.f32 %v2028_v57, %v5464_v41  ;;  %v4296_v41 = vld [vmem:[%s6567_s5 + $0x38] sm:$0xff]  ;;  %v4308_v57 = vld [vmem:[%s6568_s6 + $0xc0] sm:$0xff] }
 0xff5   : > { %2119 = vmatpush.msrb.mxu3 %v4296_v41  ;;  %2185 = vmatpush.msrb.mxu1 %v4308_v57  ;;  %v4300_v41 = vld [vmem:[%s6568_s6 + $0x80] sm:$0xff] }
 0xff6   : > { %v2034_v60 = vmul.f32 %v5703_v59, %v5703_v59 }
 0xff7   : > { %2120 = vmatpush.msrb.mxu3 %v4295_v4  ;;  %v4891_v4 = vld [vmem:[%s6569_s7 + $0x10] sm:$0xff] }
 0xff8   : > { %v2039_v61 = vsel %vm413_vm1, %v2034_v60, 0.0  ;;  %v4307_v60 = vld [vmem:[%s6568_s6 + $0xb8] sm:$0xff] }
 0xff9   : > { %2040 = vadd.xlane.f32.xlu2 %v2039_v61  ;;  %2186 = vmatpush.msrb.mxu1 %v4307_v60  ;;  %v4306_v61 = vld [vmem:[%s6568_s6 + $0xb0] sm:$0xff] }
 0xffb   : > { %2187 = vmatpush.msrb.mxu1 %v4306_v61 }
0x100e   : > { %v2023_v37 = vpop.f32.mrf.mxu2 }
0x100f   : > { %v2024_v62 = vadd.f32 %v2023_v37, %v1990_v17  ;;  %v4305_v37 = vld [vmem:[%s6568_s6 + $0xa8] sm:$0xff] }
0x1010   : > { %2188 = vmatpush.msrb.mxu1 %v4305_v37 }
0x1011   : > { %v2029_v0 = vmul.f32 %v2026_v50, %v2024_v62  ;;  %v4304_v62 = vld [vmem:[%s6568_s6 + $0xa0] sm:$0xff] }
0x1012   : > { %2189 = vmatpush.msrb.mxu1 %v4304_v62 }
0x1013   : > { %v5709_v1 = vadd.f32 %v2029_v0, %v5470_v46  ;;  %v4294_v46 = vld [vmem:[%s6567_s5 + $0x28] sm:$0xff]  ;;  %v4303_v0 = vld [vmem:[%s6568_s6 + $0x98] sm:$0xff] }
0x1014   : > { %2121 = vmatpush.msrb.mxu3 %v4294_v46  ;;  %2190 = vmatpush.msrb.mxu1 %v4303_v0  ;;  %v2097_v46 = vperm.slane %v4891_v4, 6 }
0x1015   : > { %v2035_v2 = vmul.f32 %v5709_v1, %v5709_v1 }
0x1016   : > { %2122 = vmatpush.msrb.mxu3 %v4293_v5 }
0x1017   : > { %v2042_v3 = vsel %vm420_vm2, %v2035_v2, 0.0  ;;  %v4302_v2 = vld [vmem:[%s6568_s6 + $0x90] sm:$0xff] }
0x1018   : > { %2043 = vadd.xlane.f32.xlu1 %v2042_v3  ;;  %v4301_v3 = vld [vmem:[%s6568_s6 + $0x88] sm:$0xff]  ;;  %2191 = vmatpush.msrb.mxu1 %v4302_v2 }
0x101a   : > { %2192 = vmatpush.msrb.mxu1 %v4301_v3 }
0x101c   : > { %2193 = vmatpush.msrb.mxu1 %v4300_v41 }
0x104a   : > { %v2038_v6 = vpop.xlane.xlu0 %2037 }
0x104b   : > { %v2045_v7 = vmul.f32 %v2038_v6, %v5134_v34 }
0x104d   : > { %v2048_v8 = vadd.f32 1e-06, %v2045_v7 }
0x104f   : > { %4744 = vrsqrt.f32 %v2048_v8  ;;  %vm2057_vm11 = vweird.f32 %v2048_v8 }
0x1055   : > { %v4745_v9 = vpop.eup %4744 }
0x1056   : > { %v2052_v63 = vmul.f32 %v4745_v9, %v2048_v8  ;;  %vm2058_vm10 = vweird.f32 %v4745_v9 }
0x1057   : > { %vm2059_vm12 = vmor %vm2057_vm11, %vm2058_vm10 }
0x1058   : > { %v2053_v10 = vmul.f32 %v4745_v9, %v2052_v63 }
0x105a   : > { %v2054_v12 = vmul.f32 0.5, %v2053_v10 }
0x105c   : > { %v2055_v13 = vsub.f32 1.5, %v2054_v12 }
0x105e   : > { %v2056_v15 = vmul.f32 %v4745_v9, %v2055_v13 }
0x1060   : > { %v2060_v20 = vsel %vm2059_vm12, %v4745_v9, %v2056_v15 }
0x1061   : > { %v2081_v23 = vmul.f32 %v2060_v20, %v5697_v18 }
0x1063   : > { %v2085_v32 = vmul.f32 %v2084_v19, %v2081_v23 }
0x1065   : > { %v2089_v48 = vadd.f32 %v2088_v14, %v2085_v32 }
0x1067   : > { %4297 = vmatmul.msk.f32.vlgmr.msrb.gmra.mxu3 %vm413_vm1, %v2089_v48 }
0x106c   : > { %v2041_v22 = vpop.xlane.xlu2 %2040 }
0x106d   : > { %v2046_v24 = vmul.f32 %v2041_v22, %v5134_v34 }
0x106f   : > { %v2049_v25 = vadd.f32 1e-06, %v2046_v24 }
0x1071   : > { %4746 = vrsqrt.f32 %v2049_v25  ;;  %vm2067_vm8 = vweird.f32 %v2049_v25 }
0x1077   : > { %v4747_v26 = vpop.eup %4746 }
0x1078   : > { %v2062_v27 = vmul.f32 %v4747_v26, %v2049_v25  ;;  %vm2068_vm6 = vweird.f32 %v4747_v26 }
0x1079   : > { %vm2069_vm9 = vmor %vm2067_vm8, %vm2068_vm6 }
0x107a   : > { %v2063_v29 = vmul.f32 %v4747_v26, %v2062_v27 }
0x107c   : > { %v2064_v30 = vmul.f32 0.5, %v2063_v29 }
0x107e   : > { %v2065_v31 = vsub.f32 1.5, %v2064_v30 }
0x1080   : > { %v2066_v36 = vmul.f32 %v4747_v26, %v2065_v31 }
0x1082   : > { %v2070_v38 = vsel %vm2069_vm9, %v4747_v26, %v2066_v36 }
0x1083   : > { %v2082_v58 = vmul.f32 %v2070_v38, %v5703_v59 }
0x1085   : > { %v2086_v39 = vmul.f32 %v2084_v19, %v2082_v58 }
0x1087   : > { %v2090_v40 = vadd.f32 %v2088_v14, %v2086_v39 }
0x1089   : > { %4298 = vmatmul.msk.f32.gmra.mxu3 %vm413_vm1, %v2090_v40 }
0x108b   : > { %v2044_v44 = vpop.xlane.xlu1 %2043 }
0x108c   : > { %v2047_v45 = vmul.f32 %v2044_v44, %v5134_v34 }
0x108e   : > { %v2050_v49 = vadd.f32 1e-06, %v2047_v45  ;;  %v2177_v45 = vperm.slane %v4891_v4, 7 }
0x1090   : > { %4748 = vrsqrt.f32 %v2050_v49  ;;  %vm2077_vm11 = vweird.f32 %v2050_v49 }
0x1096   : > { %v4749_v51 = vpop.eup %4748 }
0x1097   : > { %v2072_v47 = vmul.f32 %v4749_v51, %v2050_v49  ;;  %vm2078_vm10 = vweird.f32 %v4749_v51  ;;  %v4619_v49 = vld [vmem:[%s6569_s7 + $0x18] ss:$0 sm:$0xff] }
0x1098   : > { %vm2079_vm12 = vmor %vm2077_vm11, %vm2078_vm10 }
0x1099   : > { %v2073_v11 = vmul.f32 %v4749_v51, %v2072_v47 }
0x109b   : > { %v2074_v28 = vmul.f32 0.5, %v2073_v11 }
0x109d   : > { %v2075_v52 = vsub.f32 1.5, %v2074_v28 }
0x109f   : > { %v2076_v17 = vmul.f32 %v4749_v51, %v2075_v52 }
0x10a1   : > { %v2080_v50 = vsel %vm2079_vm12, %v4749_v51, %v2076_v17 }
0x10a2   : > { %v2083_v53 = vmul.f32 %v2080_v50, %v5709_v1 }
0x10a4   : > { %v2087_v54 = vmul.f32 %v2084_v19, %v2083_v53 }
0x10a6   : > { %v2091_v21 = vadd.f32 %v2088_v14, %v2087_v54 }
0x10a8   : > { %4299 = vmatmul.msk.f32.gmra.mxu3 %vm413_vm1, %v2091_v21 }
0x10ea   : > { %v2124_v5 = vpop.f32.mrf.mxu3 }
0x10eb   : > { %v2125_v6 = vadd.f32 %v2124_v5, %v2097_v46 }
0x10ed   : > { %v2133_v7 = vmul.f32 %v2125_v6, %v2125_v6 }
0x10ef   : > { %v2136_v8 = vmul.f32 %v2133_v7, %v2125_v6  ;;  %v4321_v7 = vld [vmem:[%s6565_s3 + $0x58] sm:$0xff] }
0x10f0   : > { %2314 = vmatpush.msrb.mxu0 %v4321_v7 }
0x10f1   : > { %v2139_v9 = vmul.f32 0.044715, %v2136_v8  ;;  %v4320_v8 = vld [vmem:[%s6565_s3 + $0x50] sm:$0xff] }
0x10f2   : > { %2315 = vmatpush.msrb.mxu0 %v4320_v8 }
0x10f3   : > { %v2142_v63 = vadd.f32 %v2139_v9, %v2125_v6  ;;  %v4319_v9 = vld [vmem:[%s6565_s3 + $0x48] sm:$0xff] }
0x10f4   : > { %2316 = vmatpush.msrb.mxu0 %v4319_v9 }
0x10f5   : > { %v2145_v10 = vmul.f32 0.7978846, %v2142_v63  ;;  %v4318_v63 = vld [vmem:[%s6565_s3 + $0x40] sm:$0xff] }
0x10f6   : > { %2317 = vmatpush.msrb.mxu0 %v4318_v63 }
0x10f7   : > { %4750 = vtanh.f32 %v2145_v10 }
0x10fd   : > { %v4751_v12 = vpop.eup %4750 }
0x10fe   : > { %v2151_v13 = vadd.f32 1.0, %v4751_v12 }
0x1100   : > { %v2154_v15 = vmul.f32 0.5, %v2151_v13 }
0x1102   : > { %v2157_v19 = vmul.f32 %v2154_v15, %v2125_v6 }
0x1104   : > { %2194 = vmatmul.f32.vlgmr.msrb.gmra.mxu1 %v2157_v19 }
0x110c   : > { %v2127_v20 = vpop.f32.mrf.mxu3 }
0x110d   : > { %v2128_v23 = vadd.f32 %v2127_v20, %v2097_v46 }
0x110f   : > { %v2134_v14 = vmul.f32 %v2128_v23, %v2128_v23 }
0x1111   : > { %v2137_v32 = vmul.f32 %v2134_v14, %v2128_v23  ;;  %v5835_v14 = vld [vmem:[%s6569_s7 + $0x20] sm:$0xff] }
0x1113   : > { %v2140_v48 = vmul.f32 0.044715, %v2137_v32 }
0x1115   : > { %v2143_v22 = vadd.f32 %v2140_v48, %v2128_v23 }
0x1117   : > { %v2146_v24 = vmul.f32 0.7978846, %v2143_v22  ;;  %v2280_v22 = vperm.slane %v5835_v14, 0 }
0x1119   : > { %4752 = vtanh.f32 %v2146_v24 }
0x111f   : > { %v4753_v25 = vpop.eup %4752 }
0x1120   : > { %v2152_v26 = vadd.f32 1.0, %v4753_v25 }
0x1122   : > { %v2155_v27 = vmul.f32 0.5, %v2152_v26  ;;  %v2284_v26 = vperm.slane %v5835_v14, 1 }
0x1124   : > { %v2158_v29 = vmul.f32 %v2155_v27, %v2128_v23 }
0x1126   : > { %2197 = vmatmul.f32.gmra.mxu1 %v2158_v29 }
0x112b   : > { %v2130_v30 = vpop.f32.mrf.mxu3 }
0x112c   : > { %v2131_v31 = vadd.f32 %v2130_v30, %v2097_v46 }
0x112e   : > { %v2135_v36 = vmul.f32 %v2131_v31, %v2131_v31 }
0x1130   : > { %v2138_v38 = vmul.f32 %v2135_v36, %v2131_v31 }
0x1132   : > { %v2141_v58 = vmul.f32 0.044715, %v2138_v38 }
0x1134   : > { %v2144_v39 = vadd.f32 %v2141_v58, %v2131_v31 }
0x1136   : > { %v2147_v40 = vmul.f32 0.7978846, %v2144_v39 }
0x1138   : > { %4754 = vtanh.f32 %v2147_v40 }
0x113e   : > { %v4755_v33 = vpop.eup %4754 }
0x113f   : > { %v2153_v43 = vadd.f32 1.0, %v4755_v33 }
0x1141   : > { %v2156_v42 = vmul.f32 0.5, %v2153_v43 }
0x1143   : > { %v2159_v44 = vmul.f32 %v2156_v42, %v2131_v31 }
0x1145   : > { %2200 = vmatmul.f32.gmra.mxu1 %v2159_v44 }
0x1181   : > { %v2195_v51 = vpop.f32.mrf.mxu1 }
0x1182   : > { %v2196_v47 = vadd.f32 %v2195_v51, %v2177_v45 }
0x1184   : > { %v2205_v11 = vmul.f32 %v4619_v49, %v2196_v47 }
0x1186   : > { %v5792_v28 = vadd.f32 %v2205_v11, %v5697_v18 }
0x1188   : > { %v2214_v52 = vsel %vm413_vm1, %v5792_v28, 0.0 }
0x1189   : > { %2215 = vadd.xlane.f32.xlu2 %v2214_v52 }
0x11a3   : > { %v2198_v17 = vpop.f32.mrf.mxu1 }
0x11a4   : > { %v2199_v50 = vadd.f32 %v2198_v17, %v2177_v45 }
0x11a6   : > { %v2206_v53 = vmul.f32 %v4619_v49, %v2199_v50 }
0x11a8   : > { %v5797_v54 = vadd.f32 %v2206_v53, %v5703_v59 }
0x11aa   : > { %v2217_v21 = vsel %vm413_vm1, %v5797_v54, 0.0 }
0x11ab   : > { %2218 = vadd.xlane.f32.xlu0 %v2217_v21 }
0x11c2   : > { %v2201_v16 = vpop.f32.mrf.mxu1 }
0x11c3   : > { %v2202_v55 = vadd.f32 %v2201_v16, %v2177_v45 }
0x11c5   : > { %v2207_v56 = vmul.f32 %v4619_v49, %v2202_v55 }
0x11c7   : > { %v5802_v18 = vadd.f32 %v2207_v56, %v5709_v1 }
0x11c9   : > { %v2220_v35 = vsel %vm420_vm2, %v5802_v18, 0.0 }
0x11ca   : > { %2221 = vadd.xlane.f32.xlu1 %v2220_v35 }
0x11fc   : > { %v2216_v57 = vpop.xlane.xlu2 %2215 }
0x11fd   : > { %v2223_v60 = vmul.f32 %v2216_v57, %v5134_v34 }
0x11ff   : > { %v2226_v59 = vsub.f32 %v5792_v28, %v2223_v60 }
0x1201   : > { %v2229_v61 = vmul.f32 %v2226_v59, %v2226_v59 }
0x1203   : > { %v2232_v37 = vsel %vm413_vm1, %v2229_v61, 0.0 }
0x1204   : > { %2233 = vadd.xlane.f32.xlu2 %v2232_v37 }
0x121e   : > { %v2219_v62 = vpop.xlane.xlu0 %2218 }
0x121f   : > { %v2224_v0 = vmul.f32 %v2219_v62, %v5134_v34 }
0x1221   : > { %v2227_v2 = vsub.f32 %v5797_v54, %v2224_v0 }
0x1223   : > { %v2230_v1 = vmul.f32 %v2227_v2, %v2227_v2 }
0x1225   : > { %v2235_v3 = vsel %vm413_vm1, %v2230_v1, 0.0 }
0x1226   : > { %2236 = vadd.xlane.f32.xlu0 %v2235_v3 }
0x123d   : > { %v2222_v41 = vpop.xlane.xlu1 %2221 }
0x123e   : > { %v2225_v4 = vmul.f32 %v2222_v41, %v5134_v34 }
0x1240   : > { %v5814_v46 = vsub.f32 %v5802_v18, %v2225_v4 }
0x1242   : > { %v2231_v5 = vmul.f32 %v5814_v46, %v5814_v46 }
0x1244   : > { %v2238_v6 = vsel %vm420_vm2, %v2231_v5, 0.0 }
0x1245   : > { %2239 = vadd.xlane.f32.xlu1 %v2238_v6 }
0x1277   : > { %v2234_v10 = vpop.xlane.xlu2 %2233 }
0x1278   : > { %v2241_v12 = vmul.f32 %v2234_v10, %v5134_v34 }
0x127a   : > { %v2244_v13 = vadd.f32 1e-06, %v2241_v12 }
0x127c   : > { %4756 = vrsqrt.f32 %v2244_v13  ;;  %vm2253_vm8 = vweird.f32 %v2244_v13 }
0x1282   : > { %v4757_v15 = vpop.eup %4756 }
0x1283   : > { %v2248_v19 = vmul.f32 %v4757_v15, %v2244_v13  ;;  %vm2254_vm6 = vweird.f32 %v4757_v15 }
0x1284   : > { %vm2255_vm9 = vmor %vm2253_vm8, %vm2254_vm6 }
0x1285   : > { %v2249_v20 = vmul.f32 %v4757_v15, %v2248_v19 }
0x1287   : > { %v2250_v23 = vmul.f32 0.5, %v2249_v20 }
0x1289   : > { %v2251_v32 = vsub.f32 1.5, %v2250_v23 }
0x128b   : > { %v2252_v48 = vmul.f32 %v4757_v15, %v2251_v32 }
0x128d   : > { %v2256_v24 = vsel %vm2255_vm9, %v4757_v15, %v2252_v48 }
0x128e   : > { %v2277_v25 = vmul.f32 %v2256_v24, %v2226_v59 }
0x1290   : > { %v2281_v27 = vmul.f32 %v2280_v22, %v2277_v25 }
0x1292   : > { %v2285_v29 = vadd.f32 %v2284_v26, %v2281_v27 }
0x1294   : > { %4322 = vmatmul.msk.f32.vlgmr.msrb.gmra.mxu0 %vm413_vm1, %v2285_v29 }
0x1299   : > { %v2237_v30 = vpop.xlane.xlu0 %2236 }
0x129a   : > { %v2242_v31 = vmul.f32 %v2237_v30, %v5134_v34 }
0x129c   : > { %v2245_v36 = vadd.f32 1e-06, %v2242_v31 }
0x129e   : > { %4758 = vrsqrt.f32 %v2245_v36  ;;  %vm2263_vm11 = vweird.f32 %v2245_v36 }
0x12a4   : > { %v4759_v38 = vpop.eup %4758 }
0x12a5   : > { %v2258_v58 = vmul.f32 %v4759_v38, %v2245_v36  ;;  %vm2264_vm10 = vweird.f32 %v4759_v38 }
0x12a6   : > { %vm2265_vm12 = vmor %vm2263_vm11, %vm2264_vm10  ;;  %vm6650_vm10 = vcmask 122944   ;;  %vm6651_vm11 = vcmask 188544  }
0x12a7   : > { %v2259_v39 = vmul.f32 %v4759_v38, %v2258_v58 }
0x12a9   : > { %v2260_v40 = vmul.f32 0.5, %v2259_v39 }
0x12ab   : > { %v2261_v33 = vsub.f32 1.5, %v2260_v40 }
0x12ad   : > { %v2262_v43 = vmul.f32 %v4759_v38, %v2261_v33 }
0x12af   : > { %v2266_v42 = vsel %vm2265_vm12, %v4759_v38, %v2262_v43  ;;  %vm6652_vm12 = vcmask 254144  }
0x12b0   : > { %v2278_v44 = vmul.f32 %v2266_v42, %v2227_v2 }
0x12b2   : > { %v2282_v45 = vmul.f32 %v2280_v22, %v2278_v44 }
0x12b4   : > { %v2286_v49 = vadd.f32 %v2284_v26, %v2282_v45 }
0x12b6   : > { %4323 = vmatmul.msk.f32.gmra.mxu0 %vm413_vm1, %v2286_v49 }
0x12b8   : > { %v2240_v51 = vpop.xlane.xlu1 %2239 }
0x12b9   : > { %v2243_v47 = vmul.f32 %v2240_v51, %v5134_v34 }
0x12bb   : > { %v2246_v11 = vadd.f32 1e-06, %v2243_v47 }
0x12bd   : > { %4760 = vrsqrt.f32 %v2246_v11  ;;  %vm2273_vm8 = vweird.f32 %v2246_v11 }
0x12c3   : > { %v4761_v52 = vpop.eup %4760 }
0x12c4   : > { %v2268_v17 = vmul.f32 %v4761_v52, %v2246_v11  ;;  %vm2274_vm6 = vweird.f32 %v4761_v52 }
0x12c5   : > { %vm2275_vm9 = vmor %vm2273_vm8, %vm2274_vm6 }
0x12c6   : > { %v2269_v50 = vmul.f32 %v4761_v52, %v2268_v17 }
0x12c8   : > { %v2270_v53 = vmul.f32 0.5, %v2269_v50 }
0x12ca   : > { %v2271_v21 = vsub.f32 1.5, %v2270_v53 }
0x12cc   : > { %v2272_v16 = vmul.f32 %v4761_v52, %v2271_v21 }
0x12ce   : > { %v2276_v55 = vsel %vm2275_vm9, %v4761_v52, %v2272_v16 }
0x12cf   : > { %v2279_v56 = vmul.f32 %v2276_v55, %v5814_v46 }
0x12d1   : > { %v2283_v35 = vmul.f32 %v2280_v22, %v2279_v56 }
0x12d3   : > { %v2287_v57 = vadd.f32 %v2284_v26, %v2283_v35 }
0x12d5   : > { %4324 = vmatmul.msk.f32.gmra.mxu0 %vm413_vm1, %v2287_v57 }
0x1311   : > { %v2319_v60 = vpop.f32.mrf.mxu0 }
0x1312   : > { %2334 = vrot.lane.b32.xlu1 %v2319_v60, %s6648_s19  ;;  %v2328_v59 = vmul.f32 0.35355338, %v2319_v60 }
0x131a   : > { %2462 = vrot.lane.b32.xlu1 %v2328_v59, %s6635_s25 }
0x1333   : > { %v2322_v61 = vpop.f32.mrf.mxu0 }
0x1334   : > { %2336 = vrot.lane.b32.xlu0 %v2322_v61, %s6648_s19  ;;  %v2329_v37 = vmul.f32 0.35355338, %v2322_v61  ;;  %v5856_v0 = vpack.i.bf16 %v2319_v60, %v2322_v61 }
0x1336   : > { %2464 = vrot.lane.b32.xlu1 %v2329_v37, %s6635_s25 }
0x133c   : > { %2470 = vrot.lane.b32.xlu0 %v2322_v61, %s6633_s22 }
0x1352   : > { %v5850_v62 = vpop.f32.mrf.mxu0 }
0x1353   : > { %2418 = vrot.lane.b32.xlu1 %v5850_v62, %s6649_s24  ;;  %2338 = vrot.lane.b32.xlu2 %v5850_v62, %s6648_s19  ;;  %v5873_v9 = vmul.f32 0.35355338, %v5850_v62 }
0x135b   : > { %2615 = vrot.lane.b32.xlu1 %v5850_v62, %s6634_s12  ;;  %4579 = vrot.lane.b32.xlu2 %v5856_v0, %s6649_s24 }
0x1363   : > { %2468 = vrot.lane.b32.xlu2 %v2319_v60, %s6633_s22 }
0x136b   : > { %2472 = vrot.lane.b32.xlu2 %v5850_v62, %s6633_s22 }
0x1384   : > { %v2335_v2 = vpop.permute.xlu1 %2334 }
0x138c   : > { %v2463_v41 = vpop.permute.xlu1 %2462 }
0x13a6   : > { %v2337_v3 = vpop.permute.xlu0 %2336 }
0x13a8   : > { %v2465_v46 = vpop.permute.xlu1 %2464 }
0x13ad   : > { %v2339_v1 = vpop.permute.xlu2 %2338 }
0x13ae   : > { %4325 = vmatpush.xpose.msk.msra.mxu2 %vm529_vm13, %v2339_v1  ;;  %v2471_v10 = vpop.permute.xlu0 %2470 }
0x13b2   : > { %4326 = vmatpush.xpose.msk.msra.mxu2 %vm529_vm13, %v2337_v3 }
0x13b5   : > { %v4580_v4 = vpop.permute.xlu2 %4579 }
0x13b6   : > { %4327 = vmatpush.xpose.msk.msra.mxu2 %vm529_vm13, %v2335_v2  ;;  %v4581_v8 = vunpack.i.l.bf16 %v4580_v4  ;;  %v4582_v63 = vunpack.i.h.bf16 %v4580_v4 }
0x13b9   : > { %4328 = vmatmul.msk.f32.vlgmr.msra.gmra.mxu2 %vm529_vm13, %v2328_v59 }
0x13bd   : > { %v2469_v5 = vpop.permute.xlu2 %2468 }
0x13c1   : > { %4329 = vmatmul.msk.f32.gmra.mxu2 %vm529_vm13, %v2329_v37 }
0x13c5   : > { %v2419_v6 = vpop.permute.xlu1 %2418  ;;  %v2473_v7 = vpop.permute.xlu2 %2472 }
0x13c6   : > { %4331 = vmatpush.msk.msra.mxu3 %vm623_vm14, %v2419_v6  ;;  %4335 = vmatpush.xpose.msk.msra.mxu0 %vm529_vm13, %v2473_v7 }
0x13c8   : > { %2447 = vmatpush.msra.mxu3 %v4581_v8 }
0x13c9   : > { %4330 = vmatmul.msk.f32.gmra.mxu2 %vm529_vm13, %v5873_v9 }
0x13ca   : > { %2448 = vmatpush.msra.mxu3 %v4582_v63  ;;  %4336 = vmatpush.xpose.msk.msra.mxu0 %vm529_vm13, %v2471_v10 }
0x13cd   : > { %v2616_v12 = vpop.permute.xlu1 %2615 }
0x13ce   : > { %4337 = vmatpush.xpose.msk.msra.mxu0 %vm529_vm13, %v2469_v5  ;;  %4345 = vmatpush.xpose.msk.msrb.mxu3 %vm529_vm13, %v2616_v12 }
0x13d1   : > { %4338 = vmatmul.msk.f32.vlgmr.msra.gmra.mxu0 %vm529_vm13, %v2463_v41 }
0x13d9   : > { %4339 = vmatmul.msk.f32.gmra.mxu0 %vm529_vm13, %v2465_v46 }
0x143c   : > { %v2372_v13 = vpop.f32.mrf.mxu2 }
0x143d   : > { %v2381_v15 = vsel %vm571_vm15, %v2372_v13, -inf }
0x143e   : > { %2382 = vmax.xlane.f32.xlu0 %v2381_v15 }
0x1444   : > { %v2375_v19 = vpop.f32.mrf.mxu2 }
0x1445   : > { %v2384_v20 = vsel %vm571_vm15, %v2375_v19, -inf }
0x1446   : > { %2385 = vmax.xlane.f32.xlu2 %v2384_v20 }
0x144c   : > { %v2378_v23 = vpop.f32.mrf.mxu2 }
0x144d   : > { %v2387_v32 = vsel %vm578_vm0, %v2378_v23, -inf }
0x144e   : > { %2388 = vmax.xlane.f32.xlu1 %v2387_v32  ;;  %v5897_v25 = vpop.f32.mrf.mxu0 }
0x144f   : > { %v2512_v26 = vsel %vm571_vm15, %v5897_v25, -inf }
0x1452   : > { %2613 = vrot.lane.b32.xlu0 %v2322_v61, %s6634_s12 }
0x1456   : > { %v2506_v17 = vpop.f32.mrf.mxu0 }
0x1457   : > { %v2515_v53 = vsel %vm571_vm15, %v2506_v17, -inf }
0x145a   : > { %2605 = vrot.lane.b32.xlu0 %v2328_v59, %s6636_s27 }
0x145e   : > { %2611 = vrot.lane.b32.xlu2 %v2319_v60, %s6634_s12 }
0x1462   : > { %2607 = vrot.lane.b32.xlu0 %v2329_v37, %s6636_s27 }
0x1467   : > { %2758 = vrot.lane.b32.xlu1 %v5850_v62, %s6637_s28 }
0x146f   : > { %2466 = vrot.lane.b32.xlu1 %v5873_v9, %s6635_s25 }
0x1477   : > { %2756 = vrot.lane.b32.xlu1 %v2322_v61, %s6637_s28 }
0x147f   : > { %2754 = vrot.lane.b32.xlu1 %v2319_v60, %s6637_s28 }
0x1487   : > { %2748 = vrot.lane.b32.xlu1 %v2328_v59, %s6638_s29 }
0x148f   : > { %2750 = vrot.lane.b32.xlu1 %v2329_v37, %s6638_s29 }
0x14b1   : > { %v2383_v48 = vpop.xlane.xlu0 %2382 }
0x14b2   : > { %v2390_v22 = vsub.f32 %v2372_v13, %v2383_v48 }
0x14b4   : > { %v2393_v24 = vmul.f32 1.442695, %v2390_v22 }
0x14b6   : > { %4762 = vpow2.f32 %v2393_v24 }
0x14b9   : > { %v2386_v27 = vpop.xlane.xlu2 %2385  ;;  %2513 = vmax.xlane.f32.xlu1 %v2512_v26 }
0x14ba   : > { %v2391_v29 = vsub.f32 %v2375_v19, %v2386_v27 }
0x14bc   : > { %v4763_v30 = vpop.eup %4762  ;;  %v2395_v31 = vmul.f32 1.442695, %v2391_v29 }
0x14bd   : > { %v2399_v36 = vsel %vm571_vm15, %v4763_v30, 0.0 }
0x14be   : > { %4764 = vpow2.f32 %v2395_v31  ;;  %2400 = vadd.xlane.f32.xlu0 %v2399_v36 }
0x14c1   : > { %v2389_v38 = vpop.xlane.xlu1 %2388  ;;  %v2612_v42 = vpop.permute.xlu2 %2611 }
0x14c2   : > { %v2392_v58 = vsub.f32 %v2378_v23, %v2389_v38 }
0x14c4   : > { %v4765_v39 = vpop.eup %4764  ;;  %v2397_v40 = vmul.f32 1.442695, %v2392_v58  ;;  %v2614_v33 = vpop.permute.xlu0 %2613 }
0x14c5   : > { %4346 = vmatpush.xpose.msk.msrb.mxu3 %vm529_vm13, %v2614_v33  ;;  %v2402_v43 = vsel %vm571_vm15, %v4765_v39, 0.0 }
0x14c6   : > { %4766 = vpow2.f32 %v2397_v40  ;;  %2403 = vadd.xlane.f32.xlu0 %v2402_v43 }
0x14c9   : > { %4347 = vmatpush.xpose.msk.msrb.mxu3 %vm529_vm13, %v2612_v42 }
0x14cc   : > { %v4767_v44 = vpop.eup %4766  ;;  %v2606_v21 = vpop.permute.xlu0 %2605 }
0x14cd   : > { %v2405_v45 = vsel %vm578_vm0, %v4767_v44, 0.0 }
0x14ce   : > { %2406 = vadd.xlane.f32.xlu2 %v2405_v45 }
0x14d4   : > { %v2608_v16 = vpop.permute.xlu0 %2607 }
0x14d9   : > { %v2759_v49 = vpop.permute.xlu1 %2758 }
0x14da   : > { %2609 = vrot.lane.b32.xlu0 %v5873_v9, %s6636_s27  ;;  %4355 = vmatpush.xpose.msk.msrb.mxu0 %vm529_vm13, %v2759_v49 }
0x14e1   : > { %v2467_v51 = vpop.permute.xlu1 %2466 }
0x14e2   : > { %4340 = vmatmul.msk.f32.gmra.mxu0 %vm529_vm13, %v2467_v51 }
0x14e6   : > { %2752 = vrot.lane.b32.xlu2 %v5873_v9, %s6638_s29 }
0x14e9   : > { %v2757_v47 = vpop.permute.xlu1 %2756 }
0x14ea   : > { %4356 = vmatpush.xpose.msk.msrb.mxu0 %vm529_vm13, %v2757_v47 }
0x14f1   : > { %v2755_v11 = vpop.permute.xlu1 %2754 }
0x14f2   : > { %4357 = vmatpush.xpose.msk.msrb.mxu0 %vm529_vm13, %v2755_v11 }
0x14f9   : > { %v2749_v52 = vpop.permute.xlu1 %2748 }
0x14fa   : > { %4358 = vmatmul.msk.f32.vlgmr.msrb.gmra.mxu0 %vm529_vm13, %v2749_v52 }
0x1501   : > { %v2751_v50 = vpop.permute.xlu1 %2750 }
0x1502   : > { %4359 = vmatmul.msk.f32.gmra.mxu0 %vm529_vm13, %v2751_v50 }
0x1504   : > { %2516 = vmax.xlane.f32.xlu0 %v2515_v53 }
0x152c   : > { %v2514_v46 = vpop.xlane.xlu1 %2513 }
0x152d   : > { %v2521_v5 = vsub.f32 %v5897_v25, %v2514_v46 }
0x152f   : > { %v2524_v6 = vmul.f32 1.442695, %v2521_v5 }
0x1531   : > { %v2401_v55 = vpop.xlane.xlu0 %2400 }
0x1532   : > { %4768 = vrcp.f32 %v2401_v55 }
0x1538   : > { %v4769_v56 = vpop.eup %4768 }
0x1539   : > { %v2411_v35 = vmul.f32 %v4769_v56, %v4763_v30  ;;  %v2404_v57 = vpop.xlane.xlu0 %2403 }
0x153a   : > { %4770 = vrcp.f32 %v2404_v57 }
0x153b   : > { %4332 = vmatmul.msk.f32.vlgmr.msra.gmra.mxu3 %vm571_vm15, %v2411_v35 }
0x1540   : > { %v4771_v60 = vpop.eup %4770 }
0x1541   : > { %v2407_v59 = vpop.xlane.xlu2 %2406  ;;  %v2412_v61 = vmul.f32 %v4771_v60, %v4765_v39 }
0x1542   : > { %4772 = vrcp.f32 %v2407_v59 }
0x1543   : > { %4333 = vmatmul.msk.f32.gmra.mxu3 %vm571_vm15, %v2412_v61  ;;  %4774 = vpow2.f32 %v2524_v6 }
0x1548   : > { %v4773_v37 = vpop.eup %4772 }
0x1549   : > { %v2753_v2 = vpop.permute.xlu2 %2752  ;;  %v2413_v1 = vmul.f32 %v4773_v37, %v4767_v44  ;;  %v5927_v12 = vpop.eup %4774 }
0x154a   : > { %4360 = vmatmul.msk.f32.gmra.mxu0 %vm529_vm13, %v2753_v2  ;;  %v2530_v19 = vsel %vm571_vm15, %v5927_v12, 0.0 }
0x154b   : > { %4334 = vmatmul.msk.f32.gmra.mxu3 %vm571_vm15, %v2413_v1 }
0x154c   : > { %v2610_v4 = vpop.permute.xlu0 %2609 }
0x1553   : > { %4348 = vmatmul.msk.f32.vlgmr.msrb.gmra.mxu3 %vm529_vm13, %v2606_v21 }
0x155b   : > { %4349 = vmatmul.msk.f32.gmra.mxu3 %vm529_vm13, %v2608_v16 }
0x155f   : > { %v2509_v3 = vpop.f32.mrf.mxu0 }
0x1560   : > { %v2518_v41 = vsel %vm578_vm0, %v2509_v3, -inf }
0x1561   : > { %2519 = vmax.xlane.f32.xlu2 %v2518_v41 }
0x1563   : > { %4350 = vmatmul.msk.f32.gmra.mxu3 %vm529_vm13, %v2610_v4 }
0x1577   : > { %v2517_v7 = vpop.xlane.xlu0 %2516  ;;  %v2789_v8 = vpop.f32.mrf.mxu0 }
0x1578   : > { %v2522_v9 = vsub.f32 %v2506_v17, %v2517_v7  ;;  %v2798_v63 = vsel %vm571_vm15, %v2789_v8, -inf }
0x1579   : > { %2799 = vmax.xlane.f32.xlu1 %v2798_v63 }
0x157a   : > { %v2526_v10 = vmul.f32 1.442695, %v2522_v9 }
0x157c   : > { %4776 = vpow2.f32 %v2526_v10 }
0x157f   : > { %v2792_v13 = vpop.f32.mrf.mxu0 }
0x1580   : > { %v2801_v15 = vsel %vm571_vm15, %v2792_v13, -inf }
0x1581   : > { %2802 = vmax.xlane.f32.xlu2 %v2801_v15  ;;  %2531 = vadd.xlane.f32.xlu1 %v2530_v19 }
0x1582   : > { %v5932_v20 = vpop.eup %4776 }
0x1583   : > { %v2533_v23 = vsel %vm571_vm15, %v5932_v20, 0.0 }
0x1589   : > { %2534 = vadd.xlane.f32.xlu1 %v2533_v23 }
0x1599   : > { %4584 = vrot.lane.b32.xlu2 %v5856_v0, %s6639_s30 }
0x15be   : > { %v2450_v32 = vpop.f32.mrf.mxu3 }
0x15bf   : > { %2459 = vst.msk [vmem:[#allocation2] sm:$0xff] %vm529_vm13, %v2450_v32 }
0x15c6   : > { %v2453_v48 = vpop.f32.mrf.mxu3 }
0x15c7   : > { %2460 = vst.msk [vmem:[#allocation2 + $0x8] sm:$0xff] %vm529_vm13, %v2453_v48  ;;  %v2795_v22 = vpop.f32.mrf.mxu0 }
0x15c8   : > { %v2804_v24 = vsel %vm578_vm0, %v2795_v22, -inf }
0x15c9   : > { %2805 = vmax.xlane.f32.xlu0 %v2804_v24 }
0x15ce   : > { %v2456_v25 = vpop.f32.mrf.mxu3 }
0x15cf   : > { %2461 = vst.msk [vmem:[#allocation2 + $0x10] sm:$0x1] %vm654_vm3, %v2456_v25 }
0x15d4   : > { %v2520_v26 = vpop.xlane.xlu2 %2519 }
0x15d5   : > { %v2523_v27 = vsub.f32 %v2509_v3, %v2520_v26 }
0x15d6   : > { %v2646_v29 = vpop.f32.mrf.mxu3 }
0x15d7   : > { %v2528_v30 = vmul.f32 1.442695, %v2523_v27  ;;  %v2655_v31 = vsel %vm571_vm15, %v2646_v29, -inf }
0x15d8   : > { %2656 = vmax.xlane.f32.xlu0 %v2655_v31 }
0x15d9   : > { %4778 = vpow2.f32 %v2528_v30 }
0x15de   : > { %v5943_v36 = vpop.f32.mrf.mxu3 }
0x15df   : > { %v5945_v38 = vpop.eup %4778  ;;  %v2658_v49 = vsel %vm571_vm15, %v5943_v36, -inf }
0x15e0   : > { %v2536_v58 = vsel %vm578_vm0, %v5945_v38, 0.0 }
0x15e1   : > { %2537 = vadd.xlane.f32.xlu1 %v2536_v58 }
0x15e6   : > { %v5949_v39 = vpop.f32.mrf.mxu3 }
0x15e7   : > { %v2661_v40 = vsel %vm578_vm0, %v5949_v39, -inf }
0x15e8   : > { %2662 = vmax.xlane.f32.xlu2 %v2661_v40 }
0x15ec   : > { %2549 = vrot.lane.b32.xlu0 %v5850_v62, %s6639_s30  ;;  %v2800_v33 = vpop.xlane.xlu1 %2799 }
0x15ed   : > { %v2807_v43 = vsub.f32 %v2789_v8, %v2800_v33 }
0x15ef   : > { %v2810_v42 = vmul.f32 1.442695, %v2807_v43 }
0x15f1   : > { %4780 = vpow2.f32 %v2810_v42 }
0x15f4   : > { %v2803_v51 = vpop.xlane.xlu2 %2802 }
0x15f5   : > { %v2808_v47 = vsub.f32 %v2792_v13, %v2803_v51 }
0x15f7   : > { %v5955_v44 = vpop.eup %4780  ;;  %v2812_v11 = vmul.f32 1.442695, %v2808_v47 }
0x15f8   : > { %v2816_v45 = vsel %vm571_vm15, %v5955_v44, 0.0 }
0x15f9   : > { %2817 = vadd.xlane.f32.xlu1 %v2816_v45  ;;  %4782 = vpow2.f32 %v2812_v11 }
0x15fc   : > { %v4585_v57 = vpop.permute.xlu2 %4584 }
0x15fd   : > { %v4586_v3 = vunpack.i.l.bf16 %v4585_v57  ;;  %v4587_v41 = vunpack.i.h.bf16 %v4585_v57 }
0x15ff   : > { %v5967_v52 = vpop.eup %4782 }
0x1600   : > { %2835 = vrot.lane.b32.xlu2 %v5850_v62, %s6641_s21  ;;  %v2819_v17 = vsel %vm571_vm15, %v5967_v52, 0.0 }
0x1601   : > { %2659 = vmax.xlane.f32.xlu1 %v2658_v49 }
0x161a   : > { %4589 = vrot.lane.b32.xlu1 %v5856_v0, %s6641_s21 }
0x1622   : > { %2692 = vrot.lane.b32.xlu1 %v5850_v62, %s6640_s11  ;;  %v2532_v62 = vpop.xlane.xlu1 %2531 }
0x1629   : > { %2820 = vadd.xlane.f32.xlu2 %v2819_v17 }
0x162a   : > { %4594 = vrot.lane.b32.xlu1 %v5856_v0, %s6640_s11  ;;  %v2535_v37 = vpop.xlane.xlu1 %2534 }
0x163c   : > { %v2806_v50 = vpop.xlane.xlu0 %2805 }
0x163d   : > { %v2809_v53 = vsub.f32 %v2795_v22, %v2806_v50 }
0x163f   : > { %v2814_v21 = vmul.f32 1.442695, %v2809_v53 }
0x1641   : > { %4784 = vpow2.f32 %v2814_v21 }
0x1647   : > { %v5973_v35 = vpop.eup %4784 }
0x1648   : > { %v2822_v60 = vsel %vm578_vm0, %v5973_v35, 0.0 }
0x164b   : > { %v2657_v16 = vpop.xlane.xlu0 %2656 }
0x164c   : > { %v2664_v55 = vsub.f32 %v2646_v29, %v2657_v16 }
0x164e   : > { %v2667_v56 = vmul.f32 1.442695, %v2664_v55 }
0x1650   : > { %4786 = vpow2.f32 %v2667_v56 }
0x1651   : > { %4788 = vrcp.f32 %v2532_v62 }
0x1652   : > { %4790 = vrcp.f32 %v2535_v37  ;;  %v4366_v37 = vld [vmem:[%s6566_s4 + $0x48] sm:$0xff] }
0x1654   : > { %2823 = vadd.xlane.f32.xlu1 %v2822_v60  ;;  %v2538_v5 = vpop.xlane.xlu1 %2537 }
0x1655   : > { %4792 = vrcp.f32 %v2538_v5 }
0x1656   : > { %v5977_v59 = vpop.eup %4786 }
0x1657   : > { %v2673_v0 = vsel %vm571_vm15, %v5977_v59, 0.0  ;;  %v4789_v1 = vpop.eup %4788 }
0x1658   : > { %2674 = vadd.xlane.f32.xlu0 %v2673_v0  ;;  %v2542_v4 = vmul.f32 %v4789_v1, %v5927_v12  ;;  %v4791_v6 = vpop.eup %4790  ;;  %v4368_v0 = vld [vmem:[%s6566_s4 + $0x58] sm:$0xff] }
0x1659   : > { %v2543_v7 = vmul.f32 %v4791_v6, %v5932_v20  ;;  %2921 = vmatpush.msra.mxu3 %v4368_v0  ;;  %v3008_v0 = vperm.slane %v5835_v14, 4 }
0x165b   : > { %v2663_v61 = vpop.xlane.xlu2 %2662  ;;  %v4793_v9 = vpop.eup %4792 }
0x165c   : > { %v2544_v63 = vmul.f32 %v4793_v9, %v5945_v38  ;;  %v2666_v13 = vsub.f32 %v5949_v39, %v2663_v61  ;;  %v4367_v61 = vld [vmem:[%s6566_s4 + $0x50] sm:$0xff] }
0x165d   : > { %2922 = vmatpush.msra.mxu3 %v4367_v61 }
0x165e   : > { %v2550_v2 = vpop.permute.xlu0 %2549  ;;  %v2671_v19 = vmul.f32 1.442695, %v2666_v13 }
0x165f   : > { %4341 = vmatpush.msk.msrb.mxu2 %vm623_vm14, %v2550_v2  ;;  %2923 = vmatpush.msra.mxu3 %v4366_v37  ;;  %v4365_v2 = vld [vmem:[%s6566_s4 + $0x40] sm:$0xff]  ;;  %v4394_v37 = vld [vmem:[%s6568_s6 + $0x178] sm:$0xff] }
0x1660   : > { %3102 = vmatpush.msra.mxu0 %v4394_v37 }
0x1661   : > { %2578 = vmatpush.msrb.mxu2 %v4586_v3  ;;  %2924 = vmatpush.msra.mxu3 %v4365_v2  ;;  %v4393_v2 = vld [vmem:[%s6568_s6 + $0x170] sm:$0xff] }
0x1662   : > { %3103 = vmatpush.msra.mxu0 %v4393_v2 }
0x1663   : > { %v2836_v46 = vpop.permute.xlu2 %2835  ;;  %2579 = vmatpush.msrb.mxu2 %v4587_v41 }
0x1664   : > { %4342 = vmatmul.msk.f32.vlgmr.msrb.gmra.mxu2 %vm571_vm15, %v2542_v4 }
0x1665   : > { %4361 = vmatpush.msk.msra.mxu2 %vm623_vm14, %v2836_v46 }
0x166c   : > { %4343 = vmatmul.msk.f32.gmra.mxu2 %vm571_vm15, %v2543_v7  ;;  %v2818_v8 = vpop.xlane.xlu1 %2817 }
0x1674   : > { %4344 = vmatmul.msk.f32.gmra.mxu2 %vm571_vm15, %v2544_v63  ;;  %v2660_v10 = vpop.xlane.xlu1 %2659  ;;  %v2899_v63 = vperm.slane %v5835_v14, 2 }
0x1675   : > { %v2665_v12 = vsub.f32 %v5943_v36, %v2660_v10  ;;  %v2935_v10 = vperm.slane %v5835_v14, 3 }
0x1677   : > { %v2669_v15 = vmul.f32 1.442695, %v2665_v12 }
0x1679   : > { %4794 = vpow2.f32 %v2669_v15 }
0x167a   : > { %4796 = vpow2.f32 %v2671_v19 }
0x167b   : > { %4798 = vrcp.f32 %v2818_v8 }
0x167f   : > { %v4795_v23 = vpop.eup %4794 }
0x1680   : > { %v2676_v20 = vsel %vm571_vm15, %v4795_v23, 0.0  ;;  %v4797_v32 = vpop.eup %4796 }
0x1681   : > { %2677 = vadd.xlane.f32.xlu0 %v2676_v20  ;;  %v2679_v48 = vsel %vm578_vm0, %v4797_v32, 0.0  ;;  %v4799_v24 = vpop.eup %4798 }
0x1682   : > { %v2828_v27 = vmul.f32 %v4799_v24, %v5955_v44 }
0x1689   : > { %2680 = vadd.xlane.f32.xlu0 %v2679_v48 }
0x168c   : > { %v4590_v22 = vpop.permute.xlu1 %4589 }
0x168d   : > { %v4591_v25 = vunpack.i.l.bf16 %v4590_v22  ;;  %v4592_v26 = vunpack.i.h.bf16 %v4590_v22 }
0x168f   : > { %2864 = vmatpush.msra.mxu2 %v4591_v25 }
0x1691   : > { %2865 = vmatpush.msra.mxu2 %v4592_v26 }
0x1692   : > { %4362 = vmatmul.msk.f32.vlgmr.msra.gmra.mxu2 %vm571_vm15, %v2828_v27 }
0x1694   : > { %v2693_v29 = vpop.permute.xlu1 %2692 }
0x1695   : > { %4351 = vmatpush.msk.msra.mxu1 %vm623_vm14, %v2693_v29 }
0x169c   : > { %v2821_v30 = vpop.xlane.xlu2 %2820  ;;  %v4595_v31 = vpop.permute.xlu1 %4594 }
0x169d   : > { %4800 = vrcp.f32 %v2821_v30  ;;  %v4596_v36 = vunpack.i.l.bf16 %v4595_v31  ;;  %v4597_v38 = vunpack.i.h.bf16 %v4595_v31 }
0x169f   : > { %2721 = vmatpush.msra.mxu1 %v4596_v36 }
0x16a1   : > { %2722 = vmatpush.msra.mxu1 %v4597_v38 }
0x16a3   : > { %v4801_v58 = vpop.eup %4800 }
0x16a4   : > { %v2829_v39 = vmul.f32 %v4801_v58, %v5967_v52 }
0x16a6   : > { %4363 = vmatmul.msk.f32.gmra.mxu2 %vm571_vm15, %v2829_v39 }
0x16c7   : > { %v2824_v40 = vpop.xlane.xlu1 %2823 }
0x16c8   : > { %4802 = vrcp.f32 %v2824_v40 }
0x16cb   : > { %v2675_v33 = vpop.xlane.xlu0 %2674 }
0x16cc   : > { %4804 = vrcp.f32 %v2675_v33 }
0x16ce   : > { %v4803_v43 = vpop.eup %4802 }
0x16cf   : > { %v2830_v42 = vmul.f32 %v4803_v43, %v5973_v35 }
0x16d1   : > { %4364 = vmatmul.msk.f32.gmra.mxu2 %vm571_vm15, %v2830_v42 }
0x16d2   : > { %v4805_v44 = vpop.eup %4804 }
0x16d3   : > { %v2685_v45 = vmul.f32 %v4805_v44, %v5977_v59 }
0x16d5   : > { %4352 = vmatmul.msk.f32.vlgmr.msra.gmra.mxu1 %vm571_vm15, %v2685_v45 }
0x16e7   : > { %v2581_v49 = vpop.f32.mrf.mxu2 }
0x16e8   : > { %2593 = vrot.lane.b32.xlu2 %v2581_v49, %s6642_s26 }
0x16ef   : > { %v2584_v51 = vpop.f32.mrf.mxu2 }
0x16f4   : > { %v2678_v47 = vpop.xlane.xlu0 %2677 }
0x16f5   : > { %4806 = vrcp.f32 %v2678_v47  ;;  %v4374_v47 = vld [vmem:[%s6567_s5 + $0x50] sm:$0xff] }
0x16f7   : > { %v2587_v11 = vpop.f32.mrf.mxu2 }
0x16f8   : > { %2597 = vrot.lane.b32.xlu1 %v2587_v11, %s6642_s26  ;;  %v4373_v11 = vld [vmem:[%s6567_s5 + $0x48] sm:$0xff] }
0x16fb   : > { %v4807_v52 = vpop.eup %4806 }
0x16fc   : > { %v2681_v17 = vpop.xlane.xlu0 %2680  ;;  %v2686_v50 = vmul.f32 %v4807_v52, %v4795_v23  ;;  %v4372_v52 = vld [vmem:[%s6567_s5 + $0x40] sm:$0xff] }
0x16fd   : > { %4808 = vrcp.f32 %v2681_v17 }
0x16fe   : > { %4353 = vmatmul.msk.f32.gmra.mxu1 %vm571_vm15, %v2686_v50 }
0x1703   : > { %v4809_v53 = vpop.eup %4808 }
0x1704   : > { %v2687_v21 = vmul.f32 %v4809_v53, %v4797_v32 }
0x1706   : > { %4354 = vmatmul.msk.f32.gmra.mxu1 %vm571_vm15, %v2687_v21 }
0x1715   : > { %v2867_v16 = vpop.f32.mrf.mxu2 }
0x1716   : > { %2879 = vrot.lane.b32.xlu2 %v2867_v16, %s6643_s20 }
0x1729   : > { %v2870_v35 = vpop.f32.mrf.mxu2 }
0x1742   : > { %v2594_v55 = vpop.permute.xlu2 %2593 }
0x1743   : > { %2602 = vst.msk [vmem:[#allocation2] sm:$0xff] %vm796_vm4, %v2594_v55 }
0x1752   : > { %v2724_v56 = vpop.f32.mrf.mxu1 }
0x1753   : > { %2736 = vrot.lane.b32.xlu0 %v2724_v56, %s6644_s18 }
0x1754   : > { %v2873_v62 = vpop.f32.mrf.mxu2 }
0x175b   : > { %2595 = vrot.lane.b32.xlu0 %v2584_v51, %s6642_s26  ;;  %v4375_v51 = vld [vmem:[%s6567_s5 + $0x58] sm:$0xff] }
0x175c   : > { %3043 = vmatpush.msrb.mxu1 %v4375_v51  ;;  %v4379_v51 = vld [vmem:[%s6568_s6 + $0x100] sm:$0xff] }
0x175e   : > { %3044 = vmatpush.msrb.mxu1 %v4374_v47  ;;  %v4892_v47 = vld [vmem:[%s6569_s7 + $0x20] sm:$0xff] }
0x1760   : > { %3045 = vmatpush.msrb.mxu1 %v4373_v11  ;;  %v3021_v11 = vperm.slane %v4892_v47, 6 }
0x1762   : > { %3046 = vmatpush.msrb.mxu1 %v4372_v52 }
0x1763   : > { %2881 = vrot.lane.b32.xlu0 %v2870_v35, %s6643_s20 }
0x176a   : > { %v2598_v57 = vpop.permute.xlu1 %2597 }
0x176b   : > { %2604 = vst.msk [vmem:[#allocation2 + $0x10] sm:$0x1] %vm6650_vm10, %v2598_v57  ;;  %2883 = vrot.lane.b32.xlu0 %v2873_v62, %s6643_s20 }
0x1770   : > { %v2880_v3 = vpop.permute.xlu2 %2879 }
0x177b   : > { %v2727_v60 = vpop.f32.mrf.mxu1 }
0x177c   : > { %2738 = vrot.lane.b32.xlu2 %v2727_v60, %s6644_s18 }
0x1783   : > { %v2730_v59 = vpop.f32.mrf.mxu1 }
0x1784   : > { %2740 = vrot.lane.b32.xlu2 %v2730_v59, %s6644_s18 }
0x17c5   : > { %v2737_v1 = vpop.permute.xlu0 %2736 }
0x17c6   : > { %2745 = vst.msk [vmem:[#allocation2] sm:$0xff] %vm941_vm5, %v2737_v1  ;;  %v3012_v1 = vperm.slane %v5835_v14, 5 }
0x17c7   : > { %2888 = vst.msk [vmem:[#allocation2] sm:$0xff] %vm1086_vm7, %v2880_v3 }
0x17cd   : > { %v2596_v41 = vpop.permute.xlu0 %2595 }
0x17ce   : > { %2603 = vst.msk [vmem:[#allocation2 + $0x8] sm:$0xff] %vm796_vm4, %v2596_v41  ;;  %v2891_v4 = vld [vmem:[#allocation2] sm:$0xff]  ;;  %v4392_v41 = vld [vmem:[%s6568_s6 + $0x168] sm:$0xff] }
0x17cf   : > { %4369 = vmatmul.msk.f32.vlgmr.msra.gmra.mxu3 %vm413_vm1, %v2891_v4  ;;  %3104 = vmatpush.msra.mxu0 %v4392_v41 }
0x17d5   : > { %v2882_v46 = vpop.permute.xlu0 %2881 }
0x17d6   : > { %v2739_v5 = vpop.permute.xlu2 %2738 }
0x17d7   : > { %2746 = vst.msk [vmem:[#allocation2 + $0x8] sm:$0xff] %vm941_vm5, %v2739_v5 }
0x17d8   : > { %2889 = vst.msk [vmem:[#allocation2 + $0x8] sm:$0xff] %vm1086_vm7, %v2882_v46 }
0x17dd   : > { %v2884_v7 = vpop.permute.xlu0 %2883 }
0x17de   : > { %v2741_v6 = vpop.permute.xlu2 %2740 }
0x17df   : > { %2747 = vst.msk [vmem:[#allocation2 + $0x10] sm:$0x1] %vm6651_vm11, %v2741_v6  ;;  %v2892_v8 = vld [vmem:[#allocation2 + $0x8] sm:$0xff] }
0x17e0   : > { %2890 = vst.msk [vmem:[#allocation2 + $0x10] sm:$0x1] %vm6652_vm12, %v2884_v7  ;;  %4370 = vmatmul.msk.f32.gmra.mxu3 %vm413_vm1, %v2892_v8 }
0x17e7   : > { %v2893_v9 = vld [vmem:[#allocation2 + $0x10] sm:$0x1] }
0x17e8   : > { %4371 = vmatmul.msk.f32.gmra.mxu3 %vm413_vm1, %v2893_v9 }
0x1852   : > { %v2926_v12 = vpop.f32.mrf.mxu3 }
0x1853   : > { %v2927_v13 = vadd.f32 %v2926_v12, %v2899_v63 }
0x1855   : > { %v2936_v15 = vmul.f32 %v2935_v10, %v2927_v13 }
0x1857   : > { %v6040_v19 = vadd.f32 %v2936_v15, %v5792_v28 }
0x1859   : > { %v2942_v23 = vsel %vm413_vm1, %v6040_v19, 0.0 }
0x185a   : > { %2943 = vadd.xlane.f32.xlu2 %v2942_v23 }
0x1863   : > { %v2929_v20 = vpop.f32.mrf.mxu3 }
0x1864   : > { %v2930_v32 = vadd.f32 %v2929_v20, %v2899_v63 }
0x1866   : > { %v2937_v48 = vmul.f32 %v2935_v10, %v2930_v32 }
0x1868   : > { %v6045_v22 = vadd.f32 %v2937_v48, %v5797_v54 }
0x186a   : > { %v2945_v24 = vsel %vm413_vm1, %v6045_v22, 0.0 }
0x186b   : > { %2946 = vadd.xlane.f32.xlu0 %v2945_v24  ;;  %v2932_v25 = vpop.f32.mrf.mxu3 }
0x186c   : > { %v2933_v26 = vadd.f32 %v2932_v25, %v2899_v63 }
0x186e   : > { %v2938_v27 = vmul.f32 %v2935_v10, %v2933_v26 }
0x1870   : > { %v6050_v28 = vadd.f32 %v2938_v27, %v5802_v18 }
0x1872   : > { %v2948_v29 = vsel %vm420_vm2, %v6050_v28, 0.0 }
0x1873   : > { %2949 = vadd.xlane.f32.xlu1 %v2948_v29 }
0x18cd   : > { %v2944_v30 = vpop.xlane.xlu2 %2943 }
0x18ce   : > { %v2951_v31 = vmul.f32 %v2944_v30, %v5134_v34 }
0x18d0   : > { %v2954_v54 = vsub.f32 %v6040_v19, %v2951_v31 }
0x18d2   : > { %v2957_v36 = vmul.f32 %v2954_v54, %v2954_v54 }
0x18d4   : > { %v2960_v38 = vsel %vm413_vm1, %v2957_v36, 0.0  ;;  %v4391_v36 = vld [vmem:[%s6568_s6 + $0x160] sm:$0xff] }
0x18d5   : > { %2961 = vadd.xlane.f32.xlu2 %v2960_v38  ;;  %3105 = vmatpush.msra.mxu0 %v4391_v36  ;;  %v4390_v38 = vld [vmem:[%s6568_s6 + $0x158] sm:$0xff] }
0x18d7   : > { %3106 = vmatpush.msra.mxu0 %v4390_v38 }
0x18de   : > { %v2947_v58 = vpop.xlane.xlu0 %2946 }
0x18df   : > { %v2952_v39 = vmul.f32 %v2947_v58, %v5134_v34  ;;  %v4389_v58 = vld [vmem:[%s6568_s6 + $0x150] sm:$0xff] }
0x18e0   : > { %3107 = vmatpush.msra.mxu0 %v4389_v58 }
0x18e1   : > { %v6059_v40 = vsub.f32 %v6045_v22, %v2952_v39  ;;  %v4388_v39 = vld [vmem:[%s6568_s6 + $0x148] sm:$0xff] }
0x18e2   : > { %3108 = vmatpush.msra.mxu0 %v4388_v39 }
0x18e3   : > { %v2958_v18 = vmul.f32 %v6059_v40, %v6059_v40 }
0x18e5   : > { %v2963_v33 = vsel %vm413_vm1, %v2958_v18, 0.0  ;;  %v4386_v18 = vld [vmem:[%s6568_s6 + $0x138] sm:$0xff] }
0x18e6   : > { %v2950_v43 = vpop.xlane.xlu1 %2949  ;;  %2964 = vadd.xlane.f32.xlu0 %v2963_v33  ;;  %v4385_v33 = vld [vmem:[%s6568_s6 + $0x130] sm:$0xff] }
0x18e7   : > { %v2953_v42 = vmul.f32 %v2950_v43, %v5134_v34  ;;  %v4384_v43 = vld [vmem:[%s6568_s6 + $0x128] sm:$0xff] }
0x18e9   : > { %v6066_v44 = vsub.f32 %v6050_v28, %v2953_v42  ;;  %v4383_v42 = vld [vmem:[%s6568_s6 + $0x120] sm:$0xff] }
0x18eb   : > { %v2959_v45 = vmul.f32 %v6066_v44, %v6066_v44 }
0x18ed   : > { %v2966_v49 = vsel %vm420_vm2, %v2959_v45, 0.0  ;;  %v4381_v45 = vld [vmem:[%s6568_s6 + $0x110] sm:$0xff] }
0x18ee   : > { %2967 = vadd.xlane.f32.xlu2 %v2966_v49  ;;  %v4380_v49 = vld [vmem:[%s6568_s6 + $0x108] sm:$0xff] }
0x1948   : > { %v2962_v17 = vpop.xlane.xlu2 %2961 }
0x1949   : > { %v2969_v50 = vmul.f32 %v2962_v17, %v5134_v34 }
0x194b   : > { %v2972_v53 = vadd.f32 1e-06, %v2969_v50 }
0x194d   : > { %4810 = vrsqrt.f32 %v2972_v53  ;;  %vm2981_vm8 = vweird.f32 %v2972_v53 }
0x1953   : > { %v4811_v21 = vpop.eup %4810 }
0x1954   : > { %v2976_v16 = vmul.f32 %v4811_v21, %v2972_v53  ;;  %vm2982_vm6 = vweird.f32 %v4811_v21 }
0x1955   : > { %vm2983_vm9 = vmor %vm2981_vm8, %vm2982_vm6 }
0x1956   : > { %v2977_v55 = vmul.f32 %v4811_v21, %v2976_v16 }
0x1958   : > { %v2978_v56 = vmul.f32 0.5, %v2977_v55 }
0x1959   : > { %v2965_v35 = vpop.xlane.xlu0 %2964 }
0x195a   : > { %v2979_v62 = vsub.f32 1.5, %v2978_v56  ;;  %v2970_v57 = vmul.f32 %v2965_v35, %v5134_v34 }
0x195c   : > { %v2980_v60 = vmul.f32 %v4811_v21, %v2979_v62  ;;  %v2973_v59 = vadd.f32 1e-06, %v2970_v57 }
0x195e   : > { %v2984_v61 = vsel %vm2983_vm9, %v4811_v21, %v2980_v60  ;;  %4812 = vrsqrt.f32 %v2973_v59  ;;  %vm2991_vm11 = vweird.f32 %v2973_v59 }
0x195f   : > { %v3005_v3 = vmul.f32 %v2984_v61, %v2954_v54 }
0x1961   : > { %v3009_v4 = vmul.f32 %v3008_v0, %v3005_v3  ;;  %v2968_v46 = vpop.xlane.xlu2 %2967 }
0x1962   : > { %v2971_v5 = vmul.f32 %v2968_v46, %v5134_v34 }
0x1963   : > { %v3013_v6 = vadd.f32 %v3012_v1, %v3009_v4 }
0x1964   : > { %v4813_v7 = vpop.eup %4812  ;;  %v2974_v8 = vadd.f32 1e-06, %v2971_v5 }
0x1965   : > { %v2986_v9 = vmul.f32 %v4813_v7, %v2973_v59  ;;  %4376 = vmatmul.msk.f32.vlgmr.msrb.gmra.mxu1 %vm413_vm1, %v3013_v6  ;;  %vm2992_vm10 = vweird.f32 %v4813_v7 }
0x1966   : > { %4814 = vrsqrt.f32 %v2974_v8  ;;  %vm2993_vm12 = vmor %vm2991_vm11, %vm2992_vm10  ;;  %vm3001_vm8 = vweird.f32 %v2974_v8 }
0x1967   : > { %v2987_v14 = vmul.f32 %v4813_v7, %v2986_v9 }
0x1969   : > { %v2988_v63 = vmul.f32 0.5, %v2987_v14 }
0x196b   : > { %v2989_v10 = vsub.f32 1.5, %v2988_v63 }
0x196c   : > { %v4815_v12 = vpop.eup %4814 }
0x196d   : > { %v2990_v13 = vmul.f32 %v4813_v7, %v2989_v10  ;;  %v2996_v15 = vmul.f32 %v4815_v12, %v2974_v8  ;;  %vm3002_vm6 = vweird.f32 %v4815_v12 }
0x196e   : > { %vm3003_vm9 = vmor %vm3001_vm8, %vm3002_vm6 }
0x196f   : > { %v2994_v23 = vsel %vm2993_vm12, %v4813_v7, %v2990_v13  ;;  %v2997_v20 = vmul.f32 %v4815_v12, %v2996_v15 }
0x1970   : > { %v3006_v32 = vmul.f32 %v2994_v23, %v6059_v40  ;;  %v4387_v40 = vld [vmem:[%s6568_s6 + $0x140] sm:$0xff]  ;;  %v3101_v23 = vperm.slane %v4892_v47, 7 }
0x1971   : > { %v2998_v48 = vmul.f32 0.5, %v2997_v20  ;;  %3109 = vmatpush.msra.mxu0 %v4387_v40  ;;  %v4620_v20 = vld [vmem:[%s6569_s7 + $0x28] ss:$0 sm:$0xff] }
0x1972   : > { %v3010_v24 = vmul.f32 %v3008_v0, %v3006_v32 }
0x1973   : > { %v2999_v25 = vsub.f32 1.5, %v2998_v48  ;;  %3110 = vmatpush.msra.mxu0 %v4386_v18 }
0x1974   : > { %v3014_v26 = vadd.f32 %v3012_v1, %v3010_v24 }
0x1975   : > { %v3000_v27 = vmul.f32 %v4815_v12, %v2999_v25  ;;  %3111 = vmatpush.msra.mxu0 %v4385_v33 }
0x1976   : > { %4377 = vmatmul.msk.f32.gmra.mxu1 %vm413_vm1, %v3014_v26 }
0x1977   : > { %v3004_v29 = vsel %vm3003_vm9, %v4815_v12, %v3000_v27  ;;  %3112 = vmatpush.msra.mxu0 %v4384_v43 }
0x1978   : > { %v3007_v30 = vmul.f32 %v3004_v29, %v6066_v44  ;;  %v4382_v44 = vld [vmem:[%s6568_s6 + $0x118] sm:$0xff] }
0x1979   : > { %3113 = vmatpush.msra.mxu0 %v4383_v42 }
0x197a   : > { %v3011_v31 = vmul.f32 %v3008_v0, %v3007_v30 }
0x197b   : > { %3114 = vmatpush.msra.mxu0 %v4382_v44 }
0x197c   : > { %v3015_v54 = vadd.f32 %v3012_v1, %v3011_v31 }
0x197d   : > { %3115 = vmatpush.msra.mxu0 %v4381_v45 }
0x197e   : > { %4378 = vmatmul.msk.f32.gmra.mxu1 %vm413_vm1, %v3015_v54 }
0x197f   : > { %3116 = vmatpush.msra.mxu0 %v4380_v49 }
0x1981   : > { %3117 = vmatpush.msra.mxu0 %v4379_v51 }
0x19e2   : > { %v3048_v52 = vpop.f32.mrf.mxu1 }
0x19e3   : > { %v3049_v17 = vadd.f32 %v3048_v52, %v3021_v11 }
0x19e5   : > { %v3057_v50 = vmul.f32 %v3049_v17, %v3049_v17 }
0x19e7   : > { %v3060_v53 = vmul.f32 %v3057_v50, %v3049_v17  ;;  %v4400_v50 = vld [vmem:[%s6565_s3 + $0x78] sm:$0xff] }
0x19e8   : > { %3238 = vmatpush.msrb.mxu2 %v4400_v50 }
0x19e9   : > { %v3063_v21 = vmul.f32 0.044715, %v3060_v53  ;;  %v4399_v53 = vld [vmem:[%s6565_s3 + $0x70] sm:$0xff] }
0x19ea   : > { %3239 = vmatpush.msrb.mxu2 %v4399_v53 }
0x19eb   : > { %v3066_v16 = vadd.f32 %v3063_v21, %v3049_v17  ;;  %v4398_v21 = vld [vmem:[%s6565_s3 + $0x68] sm:$0xff] }
0x19ec   : > { %3240 = vmatpush.msrb.mxu2 %v4398_v21 }
0x19ed   : > { %v3069_v55 = vmul.f32 0.7978846, %v3066_v16  ;;  %v4397_v16 = vld [vmem:[%s6565_s3 + $0x60] sm:$0xff] }
0x19ee   : > { %3241 = vmatpush.msrb.mxu2 %v4397_v16 }
0x19ef   : > { %4816 = vtanh.f32 %v3069_v55 }
0x19f3   : > { %v3051_v56 = vpop.f32.mrf.mxu1 }
0x19f4   : > { %v3052_v35 = vadd.f32 %v3051_v56, %v3021_v11 }
0x19f5   : > { %v4817_v62 = vpop.eup %4816 }
0x19f6   : > { %v3075_v57 = vadd.f32 1.0, %v4817_v62  ;;  %v3058_v60 = vmul.f32 %v3052_v35, %v3052_v35 }
0x19f8   : > { %v3078_v59 = vmul.f32 0.5, %v3075_v57  ;;  %v3061_v0 = vmul.f32 %v3058_v60, %v3052_v35 }
0x19fa   : > { %v3081_v61 = vmul.f32 %v3078_v59, %v3049_v17  ;;  %v3064_v37 = vmul.f32 0.044715, %v3061_v0 }
0x19fb   : > { %v3054_v2 = vpop.f32.mrf.mxu1 }
0x19fc   : > { %v3067_v1 = vadd.f32 %v3064_v37, %v3052_v35  ;;  %v3055_v3 = vadd.f32 %v3054_v2, %v3021_v11  ;;  %3118 = vmatmul.f32.vlgmr.msra.gmra.mxu0 %v3081_v61  ;;  %v6191_v61 = vld [vmem:[%s6569_s7 + $0x30] sm:$0xff] }
0x19fe   : > { %v3059_v41 = vmul.f32 %v3055_v3, %v3055_v3  ;;  %v3070_v4 = vmul.f32 0.7978846, %v3067_v1 }
0x1a00   : > { %v3062_v46 = vmul.f32 %v3059_v41, %v3055_v3  ;;  %4818 = vtanh.f32 %v3070_v4  ;;  %v3204_v41 = vperm.slane %v6191_v61, 0 }
0x1a02   : > { %v3065_v5 = vmul.f32 0.044715, %v3062_v46  ;;  %v3208_v46 = vperm.slane %v6191_v61, 1 }
0x1a04   : > { %v3068_v6 = vadd.f32 %v3065_v5, %v3055_v3 }
0x1a06   : > { %v4819_v7 = vpop.eup %4818  ;;  %v3071_v8 = vmul.f32 0.7978846, %v3068_v6 }
0x1a07   : > { %v3076_v9 = vadd.f32 1.0, %v4819_v7 }
0x1a08   : > { %4820 = vtanh.f32 %v3071_v8 }
0x1a09   : > { %v3079_v14 = vmul.f32 0.5, %v3076_v9 }
0x1a0b   : > { %v3082_v63 = vmul.f32 %v3079_v14, %v3052_v35 }
0x1a0d   : > { %3121 = vmatmul.f32.gmra.mxu0 %v3082_v63 }
0x1a0e   : > { %v4821_v10 = vpop.eup %4820 }
0x1a0f   : > { %v3077_v12 = vadd.f32 1.0, %v4821_v10 }
0x1a11   : > { %v3080_v13 = vmul.f32 0.5, %v3077_v12 }
0x1a13   : > { %v3083_v15 = vmul.f32 %v3080_v13, %v3055_v3 }
0x1a15   : > { %3124 = vmatmul.f32.gmra.mxu0 %v3083_v15 }
0x1a79   : > { %v3119_v32 = vpop.f32.mrf.mxu0 }
0x1a7a   : > { %v3120_v48 = vadd.f32 %v3119_v32, %v3101_v23 }
0x1a7c   : > { %v3129_v24 = vmul.f32 %v4620_v20, %v3120_v48 }
0x1a7e   : > { %v6148_v25 = vadd.f32 %v3129_v24, %v6040_v19 }
0x1a80   : > { %v3138_v26 = vsel %vm413_vm1, %v6148_v25, 0.0 }
0x1a81   : > { %3139 = vadd.xlane.f32.xlu0 %v3138_v26 }
0x1a8a   : > { %v3122_v27 = vpop.f32.mrf.mxu0 }
0x1a8b   : > { %v3123_v29 = vadd.f32 %v3122_v27, %v3101_v23 }
0x1a8d   : > { %v3130_v30 = vmul.f32 %v4620_v20, %v3123_v29 }
0x1a8f   : > { %v6153_v31 = vadd.f32 %v3130_v30, %v6045_v22 }
0x1a91   : > { %v3141_v54 = vsel %vm413_vm1, %v6153_v31, 0.0 }
0x1a92   : > { %v3125_v36 = vpop.f32.mrf.mxu0  ;;  %3142 = vadd.xlane.f32.xlu1 %v3141_v54 }
0x1a93   : > { %v3126_v38 = vadd.f32 %v3125_v36, %v3101_v23 }
0x1a95   : > { %v3131_v58 = vmul.f32 %v4620_v20, %v3126_v38 }
0x1a97   : > { %v6158_v19 = vadd.f32 %v3131_v58, %v6050_v28 }
0x1a99   : > { %v3144_v39 = vsel %vm420_vm2, %v6158_v19, 0.0 }
0x1a9a   : > { %3145 = vadd.xlane.f32.xlu2 %v3144_v39 }
0x1af4   : > { %v3140_v40 = vpop.xlane.xlu0 %3139 }
0x1af5   : > { %v3147_v18 = vmul.f32 %v3140_v40, %v5134_v34 }
0x1af7   : > { %v3150_v22 = vsub.f32 %v6148_v25, %v3147_v18 }
0x1af9   : > { %v3153_v33 = vmul.f32 %v3150_v22, %v3150_v22 }
0x1afb   : > { %v3156_v43 = vsel %vm413_vm1, %v3153_v33, 0.0 }
0x1afc   : > { %3157 = vadd.xlane.f32.xlu0 %v3156_v43 }
0x1b05   : > { %v3143_v42 = vpop.xlane.xlu1 %3142 }
0x1b06   : > { %v3148_v44 = vmul.f32 %v3143_v42, %v5134_v34 }
0x1b08   : > { %v3151_v45 = vsub.f32 %v6153_v31, %v3148_v44 }
0x1b0a   : > { %v3154_v28 = vmul.f32 %v3151_v45, %v3151_v45 }
0x1b0c   : > { %v3159_v49 = vsel %vm413_vm1, %v3154_v28, 0.0 }
0x1b0d   : > { %v3146_v51 = vpop.xlane.xlu2 %3145  ;;  %3160 = vadd.xlane.f32.xlu1 %v3159_v49 }
0x1b0e   : > { %v3149_v47 = vmul.f32 %v3146_v51, %v5134_v34 }
0x1b10   : > { %v6170_v11 = vsub.f32 %v6158_v19, %v3149_v47 }
0x1b12   : > { %v3155_v52 = vmul.f32 %v6170_v11, %v6170_v11 }
0x1b14   : > { %v3162_v17 = vsel %vm420_vm2, %v3155_v52, 0.0 }
0x1b15   : > { %3163 = vadd.xlane.f32.xlu2 %v3162_v17 }
0x1b6f   : > { %v3158_v55 = vpop.xlane.xlu0 %3157 }
0x1b70   : > { %v3165_v56 = vmul.f32 %v3158_v55, %v5134_v34 }
0x1b72   : > { %v3168_v35 = vadd.f32 1e-06, %v3165_v56 }
0x1b74   : > { %4822 = vrsqrt.f32 %v3168_v35  ;;  %vm3177_vm11 = vweird.f32 %v3168_v35 }
0x1b7a   : > { %v4823_v62 = vpop.eup %4822 }
0x1b7b   : > { %v3172_v57 = vmul.f32 %v4823_v62, %v3168_v35  ;;  %vm3178_vm10 = vweird.f32 %v4823_v62 }
0x1b7c   : > { %vm3179_vm12 = vmor %vm3177_vm11, %vm3178_vm10 }
0x1b7d   : > { %v3173_v60 = vmul.f32 %v4823_v62, %v3172_v57 }
0x1b7f   : > { %v3174_v59 = vmul.f32 0.5, %v3173_v60 }
0x1b80   : > { %v3161_v0 = vpop.xlane.xlu1 %3160 }
0x1b81   : > { %v3175_v37 = vsub.f32 1.5, %v3174_v59  ;;  %v3166_v2 = vmul.f32 %v3161_v0, %v5134_v34 }
0x1b83   : > { %v3176_v1 = vmul.f32 %v4823_v62, %v3175_v37  ;;  %v3169_v3 = vadd.f32 1e-06, %v3166_v2 }
0x1b85   : > { %v3180_v4 = vsel %vm3179_vm12, %v4823_v62, %v3176_v1  ;;  %4824 = vrsqrt.f32 %v3169_v3  ;;  %vm3187_vm8 = vweird.f32 %v3169_v3 }
0x1b86   : > { %v3201_v5 = vmul.f32 %v3180_v4, %v3150_v22 }
0x1b88   : > { %v3205_v6 = vmul.f32 %v3204_v41, %v3201_v5  ;;  %v3164_v7 = vpop.xlane.xlu2 %3163 }
0x1b89   : > { %v3167_v8 = vmul.f32 %v3164_v7, %v5134_v34 }
0x1b8a   : > { %v3209_v9 = vadd.f32 %v3208_v46, %v3205_v6 }
0x1b8b   : > { %v4825_v14 = vpop.eup %4824  ;;  %v3170_v63 = vadd.f32 1e-06, %v3167_v8 }
0x1b8c   : > { %v3182_v10 = vmul.f32 %v4825_v14, %v3169_v3  ;;  %4401 = vmatmul.msk.f32.vlgmr.msrb.gmra.mxu2 %vm413_vm1, %v3209_v9  ;;  %vm3188_vm6 = vweird.f32 %v4825_v14 }
0x1b8d   : > { %4826 = vrsqrt.f32 %v3170_v63  ;;  %vm3189_vm9 = vmor %vm3187_vm8, %vm3188_vm6  ;;  %vm3197_vm11 = vweird.f32 %v3170_v63 }
0x1b8e   : > { %v3183_v12 = vmul.f32 %v4825_v14, %v3182_v10 }
0x1b90   : > { %v3184_v13 = vmul.f32 0.5, %v3183_v12 }
0x1b92   : > { %v3185_v15 = vsub.f32 1.5, %v3184_v13 }
0x1b93   : > { %v4827_v23 = vpop.eup %4826 }
0x1b94   : > { %v3186_v20 = vmul.f32 %v4825_v14, %v3185_v15  ;;  %v3192_v32 = vmul.f32 %v4827_v23, %v3170_v63  ;;  %vm3198_vm10 = vweird.f32 %v4827_v23 }
0x1b95   : > { %vm3199_vm12 = vmor %vm3197_vm11, %vm3198_vm10 }
0x1b96   : > { %v3190_v48 = vsel %vm3189_vm9, %v4825_v14, %v3186_v20  ;;  %v3193_v24 = vmul.f32 %v4827_v23, %v3192_v32 }
0x1b97   : > { %v3202_v26 = vmul.f32 %v3190_v48, %v3151_v45 }
0x1b98   : > { %v3194_v27 = vmul.f32 0.5, %v3193_v24 }
0x1b99   : > { %v3206_v29 = vmul.f32 %v3204_v41, %v3202_v26 }
0x1b9a   : > { %v3195_v30 = vsub.f32 1.5, %v3194_v27 }
0x1b9b   : > { %v3210_v54 = vadd.f32 %v3208_v46, %v3206_v29 }
0x1b9c   : > { %v3196_v36 = vmul.f32 %v4827_v23, %v3195_v30 }
0x1b9d   : > { %4402 = vmatmul.msk.f32.gmra.mxu2 %vm413_vm1, %v3210_v54 }
0x1b9e   : > { %v3200_v38 = vsel %vm3199_vm12, %v4827_v23, %v3196_v36 }
0x1b9f   : > { %v3203_v58 = vmul.f32 %v3200_v38, %v6170_v11 }
0x1ba1   : > { %v3207_v39 = vmul.f32 %v3204_v41, %v3203_v58 }
0x1ba3   : > { %v3211_v40 = vadd.f32 %v3208_v46, %v3207_v39 }
0x1ba5   : > { %4403 = vmatmul.msk.f32.gmra.mxu2 %vm413_vm1, %v3211_v40 }
0x1c0f   : > { %v6201_v18 = vpop.f32.mrf.mxu2 }
0x1c10   : > { %3258 = vrot.lane.b32.xlu2 %v6201_v18, %s6648_s19  ;;  %v6229_v44 = vmul.f32 0.35355338, %v6201_v18 }
0x1c18   : > { %3392 = vrot.lane.b32.xlu2 %v6201_v18, %s6633_s22 }
0x1c20   : > { %v6207_v22 = vpop.f32.mrf.mxu2 }
0x1c21   : > { %3260 = vrot.lane.b32.xlu1 %v6207_v22, %s6648_s19  ;;  %v6212_v33 = vmul.f32 0.35355338, %v6207_v22  ;;  %v6226_v42 = vpack.i.bf16 %v6201_v18, %v6207_v22 }
0x1c23   : > { %3388 = vrot.lane.b32.xlu2 %v6212_v33, %s6635_s25 }
0x1c28   : > { %v6216_v43 = vpop.f32.mrf.mxu2 }
0x1c29   : > { %3394 = vrot.lane.b32.xlu1 %v6207_v22, %s6633_s22  ;;  %3262 = vrot.lane.b32.xlu0 %v6216_v43, %s6648_s19  ;;  %v6252_v56 = vmul.f32 0.35355338, %v6216_v43 }
0x1c2b   : > { %3342 = vrot.lane.b32.xlu2 %v6216_v43, %s6649_s24 }
0x1c31   : > { %4599 = vrot.lane.b32.xlu1 %v6226_v42, %s6649_s24  ;;  %3386 = vrot.lane.b32.xlu0 %v6229_v44, %s6635_s25  ;;  %s6656_s24 = sld [smem:[#allocation7_spill]] }
0x1c33   : > { %3682 = vrot.lane.b32.xlu2 %v6216_v43, %s6637_s28 }
0x1c39   : > { %3396 = vrot.lane.b32.xlu0 %v6216_v43, %s6633_s22  ;;  %s4907_s22 = sshra.s32 %s4126_s14, 4  ;;  %s4908_s22 = int_to_ptr.hbm [resolvable:$true] %s4907_s22 }
0x1c3a   : > { %p4914_p0 = scmp.lt.s32.totalorder %s4908_s22, %s6658_s1 }
0x1c6a   : > { %v3259_v45 = vpop.permute.xlu2 %3258 }
0x1c72   : > { %v3393_v28 = vpop.permute.xlu2 %3392 }
0x1c7d   : > { %v3389_v49 = vpop.permute.xlu2 %3388 }
0x1c85   : > { %v3343_v51 = vpop.permute.xlu2 %3342 }
0x1c86   : > { %4410 = vmatpush.msk.msra.mxu1 %vm623_vm14, %v3343_v51 }
0x1c8d   : > { %v3683_v55 = vpop.permute.xlu2 %3682 }
0x1c93   : > { %v3261_v47 = vpop.permute.xlu1 %3260 }
0x1c9b   : > { %v3395_v11 = vpop.permute.xlu1 %3394  ;;  %v3263_v52 = vpop.permute.xlu0 %3262 }
0x1c9c   : > { %4404 = vmatpush.xpose.msk.msrb.mxu3 %vm529_vm13, %v3263_v52 }
0x1ca0   : > { %4405 = vmatpush.xpose.msk.msrb.mxu3 %vm529_vm13, %v3261_v47 }
0x1ca3   : > { %v4600_v17 = vpop.permute.xlu1 %4599  ;;  %v3387_v50 = vpop.permute.xlu0 %3386 }
0x1ca4   : > { %v4601_v53 = vunpack.i.l.bf16 %v4600_v17  ;;  %4406 = vmatpush.xpose.msk.msrb.mxu3 %vm529_vm13, %v3259_v45  ;;  %v4602_v21 = vunpack.i.h.bf16 %v4600_v17 }
0x1ca6   : > { %3371 = vmatpush.msra.mxu1 %v4601_v53 }
0x1ca7   : > { %4407 = vmatmul.msk.f32.vlgmr.msrb.gmra.mxu3 %vm529_vm13, %v6229_v44 }
0x1ca8   : > { %3372 = vmatpush.msra.mxu1 %v4602_v21 }
0x1cab   : > { %v3397_v16 = vpop.permute.xlu0 %3396 }
0x1cac   : > { %4414 = vmatpush.xpose.msk.msra.mxu2 %vm529_vm13, %v3397_v16 }
0x1caf   : > { %4408 = vmatmul.msk.f32.gmra.mxu3 %vm529_vm13, %v6212_v33 }
0x1cb0   : > { %4415 = vmatpush.xpose.msk.msra.mxu2 %vm529_vm13, %v3395_v11 }
0x1cb4   : > { %4416 = vmatpush.xpose.msk.msra.mxu2 %vm529_vm13, %v3393_v28 }
0x1cb7   : > { %4409 = vmatmul.msk.f32.gmra.mxu3 %vm529_vm13, %v6252_v56  ;;  %4417 = vmatmul.msk.f32.vlgmr.msra.gmra.mxu2 %vm529_vm13, %v3387_v50 }
0x1cb8   : > { %4434 = vmatpush.xpose.msk.msrb.mxu2 %vm529_vm13, %v3683_v55 }
0x1cbf   : > { %4418 = vmatmul.msk.f32.gmra.mxu2 %vm529_vm13, %v3389_v49 }
0x1d2a   : > { %v3296_v35 = vpop.f32.mrf.mxu3 }
0x1d2b   : > { %v3305_v62 = vsel %vm571_vm15, %v3296_v35, -inf }
0x1d2c   : > { %3306 = vmax.xlane.f32.xlu0 %v3305_v62 }
0x1d32   : > { %v3299_v57 = vpop.f32.mrf.mxu3 }
0x1d33   : > { %v3308_v60 = vsel %vm571_vm15, %v3299_v57, -inf }
0x1d34   : > { %3309 = vmax.xlane.f32.xlu1 %v3308_v60 }
0x1d3a   : > { %v3302_v59 = vpop.f32.mrf.mxu3  ;;  %v3427_v32 = vpop.f32.mrf.mxu2 }
0x1d3b   : > { %v3311_v0 = vsel %vm578_vm0, %v3302_v59, -inf  ;;  %v3436_v48 = vsel %vm571_vm15, %v3427_v32, -inf }
0x1d3c   : > { %3312 = vmax.xlane.f32.xlu2 %v3311_v0 }
0x1d40   : > { %3680 = vrot.lane.b32.xlu0 %v6207_v22, %s6637_s28 }
0x1d42   : > { %v3430_v24 = vpop.f32.mrf.mxu2 }
0x1d43   : > { %v3439_v26 = vsel %vm571_vm15, %v3430_v24, -inf }
0x1d48   : > { %3539 = vrot.lane.b32.xlu0 %v6216_v43, %s6634_s12 }
0x1d4d   : > { %3678 = vrot.lane.b32.xlu1 %v6201_v18, %s6637_s28  ;;  %s4913_s28 = scalar_lea.hbm %s6658_s1, 2 }
0x1d50   : > { %3672 = vrot.lane.b32.xlu0 %v6229_v44, %s6638_s29 }
0x1d54   : > { %3390 = vrot.lane.b32.xlu2 %v6252_v56, %s6635_s25 }
0x1d9f   : > { %v3307_v37 = vpop.xlane.xlu0 %3306 }
0x1da0   : > { %v3314_v2 = vsub.f32 %v3296_v35, %v3307_v37 }
0x1da2   : > { %v3317_v1 = vmul.f32 1.442695, %v3314_v2 }
0x1da4   : > { %4828 = vpow2.f32 %v3317_v1 }
0x1da7   : > { %v3310_v3 = vpop.xlane.xlu1 %3309 }
0x1da8   : > { %v3315_v41 = vsub.f32 %v3299_v57, %v3310_v3 }
0x1daa   : > { %v4829_v4 = vpop.eup %4828  ;;  %v3319_v46 = vmul.f32 1.442695, %v3315_v41 }
0x1dab   : > { %v3323_v5 = vsel %vm571_vm15, %v4829_v4, 0.0 }
0x1dac   : > { %4830 = vpow2.f32 %v3319_v46  ;;  %3324 = vadd.xlane.f32.xlu0 %v3323_v5 }
0x1daf   : > { %v3313_v6 = vpop.xlane.xlu2 %3312 }
0x1db0   : > { %v3316_v7 = vsub.f32 %v3302_v59, %v3313_v6 }
0x1db2   : > { %v4831_v8 = vpop.eup %4830  ;;  %v3321_v9 = vmul.f32 1.442695, %v3316_v7  ;;  %v3681_v14 = vpop.permute.xlu0 %3680 }
0x1db3   : > { %4435 = vmatpush.xpose.msk.msrb.mxu2 %vm529_vm13, %v3681_v14  ;;  %v3326_v63 = vsel %vm571_vm15, %v4831_v8, 0.0 }
0x1db4   : > { %4832 = vpow2.f32 %v3321_v9  ;;  %3327 = vadd.xlane.f32.xlu1 %v3326_v63 }
0x1db7   : > { %v3391_v10 = vpop.permute.xlu2 %3390 }
0x1db8   : > { %4419 = vmatmul.msk.f32.gmra.mxu2 %vm529_vm13, %v3391_v10 }
0x1dba   : > { %v4833_v12 = vpop.eup %4832  ;;  %v3540_v13 = vpop.permute.xlu0 %3539 }
0x1dbb   : > { %4424 = vmatpush.xpose.msk.msrb.mxu1 %vm529_vm13, %v3540_v13  ;;  %v3329_v15 = vsel %vm578_vm0, %v4833_v12, 0.0 }
0x1dbc   : > { %3330 = vadd.xlane.f32.xlu2 %v3329_v15 }
0x1dbf   : > { %v3679_v23 = vpop.permute.xlu1 %3678 }
0x1dc0   : > { %3537 = vrot.lane.b32.xlu0 %v6207_v22, %s6634_s12  ;;  %4436 = vmatpush.xpose.msk.msrb.mxu2 %vm529_vm13, %v3679_v23 }
0x1dc2   : > { %v3673_v20 = vpop.permute.xlu0 %3672 }
0x1dc3   : > { %4437 = vmatmul.msk.f32.vlgmr.msrb.gmra.mxu2 %vm529_vm13, %v3673_v20 }
0x1dcd   : > { %3529 = vrot.lane.b32.xlu1 %v6229_v44, %s6636_s27 }
0x1dd4   : > { %3535 = vrot.lane.b32.xlu2 %v6201_v18, %s6634_s12  ;;  %s4909_s12 = scalar_lea.hbm %s4908_s22, 1 }
0x1dd5   : > { %p4910_p11 = scmp.ne.s32.totalorder %s4908_s22, %s4909_s12  ;;  %p4915_p1 = scmp.lt.s32.totalorder %s4913_s28, %s4909_s12 }
0x1dd7   : > { %p4911_p12 = pnand %p4910_p11, %p5065_p5  ;;  %p4916_p2 = por %p4915_p1, %p4914_p0 }
0x1dd9   : > { %p4912_p13 = pneg %p4911_p12 }
0x1ddb   : > { %p4917_p3 = pnand %p4916_p2, %p4912_p13 }
0x1dea   : > { %3437 = vmax.xlane.f32.xlu0 %v3436_v48 }
0x1df7   : > { %3440 = vmax.xlane.f32.xlu1 %v3439_v26 }
0x1e1f   : > { %v3325_v27 = vpop.xlane.xlu0 %3324 }
0x1e20   : > { %4834 = vrcp.f32 %v3325_v27 }
0x1e26   : > { %v4835_v29 = vpop.eup %4834 }
0x1e27   : > { %v3335_v30 = vmul.f32 %v4835_v29, %v4829_v4  ;;  %v3328_v54 = vpop.xlane.xlu1 %3327 }
0x1e28   : > { %4836 = vrcp.f32 %v3328_v54 }
0x1e29   : > { %4411 = vmatmul.msk.f32.vlgmr.msra.gmra.mxu1 %vm571_vm15, %v3335_v30 }
0x1e2e   : > { %v4837_v36 = vpop.eup %4836 }
0x1e2f   : > { %v3331_v38 = vpop.xlane.xlu2 %3330  ;;  %v3336_v58 = vmul.f32 %v4837_v36, %v4831_v8 }
0x1e30   : > { %4838 = vrcp.f32 %v3331_v38 }
0x1e31   : > { %4412 = vmatmul.msk.f32.gmra.mxu1 %vm571_vm15, %v3336_v58 }
0x1e32   : > { %v3538_v39 = vpop.permute.xlu0 %3537 }
0x1e33   : > { %4425 = vmatpush.xpose.msk.msrb.mxu1 %vm529_vm13, %v3538_v39 }
0x1e36   : > { %v4839_v40 = vpop.eup %4838 }
0x1e37   : > { %v3536_v18 = vpop.permute.xlu2 %3535  ;;  %v3337_v22 = vmul.f32 %v4839_v40, %v4833_v12 }
0x1e38   : > { %4426 = vmatpush.xpose.msk.msrb.mxu1 %vm529_vm13, %v3536_v18 }
0x1e39   : > { %4413 = vmatmul.msk.f32.gmra.mxu1 %vm571_vm15, %v3337_v22 }
0x1e3b   : > { %v3433_v44 = vpop.f32.mrf.mxu2 }
0x1e3c   : > { %v3442_v45 = vsel %vm578_vm0, %v3433_v44, -inf }
0x1e3d   : > { %3443 = vmax.xlane.f32.xlu2 %v3442_v45 }
0x1e3f   : > { %v3530_v28 = vpop.permute.xlu1 %3529 }
0x1e41   : > { %4427 = vmatmul.msk.f32.vlgmr.msrb.gmra.mxu1 %vm529_vm13, %v3530_v28 }
0x1e46   : > { %v3713_v49 = vpop.f32.mrf.mxu2 }
0x1e47   : > { %v3722_v51 = vsel %vm571_vm15, %v3713_v49, -inf }
0x1e48   : > { %3723 = vmax.xlane.f32.xlu0 %v3722_v51 }
0x1e55   : > { %4604 = vrot.lane.b32.xlu2 %v6226_v42, %s6639_s30 }
0x1e5d   : > { %v3438_v47 = vpop.xlane.xlu0 %3437  ;;  %3759 = vrot.lane.b32.xlu2 %v6216_v43, %s6641_s21 }
0x1e5e   : > { %v3445_v11 = vsub.f32 %v3427_v32, %v3438_v47 }
0x1e60   : > { %v3448_v52 = vmul.f32 1.442695, %v3445_v11 }
0x1e62   : > { %4840 = vpow2.f32 %v3448_v52 }
0x1e65   : > { %3616 = vrot.lane.b32.xlu2 %v6216_v43, %s6640_s11 }
0x1e68   : > { %v6301_v17 = vpop.eup %4840 }
0x1e69   : > { %v3454_v50 = vsel %vm571_vm15, %v6301_v17, 0.0 }
0x1e6a   : > { %v3441_v53 = vpop.xlane.xlu1 %3440  ;;  %3455 = vadd.xlane.f32.xlu0 %v3454_v50 }
0x1e6b   : > { %v3446_v21 = vsub.f32 %v3430_v24, %v3441_v53 }
0x1e6d   : > { %v3450_v16 = vmul.f32 1.442695, %v3446_v21  ;;  %4614 = vrot.lane.b32.xlu2 %v6226_v42, %s6640_s11 }
0x1e6f   : > { %4842 = vpow2.f32 %v3450_v16 }
0x1e75   : > { %v6307_v55 = vpop.eup %4842  ;;  %3676 = vrot.lane.b32.xlu2 %v6252_v56, %s6638_s29 }
0x1e76   : > { %v3457_v35 = vsel %vm571_vm15, %v6307_v55, 0.0 }
0x1e77   : > { %3458 = vadd.xlane.f32.xlu0 %v3457_v35 }
0x1e7d   : > { %3533 = vrot.lane.b32.xlu2 %v6252_v56, %s6636_s27 }
0x1ea6   : > { %v3374_v62 = vpop.f32.mrf.mxu1 }
0x1ea7   : > { %3383 = vst.msk [vmem:[#allocation2] sm:$0xff] %vm529_vm13, %v3374_v62 }
0x1eae   : > { %v3377_v57 = vpop.f32.mrf.mxu1 }
0x1eaf   : > { %3384 = vst.msk [vmem:[#allocation2 + $0x8] sm:$0xff] %vm529_vm13, %v3377_v57 }
0x1eb0   : > { %v3444_v60 = vpop.xlane.xlu2 %3443 }
0x1eb1   : > { %v3447_v59 = vsub.f32 %v3433_v44, %v3444_v60 }
0x1eb3   : > { %v3452_v0 = vmul.f32 1.442695, %v3447_v59 }
0x1eb5   : > { %4844 = vpow2.f32 %v3452_v0 }
0x1eb6   : > { %v3380_v37 = vpop.f32.mrf.mxu1 }
0x1eb7   : > { %3385 = vst.msk [vmem:[#allocation2 + $0x10] sm:$0x1] %vm654_vm3, %v3380_v37 }
0x1eb8   : > { %v4605_v2 = vpop.permute.xlu2 %4604 }
0x1eb9   : > { %v4606_v27 = vunpack.i.l.bf16 %v4605_v2  ;;  %v4607_v29 = vunpack.i.h.bf16 %v4605_v2 }
0x1ebb   : > { %v6318_v1 = vpop.eup %4844  ;;  %v3724_v3 = vpop.xlane.xlu0 %3723 }
0x1ebc   : > { %v3731_v41 = vsub.f32 %v3713_v49, %v3724_v3  ;;  %v3460_v56 = vsel %vm578_vm0, %v6318_v1, 0.0 }
0x1ebd   : > { %3461 = vadd.xlane.f32.xlu0 %v3460_v56 }
0x1ebe   : > { %v3734_v4 = vmul.f32 1.442695, %v3731_v41  ;;  %v3570_v46 = vpop.f32.mrf.mxu1 }
0x1ebf   : > { %v3579_v5 = vsel %vm571_vm15, %v3570_v46, -inf }
0x1ec0   : > { %4846 = vpow2.f32 %v3734_v4  ;;  %3580 = vmax.xlane.f32.xlu1 %v3579_v5  ;;  %v3760_v6 = vpop.permute.xlu2 %3759 }
0x1ec6   : > { %v4847_v7 = vpop.eup %4846 }
0x1ec7   : > { %v3740_v8 = vsel %vm571_vm15, %v4847_v7, 0.0 }
0x1ec8   : > { %3741 = vadd.xlane.f32.xlu0 %v3740_v8  ;;  %v3617_v9 = vpop.permute.xlu2 %3616 }
0x1ec9   : > { %4430 = vmatpush.msk.msrb.mxu0 %vm623_vm14, %v3617_v9  ;;  %v4447_v9 = vld [vmem:[%s6566_s4 + $0x78] sm:$0xff] }
0x1eca   : > { %3845 = vmatpush.msra.mxu1 %v4447_v9 }
0x1ed0   : > { %v4615_v14 = vpop.permute.xlu2 %4614 }
0x1ed1   : > { %v4616_v63 = vunpack.i.l.bf16 %v4615_v14  ;;  %v4617_v10 = vunpack.i.h.bf16 %v4615_v14  ;;  %v4446_v14 = vld [vmem:[%s6566_s4 + $0x70] sm:$0xff] }
0x1ed2   : > { %3846 = vmatpush.msra.mxu1 %v4446_v14  ;;  %v6419_v14 = vperm.slane %v6191_v61, 4 }
0x1ed3   : > { %3645 = vmatpush.msrb.mxu0 %v4616_v63 }
0x1ed5   : > { %3646 = vmatpush.msrb.mxu0 %v4617_v10  ;;  %v4445_v10 = vld [vmem:[%s6566_s4 + $0x68] sm:$0xff] }
0x1ed6   : > { %3847 = vmatpush.msra.mxu1 %v4445_v10  ;;  %v6422_v10 = vperm.slane %v6191_v61, 5 }
0x1ed8   : > { %v3677_v18 = vpop.permute.xlu2 %3676 }
0x1ed9   : > { %3473 = vrot.lane.b32.xlu1 %v6216_v43, %s6639_s30 }
0x1edc   : > { %4609 = vrot.lane.b32.xlu0 %v6226_v42, %s6641_s21 }
0x1edd   : > { %v3456_v12 = vpop.xlane.xlu0 %3455 }
0x1ee0   : > { %v3534_v28 = vpop.permute.xlu2 %3533 }
0x1ee4   : > { %3674 = vrot.lane.b32.xlu0 %v6212_v33, %s6638_s29 }
0x1eea   : > { %v3459_v23 = vpop.xlane.xlu0 %3458 }
0x1eec   : > { %3531 = vrot.lane.b32.xlu0 %v6212_v33, %s6636_s27 }
0x1f30   : > { %v3462_v48 = vpop.xlane.xlu0 %3461 }
0x1f33   : > { %v3581_v13 = vpop.xlane.xlu1 %3580 }
0x1f34   : > { %v3588_v15 = vsub.f32 %v3570_v46, %v3581_v13 }
0x1f36   : > { %v3591_v20 = vmul.f32 1.442695, %v3588_v15 }
0x1f38   : > { %4848 = vpow2.f32 %v3591_v20 }
0x1f39   : > { %4850 = vrcp.f32 %v3456_v12  ;;  %v4444_v12 = vld [vmem:[%s6566_s4 + $0x60] sm:$0xff] }
0x1f3a   : > { %4852 = vrcp.f32 %v3459_v23  ;;  %3848 = vmatpush.msra.mxu1 %v4444_v12 }
0x1f3b   : > { %v3742_v43 = vpop.xlane.xlu0 %3741  ;;  %4854 = vrcp.f32 %v3462_v48 }
0x1f3c   : > { %4856 = vrcp.f32 %v3742_v43 }
0x1f3e   : > { %v4849_v32 = vpop.eup %4848 }
0x1f3f   : > { %v3597_v24 = vsel %vm571_vm15, %v4849_v32, 0.0  ;;  %v4851_v26 = vpop.eup %4850 }
0x1f40   : > { %3598 = vadd.xlane.f32.xlu1 %v3597_v24  ;;  %v3466_v30 = vmul.f32 %v4851_v26, %v6301_v17  ;;  %v4853_v36 = vpop.eup %4852 }
0x1f41   : > { %v3467_v39 = vmul.f32 %v4853_v36, %v6307_v55  ;;  %v4855_v40 = vpop.eup %4854 }
0x1f42   : > { %v3468_v44 = vmul.f32 %v4855_v40, %v6318_v1  ;;  %v4857_v45 = vpop.eup %4856 }
0x1f43   : > { %v3752_v49 = vmul.f32 %v4857_v45, %v4847_v7  ;;  %v6386_v45 = vperm.slane %v6191_v61, 3 }
0x1f4b   : > { %v3474_v42 = vpop.permute.xlu1 %3473 }
0x1f4c   : > { %4420 = vmatpush.msk.msra.mxu3 %vm623_vm14, %v3474_v42 }
0x1f4e   : > { %v4610_v33 = vpop.permute.xlu0 %4609  ;;  %3502 = vmatpush.msra.mxu3 %v4606_v27 }
0x1f4f   : > { %v4611_v54 = vunpack.i.l.bf16 %v4610_v33  ;;  %v4612_v38 = vunpack.i.h.bf16 %v4610_v33 }
0x1f50   : > { %3503 = vmatpush.msra.mxu3 %v4607_v29 }
0x1f51   : > { %4421 = vmatmul.msk.f32.vlgmr.msra.gmra.mxu3 %vm571_vm15, %v3466_v30 }
0x1f52   : > { %4440 = vmatpush.msk.msrb.mxu3 %vm623_vm14, %v3760_v6  ;;  %vm6654_vm14 = vcmask 188544  }
0x1f54   : > { %3788 = vmatpush.msrb.mxu3 %v4611_v54 }
0x1f56   : > { %3789 = vmatpush.msrb.mxu3 %v4612_v38  ;;  %v3675_v58 = vpop.permute.xlu0 %3674 }
0x1f57   : > { %4438 = vmatmul.msk.f32.gmra.mxu2 %vm529_vm13, %v3675_v58 }
0x1f59   : > { %4422 = vmatmul.msk.f32.gmra.mxu3 %vm571_vm15, %v3467_v39 }
0x1f5e   : > { %v3532_v22 = vpop.permute.xlu0 %3531 }
0x1f5f   : > { %4428 = vmatmul.msk.f32.gmra.mxu1 %vm529_vm13, %v3532_v22  ;;  %4439 = vmatmul.msk.f32.gmra.mxu2 %vm529_vm13, %v3677_v18 }
0x1f61   : > { %4423 = vmatmul.msk.f32.gmra.mxu3 %vm571_vm15, %v3468_v44  ;;  %v6383_v44 = vperm.slane %v6191_v61, 2 }
0x1f67   : > { %4429 = vmatmul.msk.f32.gmra.mxu1 %vm529_vm13, %v3534_v28  ;;  %vm6653_vm13 = vcmask 122944  }
0x1f69   : > { %4441 = vmatmul.msk.f32.vlgmr.msrb.gmra.mxu3 %vm571_vm15, %v3752_v49 }
0x1fb3   : > { %v3599_v51 = vpop.xlane.xlu1 %3598 }
0x1fb4   : > { %4858 = vrcp.f32 %v3599_v51 }
0x1fba   : > { %v4859_v47 = vpop.eup %4858 }
0x1fbb   : > { %v3609_v11 = vmul.f32 %v4859_v47, %v4849_v32 }
0x1fbd   : > { %4431 = vmatmul.msk.f32.vlgmr.msrb.gmra.mxu0 %vm571_vm15, %v3609_v11 }
0x1fd4   : > { %v3505_v52 = vpop.f32.mrf.mxu3 }
0x1fd5   : > { %3517 = vrot.lane.b32.xlu0 %v3505_v52, %s6642_s26 }
0x1fda   : > { %v3716_v16 = vpop.f32.mrf.mxu2 }
0x1fdb   : > { %v3725_v55 = vsel %vm571_vm15, %v3716_v16, -inf }
0x1fdc   : > { %v3508_v17 = vpop.f32.mrf.mxu3  ;;  %v3573_v21 = vpop.f32.mrf.mxu1 }
0x1fdd   : > { %v3582_v57 = vsel %vm571_vm15, %v3573_v21, -inf }
0x1fe2   : > { %v3719_v0 = vpop.f32.mrf.mxu2 }
0x1fe3   : > { %v3728_v37 = vsel %vm578_vm0, %v3719_v0, -inf }
0x1fe4   : > { %v3511_v50 = vpop.f32.mrf.mxu3  ;;  %v3576_v35 = vpop.f32.mrf.mxu1 }
0x1fe5   : > { %v3585_v62 = vsel %vm578_vm0, %v3576_v35, -inf }
0x1fec   : > { %v3791_v53 = vpop.f32.mrf.mxu3 }
0x1fed   : > { %3803 = vrot.lane.b32.xlu2 %v3791_v53, %s6643_s20 }
0x1fff   : > { %3726 = vmax.xlane.f32.xlu0 %v3725_v55 }
0x2007   : > { %3586 = vmax.xlane.f32.xlu0 %v3585_v62 }
0x2016   : > { %3583 = vmax.xlane.f32.xlu2 %v3582_v57 }
0x203a   : > { %v3648_v60 = vpop.f32.mrf.mxu0 }
0x203b   : > { %3660 = vrot.lane.b32.xlu1 %v3648_v60, %s6644_s18 }
0x2047   : > { %v3518_v59 = vpop.permute.xlu0 %3517  ;;  %v3804_v4 = vpop.permute.xlu2 %3803 }
0x2048   : > { %3526 = vst.msk [vmem:[#allocation2] sm:$0xff] %vm796_vm4, %v3518_v59 }
0x2065   : > { %3729 = vmax.xlane.f32.xlu1 %v3728_v37  ;;  %v4454_v37 = vld [vmem:[%s6567_s5 + $0x78] sm:$0xff] }
0x2066   : > { %3967 = vmatpush.msra.mxu0 %v4454_v37 }
0x2072   : > { %v3727_v2 = vpop.xlane.xlu0 %3726 }
0x2073   : > { %v3732_v1 = vsub.f32 %v3716_v16, %v3727_v2  ;;  %v4453_v2 = vld [vmem:[%s6567_s5 + $0x70] sm:$0xff] }
0x2074   : > { %3968 = vmatpush.msra.mxu0 %v4453_v2 }
0x2075   : > { %v3736_v3 = vmul.f32 1.442695, %v3732_v1  ;;  %v4452_v1 = vld [vmem:[%s6567_s5 + $0x68] sm:$0xff] }
0x2076   : > { %3969 = vmatpush.msra.mxu0 %v4452_v1 }
0x2077   : > { %4860 = vpow2.f32 %v3736_v3  ;;  %v4451_v3 = vld [vmem:[%s6567_s5 + $0x60] sm:$0xff] }
0x2078   : > { %3970 = vmatpush.msra.mxu0 %v4451_v3 }
0x207a   : > { %v3587_v46 = vpop.xlane.xlu0 %3586 }
0x207b   : > { %v3590_v7 = vsub.f32 %v3576_v35, %v3587_v46 }
0x207d   : > { %v4861_v41 = vpop.eup %4860  ;;  %v3595_v63 = vmul.f32 1.442695, %v3590_v7 }
0x207e   : > { %v3743_v56 = vsel %vm571_vm15, %v4861_v41, 0.0 }
0x207f   : > { %3744 = vadd.xlane.f32.xlu2 %v3743_v56 }
0x2089   : > { %v3584_v5 = vpop.xlane.xlu2 %3583 }
0x208a   : > { %v3589_v6 = vsub.f32 %v3573_v21, %v3584_v5 }
0x208c   : > { %v3593_v8 = vmul.f32 1.442695, %v3589_v6 }
0x208e   : > { %4862 = vpow2.f32 %v3593_v8 }
0x208f   : > { %4864 = vpow2.f32 %v3595_v63 }
0x2094   : > { %v4863_v13 = vpop.eup %4862 }
0x2095   : > { %v3600_v15 = vsel %vm571_vm15, %v4863_v13, 0.0  ;;  %v4865_v23 = vpop.eup %4864 }
0x2096   : > { %3601 = vadd.xlane.f32.xlu0 %v3600_v15  ;;  %v3603_v20 = vsel %vm578_vm0, %v4865_v23, 0.0  ;;  %v4472_v15 = vld [vmem:[%s6568_s6 + $0x1f0] sm:$0xff] }
0x209e   : > { %3604 = vadd.xlane.f32.xlu0 %v3603_v20 }
0x20ad   : > { %v3661_v32 = vpop.permute.xlu1 %3660 }
0x20ae   : > { %3669 = vst.msk [vmem:[#allocation2] sm:$0xff] %vm941_vm5, %v3661_v32  ;;  %v4471_v32 = vld [vmem:[%s6568_s6 + $0x1e8] sm:$0xff] }
0x20af   : > { %3812 = vst.msk [vmem:[#allocation2] sm:$0xff] %vm1086_vm7, %v3804_v4 }
0x20b2   : > { %3519 = vrot.lane.b32.xlu0 %v3508_v17, %s6642_s26 }
0x20b6   : > { %v3815_v48 = vld [vmem:[#allocation2] sm:$0xff] }
0x20b7   : > { %4448 = vmatmul.msk.f32.vlgmr.msra.gmra.mxu1 %vm413_vm1, %v3815_v48 }
0x20ba   : > { %3521 = vrot.lane.b32.xlu0 %v3511_v50, %s6642_s26 }
0x20d8   : > { %v3730_v24 = vpop.xlane.xlu1 %3729 }
0x20d9   : > { %v3733_v43 = vsub.f32 %v3719_v0, %v3730_v24 }
0x20db   : > { %v3738_v42 = vmul.f32 1.442695, %v3733_v43 }
0x20dd   : > { %4866 = vpow2.f32 %v3738_v42 }
0x20e3   : > { %v4867_v26 = vpop.eup %4866 }
0x20e4   : > { %v3746_v27 = vsel %vm578_vm0, %v4867_v26, 0.0 }
0x20e5   : > { %3747 = vadd.xlane.f32.xlu2 %v3746_v27  ;;  %v4469_v27 = vld [vmem:[%s6568_s6 + $0x1d8] sm:$0xff] }
0x20f2   : > { %v3745_v29 = vpop.xlane.xlu2 %3744 }
0x20f3   : > { %4868 = vrcp.f32 %v3745_v29  ;;  %v4468_v29 = vld [vmem:[%s6568_s6 + $0x1d0] sm:$0xff] }
0x20f9   : > { %v4869_v33 = vpop.eup %4868 }
0x20fa   : > { %v3753_v30 = vmul.f32 %v4869_v33, %v4861_v41  ;;  %v4467_v33 = vld [vmem:[%s6568_s6 + $0x1c8] sm:$0xff] }
0x20fc   : > { %4442 = vmatmul.msk.f32.gmra.mxu3 %vm571_vm15, %v3753_v30  ;;  %v4466_v30 = vld [vmem:[%s6568_s6 + $0x1c0] sm:$0xff] }
0x2109   : > { %v3602_v54 = vpop.xlane.xlu0 %3601 }
0x210a   : > { %4870 = vrcp.f32 %v3602_v54  ;;  %v4465_v54 = vld [vmem:[%s6568_s6 + $0x1b8] sm:$0xff] }
0x2110   : > { %v4871_v36 = vpop.eup %4870 }
0x2111   : > { %v3605_v38 = vpop.xlane.xlu0 %3604  ;;  %v3610_v58 = vmul.f32 %v4871_v36, %v4863_v13  ;;  %v4473_v13 = vld [vmem:[%s6568_s6 + $0x1f8] sm:$0xff]  ;;  %v4464_v36 = vld [vmem:[%s6568_s6 + $0x1b0] sm:$0xff] }
0x2112   : > { %4872 = vrcp.f32 %v3605_v38  ;;  %4026 = vmatpush.msra.mxu2 %v4473_v13  ;;  %v4463_v38 = vld [vmem:[%s6568_s6 + $0x1a8] sm:$0xff] }
0x2113   : > { %4432 = vmatmul.msk.f32.gmra.mxu0 %vm571_vm15, %v3610_v58  ;;  %v4462_v58 = vld [vmem:[%s6568_s6 + $0x1a0] sm:$0xff] }
0x2114   : > { %4027 = vmatpush.msra.mxu2 %v4472_v15 }
0x2116   : > { %4028 = vmatpush.msra.mxu2 %v4471_v32 }
0x2118   : > { %v4873_v39 = vpop.eup %4872 }
0x2119   : > { %v3611_v40 = vmul.f32 %v4873_v39, %v4865_v23  ;;  %v4461_v39 = vld [vmem:[%s6568_s6 + $0x198] sm:$0xff] }
0x211b   : > { %4433 = vmatmul.msk.f32.gmra.mxu0 %vm571_vm15, %v3611_v40  ;;  %v4460_v40 = vld [vmem:[%s6568_s6 + $0x190] sm:$0xff] }
0x2124   : > { %v3520_v18 = vpop.permute.xlu0 %3519 }
0x2125   : > { %3527 = vst.msk [vmem:[#allocation2 + $0x8] sm:$0xff] %vm796_vm4, %v3520_v18  ;;  %vm6655_vm4 = vcmask 254144   ;;  %v4459_v18 = vld [vmem:[%s6568_s6 + $0x188] sm:$0xff] }
0x212c   : > { %v3522_v22 = vpop.permute.xlu0 %3521 }
0x212d   : > { %3528 = vst.msk [vmem:[#allocation2 + $0x10] sm:$0x1] %vm6653_vm13, %v3522_v22  ;;  %v4458_v22 = vld [vmem:[%s6568_s6 + $0x180] sm:$0xff] }
0x2134   : > { %v3850_v28 = vpop.f32.mrf.mxu1 }
0x2135   : > { %v3851_v49 = vadd.f32 %v3850_v28, %v6383_v44  ;;  %v6480_v28 = vperm.slane %v6191_v61, 6 }
0x2137   : > { %v3860_v51 = vmul.f32 %v6386_v45, %v3851_v49 }
0x2139   : > { %v6391_v47 = vadd.f32 %v3860_v51, %v6148_v25 }
0x213b   : > { %v3866_v11 = vsel %vm413_vm1, %v6391_v47, 0.0 }
0x213c   : > { %3867 = vadd.xlane.f32.xlu2 %v3866_v11 }
0x2158   : > { %v3748_v52 = vpop.xlane.xlu2 %3747 }
0x2159   : > { %4874 = vrcp.f32 %v3748_v52 }
0x215f   : > { %v4875_v17 = vpop.eup %4874 }
0x2160   : > { %v3754_v50 = vmul.f32 %v4875_v17, %v4867_v26  ;;  %v4470_v26 = vld [vmem:[%s6568_s6 + $0x1e0] sm:$0xff] }
0x2161   : > { %4029 = vmatpush.msra.mxu2 %v4470_v26 }
0x2162   : > { %4443 = vmatmul.msk.f32.gmra.mxu3 %vm571_vm15, %v3754_v50 }
0x2163   : > { %4030 = vmatpush.msra.mxu2 %v4469_v27 }
0x2165   : > { %4031 = vmatpush.msra.mxu2 %v4468_v29 }
0x2167   : > { %4032 = vmatpush.msra.mxu2 %v4467_v33 }
0x2169   : > { %4033 = vmatpush.msra.mxu2 %v4466_v30 }
0x216b   : > { %4034 = vmatpush.msra.mxu2 %v4465_v54 }
0x216d   : > { %4035 = vmatpush.msra.mxu2 %v4464_v36 }
0x216f   : > { %4036 = vmatpush.msra.mxu2 %v4463_v38 }
0x2171   : > { %4037 = vmatpush.msra.mxu2 %v4462_v58 }
0x2173   : > { %4038 = vmatpush.msra.mxu2 %v4461_v39 }
0x2175   : > { %4039 = vmatpush.msra.mxu2 %v4460_v40 }
0x2177   : > { %4040 = vmatpush.msra.mxu2 %v4459_v18 }
0x2179   : > { %4041 = vmatpush.msra.mxu2 %v4458_v22 }
0x217f   : > { %v3794_v57 = vpop.f32.mrf.mxu3 }
0x2190   : > { %v3651_v53 = vpop.f32.mrf.mxu0 }
0x2191   : > { %3662 = vrot.lane.b32.xlu2 %v3651_v53, %s6644_s18 }
0x2198   : > { %v3654_v21 = vpop.f32.mrf.mxu0 }
0x2199   : > { %3664 = vrot.lane.b32.xlu2 %v3654_v21, %s6644_s18 }
0x21af   : > { %v3868_v16 = vpop.xlane.xlu2 %3867 }
0x21b0   : > { %v3875_v25 = vmul.f32 %v3868_v16, %v5134_v34 }
0x21b2   : > { %v3878_v55 = vsub.f32 %v6391_v47, %v3875_v25 }
0x21b4   : > { %v3881_v35 = vmul.f32 %v3878_v55, %v3878_v55 }
0x21b6   : > { %v3884_v62 = vsel %vm413_vm1, %v3881_v35, 0.0 }
0x21b7   : > { %3885 = vadd.xlane.f32.xlu1 %v3884_v62 }
0x21d0   : > { %3805 = vrot.lane.b32.xlu1 %v3794_v57, %s6643_s20 }
0x21e5   : > { %v3797_v60 = vpop.f32.mrf.mxu3 }
0x21e6   : > { %3807 = vrot.lane.b32.xlu0 %v3797_v60, %s6643_s20  ;;  %s350_s20 = sand.u32 1, %s6656_s24  }
0x21e7   : > { %s351_s15 = scalar_lea.vmem [#allocation3], %s350_s20  ;;  %s4113_s17 = scalar_lea.sflag [#allocation4], %s350_s20 }
0x21e8   : > { %s4123_s16 = sshll.u32 %s351_s15, 4  ;;  %s4124_s16 = int_to_ptr.vmem [resolvable:$true] %s4123_s16 }
0x21eb   : > { %v3663_v59 = vpop.permute.xlu2 %3662 }
0x21ec   : > { %3670 = vst.msk [vmem:[#allocation2 + $0x8] sm:$0xff] %vm941_vm5, %v3663_v59 }
0x21f3   : > { %v3665_v0 = vpop.permute.xlu2 %3664 }
0x21f4   : > { %3671 = vst.msk [vmem:[#allocation2 + $0x10] sm:$0x1] %vm6654_vm14, %v3665_v0 }
0x222a   : > { %v3886_v41 = vpop.xlane.xlu1 %3885 }
0x222b   : > { %v3893_v56 = vmul.f32 %v3886_v41, %v5134_v34 }
0x222d   : > { %v3896_v4 = vadd.f32 1e-06, %v3893_v56 }
0x222f   : > { %4876 = vrsqrt.f32 %v3896_v4  ;;  %vm3905_vm0 = vweird.f32 %v3896_v4 }
0x2235   : > { %v4877_v46 = vpop.eup %4876 }
0x2236   : > { %v3900_v5 = vmul.f32 %v4877_v46, %v3896_v4  ;;  %vm3906_vm15 = vweird.f32 %v4877_v46 }
0x2237   : > { %vm3907_vm3 = vmor %vm3905_vm0, %vm3906_vm15 }
0x2238   : > { %v3901_v6 = vmul.f32 %v4877_v46, %v3900_v5 }
0x223a   : > { %v3902_v7 = vmul.f32 0.5, %v3901_v6 }
0x223c   : > { %v3903_v8 = vsub.f32 1.5, %v3902_v7 }
0x223e   : > { %v3904_v9 = vmul.f32 %v4877_v46, %v3903_v8 }
0x2240   : > { %v3908_v63 = vsel %vm3907_vm3, %v4877_v46, %v3904_v9 }
0x2241   : > { %v3929_v12 = vmul.f32 %v3908_v63, %v3878_v55 }
0x2242   : > { %v3806_v23 = vpop.permute.xlu1 %3805 }
0x2243   : > { %v3933_v20 = vmul.f32 %v6419_v14, %v3929_v12  ;;  %3813 = vst.msk [vmem:[#allocation2 + $0x8] sm:$0xff] %vm1086_vm7, %v3806_v23 }
0x2245   : > { %v3937_v48 = vadd.f32 %v6422_v10, %v3933_v20 }
0x2247   : > { %4455 = vmatmul.msk.f32.vlgmr.msra.gmra.mxu0 %vm413_vm1, %v3937_v48 }
0x224a   : > { %v3816_v24 = vld [vmem:[#allocation2 + $0x8] sm:$0xff] }
0x224b   : > { %4449 = vmatmul.msk.f32.gmra.mxu1 %vm413_vm1, %v3816_v24 }
0x2258   : > { %v3808_v43 = vpop.permute.xlu0 %3807 }
0x2259   : > { %3814 = vst.msk [vmem:[#allocation2 + $0x10] sm:$0x1] %vm6655_vm4, %v3808_v43 }
0x2260   : > { %v3817_v42 = vld [vmem:[#allocation2 + $0x10] sm:$0x1] }
0x2261   : > { %4450 = vmatmul.msk.f32.gmra.mxu1 %vm413_vm1, %v3817_v42 }
0x22c4   : > { %v3972_v49 = vpop.f32.mrf.mxu0 }
0x22c5   : > { %v3973_v51 = vadd.f32 %v3972_v49, %v6480_v28 }
0x22c7   : > { %v3981_v11 = vmul.f32 %v3973_v51, %v3973_v51 }
0x22c8   : > { %v3853_v52 = vpop.f32.mrf.mxu1 }
0x22c9   : > { %v3984_v17 = vmul.f32 %v3981_v11, %v3973_v51  ;;  %v3854_v50 = vadd.f32 %v3853_v52, %v6383_v44 }
0x22cb   : > { %v3987_v53 = vmul.f32 0.044715, %v3984_v17  ;;  %v3861_v21 = vmul.f32 %v6386_v45, %v3854_v50 }
0x22cd   : > { %v3990_v16 = vadd.f32 %v3987_v53, %v3973_v51  ;;  %v3864_v25 = vadd.f32 %v3861_v21, %v6153_v31 }
0x22cf   : > { %v3993_v55 = vmul.f32 0.7978846, %v3990_v16  ;;  %v3869_v35 = vsel %vm413_vm1, %v3864_v25, 0.0 }
0x22d0   : > { %3870 = vadd.xlane.f32.xlu1 %v3869_v35  ;;  %v4082_v35 = vld [vmem:[%s6571_s9 + $0x8] sm:$0xff] }
0x22d1   : > { %4878 = vtanh.f32 %v3993_v55  ;;  %v4083_v55 = vld [vmem:[%s6571_s9 + $0x10] sm:$0xff] }
0x22d7   : > { %v4879_v62 = vpop.eup %4878 }
0x22d8   : > { %v3999_v57 = vadd.f32 1.0, %v4879_v62 }
0x22da   : > { %v4002_v60 = vmul.f32 0.5, %v3999_v57 }
0x22dc   : > { %v4005_v59 = vmul.f32 %v4002_v60, %v3973_v51 }
0x22de   : > { %v3856_v0 = vpop.f32.mrf.mxu1  ;;  %4042 = vmatmul.f32.vlgmr.msra.gmra.mxu2 %v4005_v59 }
0x22df   : > { %v3857_v37 = vadd.f32 %v3856_v0, %v6383_v44  ;;  %v4025_v44 = vperm.slane %v6191_v61, 7 }
0x22e1   : > { %v3862_v2 = vmul.f32 %v6386_v45, %v3857_v37 }
0x22e3   : > { %v3865_v1 = vadd.f32 %v3862_v2, %v6158_v19  ;;  %v4621_v19 = vld [vmem:[%s6569_s7 + $0x38] ss:$0 sm:$0xff] }
0x22e5   : > { %v3872_v3 = vsel %vm420_vm2, %v3865_v1, 0.0 }
0x22e6   : > { %3873 = vadd.xlane.f32.xlu2 %v3872_v3 }
0x2343   : > { %v3871_v31 = vpop.xlane.xlu1 %3870 }
0x2344   : > { %v3876_v41 = vmul.f32 %v3871_v31, %v5134_v34 }
0x2346   : > { %v3879_v56 = vsub.f32 %v3864_v25, %v3876_v41  ;;  %v4084_v25 = vld [vmem:[%s6571_s9 + $0x18] sm:$0xff] }
0x2347   : > { %4102 = vmatpush.msra.mxu3 %v4084_v25 }
0x2348   : > { %v3882_v4 = vmul.f32 %v3879_v56, %v3879_v56 }
0x2349   : > { %4103 = vmatpush.msra.mxu3 %v4083_v55 }
0x234a   : > { %v3887_v46 = vsel %vm413_vm1, %v3882_v4, 0.0 }
0x234b   : > { %3888 = vadd.xlane.f32.xlu0 %v3887_v46  ;;  %4104 = vmatpush.msra.mxu3 %v4082_v35 }
0x2359   : > { %v3874_v5 = vpop.xlane.xlu2 %3873 }
0x235a   : > { %v3877_v6 = vmul.f32 %v3874_v5, %v5134_v34 }
0x235c   : > { %v3880_v7 = vsub.f32 %v3865_v1, %v3877_v6 }
0x235e   : > { %v3883_v45 = vmul.f32 %v3880_v7, %v3880_v7 }
0x2360   : > { %v3890_v8 = vsel %vm420_vm2, %v3883_v45, 0.0 }
0x2361   : > { %v4043_v9 = vpop.f32.mrf.mxu2  ;;  %3891 = vadd.xlane.f32.xlu1 %v3890_v8 }
0x2362   : > { %v4044_v63 = vadd.f32 %v4043_v9, %v4025_v44 }
0x2364   : > { %v4051_v12 = vmul.f32 %v4621_v19, %v4044_v63 }
0x2366   : > { %v4052_v13 = vadd.f32 %v4051_v12, %v6391_v47 }
0x2368   : > { %v4054_v15 = vsel %vm420_vm2, %v4052_v13, 0.0 }
0x2369   : > { %4055 = vadd.xlane.f32.xlu2 %v4054_v15 }
0x23be   : > { %v3889_v23 = vpop.xlane.xlu0 %3888 }
0x23bf   : > { %v3894_v20 = vmul.f32 %v3889_v23, %v5134_v34 }
0x23c1   : > { %v3897_v61 = vadd.f32 1e-06, %v3894_v20 }
0x23c3   : > { %4880 = vrsqrt.f32 %v3897_v61  ;;  %vm3915_vm7 = vweird.f32 %v3897_v61 }
0x23c9   : > { %v4881_v32 = vpop.eup %4880 }
0x23ca   : > { %v3910_v48 = vmul.f32 %v4881_v32, %v3897_v61  ;;  %vm3916_vm5 = vweird.f32 %v4881_v32 }
0x23cb   : > { %vm3917_vm6 = vmor %vm3915_vm7, %vm3916_vm5 }
0x23cc   : > { %v3911_v24 = vmul.f32 %v4881_v32, %v3910_v48 }
0x23ce   : > { %v3912_v43 = vmul.f32 0.5, %v3911_v24 }
0x23d0   : > { %v3913_v42 = vsub.f32 1.5, %v3912_v43 }
0x23d2   : > { %v3914_v26 = vmul.f32 %v4881_v32, %v3913_v42 }
0x23d4   : > { %v3918_v27 = vsel %vm3917_vm6, %v4881_v32, %v3914_v26  ;;  %v3892_v29 = vpop.xlane.xlu1 %3891 }
0x23d5   : > { %v3930_v47 = vmul.f32 %v3918_v27, %v3879_v56  ;;  %v3895_v33 = vmul.f32 %v3892_v29, %v5134_v34 }
0x23d7   : > { %v3898_v30 = vadd.f32 1e-06, %v3895_v33  ;;  %v3934_v54 = vmul.f32 %v6419_v14, %v3930_v47 }
0x23d9   : > { %4882 = vrsqrt.f32 %v3898_v30  ;;  %v3938_v36 = vadd.f32 %v6422_v10, %v3934_v54  ;;  %vm3925_vm9 = vweird.f32 %v3898_v30 }
0x23db   : > { %4456 = vmatmul.msk.f32.gmra.mxu0 %vm413_vm1, %v3938_v36 }
0x23dc   : > { %v4056_v38 = vpop.xlane.xlu2 %4055 }
0x23dd   : > { %v4057_v58 = vmul.f32 %v4056_v38, %v5134_v34 }
0x23df   : > { %v4883_v39 = vpop.eup %4882  ;;  %v4058_v40 = vsub.f32 %v4052_v13, %v4057_v58 }
0x23e0   : > { %v3920_v18 = vmul.f32 %v4883_v39, %v3898_v30  ;;  %vm3926_vm8 = vweird.f32 %v4883_v39 }
0x23e1   : > { %v4059_v22 = vmul.f32 %v4058_v40, %v4058_v40  ;;  %vm3927_vm10 = vmor %vm3925_vm9, %vm3926_vm8 }
0x23e2   : > { %v3921_v49 = vmul.f32 %v4883_v39, %v3920_v18 }
0x23e3   : > { %v4060_v51 = vsel %vm420_vm2, %v4059_v22, 0.0 }
0x23e4   : > { %v3922_v11 = vmul.f32 0.5, %v3921_v49  ;;  %4061 = vadd.xlane.f32.xlu0 %v4060_v51 }
0x23e6   : > { %v3923_v52 = vsub.f32 1.5, %v3922_v11 }
0x23e8   : > { %v3924_v17 = vmul.f32 %v4883_v39, %v3923_v52 }
0x23ea   : > { %v3928_v50 = vsel %vm3927_vm10, %v4883_v39, %v3924_v17 }
0x23eb   : > { %v3931_v53 = vmul.f32 %v3928_v50, %v3880_v7 }
0x23ed   : > { %v3935_v21 = vmul.f32 %v6419_v14, %v3931_v53  ;;  %v4081_v14 = vld [vmem:[%s6571_s9] sm:$0xff] }
0x23ee   : > { %4105 = vmatpush.msra.mxu3 %v4081_v14 }
0x23ef   : > { %v3939_v16 = vadd.f32 %v6422_v10, %v3935_v21 }
0x23f1   : > { %4457 = vmatmul.msk.f32.gmra.mxu0 %vm413_vm1, %v3939_v16 }
0x2457   : > { %v4062_v10 = vpop.xlane.xlu0 %4061 }
0x2458   : > { %v4063_v62 = vmul.f32 %v4062_v10, %v5134_v34  ;;  %v3975_v57 = vpop.f32.mrf.mxu0  ;;  %v4053_v34 = vld [vmem:[%s6570_s8] sm:$0x7] }
0x2459   : > { %v3976_v60 = vadd.f32 %v3975_v57, %v6480_v28  ;;  %v4078_v45 = vrot.slane %v4053_v34, 1 }
0x245a   : > { %v4064_v59 = vadd.f32 1e-06, %v4063_v62 }
0x245b   : > { %v3982_v0 = vmul.f32 %v3976_v60, %v3976_v60 }
0x245c   : > { %4884 = vrsqrt.f32 %v4064_v59  ;;  %vm4071_vm11 = vweird.f32 %v4064_v59 }
0x245d   : > { %v3985_v37 = vmul.f32 %v3982_v0, %v3976_v60 }
0x245f   : > { %v3988_v2 = vmul.f32 0.044715, %v3985_v37 }
0x2461   : > { %v3991_v1 = vadd.f32 %v3988_v2, %v3976_v60 }
0x2462   : > { %v4885_v3 = vpop.eup %4884 }
0x2463   : > { %v4066_v31 = vmul.f32 %v4885_v3, %v4064_v59  ;;  %v3994_v41 = vmul.f32 0.7978846, %v3991_v1  ;;  %vm4072_vm2 = vweird.f32 %v4885_v3 }
0x2464   : > { %vm4073_vm12 = vmor %vm4071_vm11, %vm4072_vm2 }
0x2465   : > { %v4067_v56 = vmul.f32 %v4885_v3, %v4066_v31  ;;  %4886 = vtanh.f32 %v3994_v41 }
0x2467   : > { %v4068_v4 = vmul.f32 0.5, %v4067_v56 }
0x2469   : > { %v4069_v46 = vsub.f32 1.5, %v4068_v4 }
0x246b   : > { %v4887_v5 = vpop.eup %4886  ;;  %v4070_v6 = vmul.f32 %v4885_v3, %v4069_v46 }
0x246c   : > { %v4000_v7 = vadd.f32 1.0, %v4887_v5 }
0x246d   : > { %v4074_v44 = vsel %vm4073_vm12, %v4885_v3, %v4070_v6 }
0x246e   : > { %v4075_v19 = vmul.f32 %v4074_v44, %v4058_v40  ;;  %v3978_v8 = vpop.f32.mrf.mxu0  ;;  %v4003_v9 = vmul.f32 0.5, %v4000_v7 }
0x246f   : > { %v3979_v63 = vadd.f32 %v3978_v8, %v6480_v28  ;;  %v4085_v28 = vrot.slane %v4053_v34, 2 }
0x2470   : > { %v4076_v12 = vmul.f32 %v4075_v19, %v4053_v34  ;;  %v4006_v13 = vmul.f32 %v4003_v9, %v3976_v60 }
0x2471   : > { %v3983_v15 = vmul.f32 %v3979_v63, %v3979_v63 }
0x2472   : > { %v4080_v23 = vadd.f32 %v4078_v45, %v4076_v12  ;;  %4045 = vmatmul.f32.gmra.mxu2 %v4006_v13 }
0x2473   : > { %v3986_v20 = vmul.f32 %v3983_v15, %v3979_v63 }
0x2474   : > { %4474 = vmatmul.msk.f32.vlgmr.msra.gmra.mxu3 %vm413_vm1, %v4080_v23  ;;  %vm4110_vm1 = vcmask 73728  }
0x2475   : > { %v3989_v61 = vmul.f32 0.044715, %v3986_v20 }
0x2477   : > { %v3992_v32 = vadd.f32 %v3989_v61, %v3979_v63 }
0x2479   : > { %v3995_v48 = vmul.f32 0.7978846, %v3992_v32 }
0x247b   : > { %4888 = vtanh.f32 %v3995_v48 }
0x2481   : > { %v4889_v24 = vpop.eup %4888 }
0x2482   : > { %v4001_v43 = vadd.f32 1.0, %v4889_v24 }
0x2484   : > { %v4004_v42 = vmul.f32 0.5, %v4001_v43 }
0x2486   : > { %v4007_v26 = vmul.f32 %v4004_v42, %v3979_v63 }
0x2488   : > { %4047 = vmatmul.f32.gmra.mxu2 %v4007_v26 }
0x24f5   : > { %v4046_v27 = vpop.f32.mrf.mxu2 }
0x24f7   : > { %v4107_v29 = vpop.f32.mrf.mxu3 }
0x24f8   : > { %v4108_v47 = vadd.f32 %v4107_v29, %v4085_v28 }
0x24fa   : > { %4111 = vst.msk [vmem:[%s351_s15] sm:$0x1] %vm4110_vm1, %v4108_v47 }
0x24fb   : > { %4920 = shalt.err (!%p4917_p3)
}
0x24fc   : > { %4484 = dma.vmem_to_hbm [thread:$0]  (%p5065_p5), %s4124_s16, 16, %s4126_s14, %s4113_s17  }
0x250b   : > { %v4048_v33 = vpop.f32.mrf.mxu2 }
0x250c PF: > { %s6660_s11 = sld [smem:[#allocation9_spill]] }
0x250d   : > { %s6661_s18 = sld [smem:[#allocation6_spill]] }
0x2512   : > { %p4490_p4 = scmp.ge.s32.totalorder %s6660_s11, 2 }
0x2513   : > { %s4137_s26 = sand.u32 1, %s6661_s18  }
0x2514   : > { %p4487_p7 = pnand %p4490_p4, %p5069_p6  ;;  %s4138_s19 = scalar_lea.sflag [#allocation4], %s4137_s26 }
0x2516   : > { %p4488_p8 = pneg %p4487_p7 }
0x2518   : > { %4938 = dma.done.wait (%p4488_p8), %s4138_s19, 16  }
0x2519   : > { %4940 = vsyncadd (%p4488_p8), %s4138_s19, 4294967280  ;;  %s6663_s16 = sld [smem:[#allocation11_spill]] }
0x251a   : > { %s6664_s13 = sld [smem:[#allocation7_spill]] }
0x251b   : > { %s6665_s14 = sld [smem:[#allocation8_spill]] }
0x251c   : > { %s6666_s15 = sld [smem:[#allocation12_spill]] }
0x251f   : > { %p20_p9 = scmp.ge.s32.totalorder %s6663_s16, 4  }
0x2521   :  { %22 = sbr.rel (!%p20_p9) target bundleno = 8 (0x8), region = 110 }
0x2526   :  { %4143 = vsyncpa [#allocation4], 1 }
0x2527   :  { %4145 = vsyncpa [#allocation4 + $0x1], 1 }

</bundles_post_ra>
